<compile_context>
chip_gen: v5e
topology: v5e:2x2
jax: 0.10.0
libtpu: 0.0.40
codegen_flags: <defaults>
</compile_context>

<pallas_src>
import functools
import math

import jax
import jax.numpy as jnp
from jax.experimental import pallas as pl
from jax.experimental.pallas import tpu as pltpu

_EPS = 1e-5          # torch.nn.LayerNorm default eps
_NEG = -1e30         # mask fill value (f32-safe)


# ------------------------------ small helpers --------------------------------

def _bf16(x):
    return x.astype(jnp.bfloat16)


def _layernorm(x, g, b):
    mean = jnp.mean(x, axis=-1, keepdims=True)
    var = jnp.mean(jnp.square(x - mean), axis=-1, keepdims=True)
    return (x - mean) * jax.lax.rsqrt(var + _EPS) * g + b


def _pick_tile(n, preferred):
    """Largest preferred tile that divides n, else the full dimension."""
    for t in preferred:
        if n % t == 0:
            return t
    return n


def _vmem_limit(weight_arrays, act_bytes, scratch_bytes):
    """Single-buffered weights + double-buffered activation blocks + scratch,
    2x headroom for compiler temporaries, clamped below v7x's 64 MiB VMEM."""
    wbytes = sum(int(a.size) * a.dtype.itemsize for a in weight_arrays)
    est = wbytes + 2 * act_bytes + scratch_bytes
    return int(min(max(2 * est, 16 * 2 ** 20), 56 * 2 ** 20))


# --------- probe: is pipeline_mode=pl.Buffered(1) supported end-to-end? ------

def _probe_buffered_one():
    try:
        def _k(x_ref, o_ref):
            o_ref[...] = x_ref[...] + 1.0
        spec = pl.BlockSpec((8, 128), lambda i: (0, 0),
                            pipeline_mode=pl.Buffered(1))
        out = pl.pallas_call(
            _k,
            out_shape=jax.ShapeDtypeStruct((8, 128), jnp.float32),
            grid=(1,),
            in_specs=[spec],
            out_specs=pl.BlockSpec((8, 128), lambda i: (0, 0)),
        )(jnp.zeros((8, 128), jnp.float32))
        jax.block_until_ready(out)
        return True
    except Exception:
        return False


_BUFFERED_ONE_OK = _probe_buffered_one()


def _const_spec(shape):
    """Full-array block, identical for every grid step (weights / LN params).
    Single pipeline buffer when supported: index-invariant blocks don't need
    double buffering -> halves resident weight VMEM (matters on v7x/v5e)."""
    idx = lambda *_: (0,) * len(shape)
    if _BUFFERED_ONE_OK:
        return pl.BlockSpec(shape, idx, pipeline_mode=pl.Buffered(1))
    return pl.BlockSpec(shape, idx)


# ------------------------------ attention core --------------------------------

def _attend(q, k, v, keep, n_head, ctx_ref):
    """q: (M, D) f32 (already scaled by 1/sqrt(dk)); k, v: (S, D) f32;
    keep: bool broadcastable to (M, S).  Writes per-head context into the
    (M, D) f32 VMEM scratch ctx_ref so a single K=D out-proj can consume it."""
    D = q.shape[-1]
    dk = D // n_head
    for h in range(n_head):
        sl = slice(h * dk, (h + 1) * dk)
        s = jax.lax.dot_general(
            _bf16(q[:, sl]), _bf16(k[:, sl]), (((1,), (1,)), ((), ())),
            preferred_element_type=jnp.float32)                   # (M, S)
        s = jnp.where(keep, s, jnp.float32(_NEG))
        s_max = jnp.max(s, axis=-1, keepdims=True)
        e = jnp.exp(s - s_max)
        denom = jnp.sum(e, axis=-1, keepdims=True)
        p = e * pl.reciprocal(denom, approx=True)
        # wenet zeroes fully-masked attention rows (masked_fill(0)); this second
        # where is load-bearing for padding rows -- do not remove.
        p = jnp.where(keep, p, jnp.float32(0.0))
        ctx_ref[:, sl] = jnp.dot(_bf16(p), _bf16(v[:, sl]),
                                 preferred_element_type=jnp.float32)
    # TODO(synk): when attention GEMMs dominate (long L/T), 128-pad each head's
    # q/k/v columns so dk-wide slices are lane aligned and MXU fill doubles.


# ------------------------- fused decoder-layer kernel -------------------------

def _decoder_layer_kernel(
        lens_ref,                                    # SMEM (B,) int32 (prefetch)
        x_ref,                                       # (L, D) f32  layer input
        mem_ref,                                     # (T, D) f32  encoder output
        memmask_ref,                                 # (1, T) int32 memory mask
        sa_g, sa_b, sa_wqkv, sa_bqkv, sa_wo, sa_bo,              # self-attn
        ca_g, ca_b, ca_wq, ca_bq, ca_wkv, ca_bkv, ca_wo, ca_bo,  # cross-attn
        ff_g, ff_b, ff_w1, ff_b1, ff_w2, ff_b2,                  # feed-forward
        o_ref,                                       # (TILE_L, D) f32 out tile
        qkv_scr,                                     # (L, 3D) f32 scratch
        kvm_scr,                                     # (T, 2D) f32 scratch
        ctx_scr,                                     # (TILE_L, D) f32 scratch
        *, n_head, tile_l):
    b = pl.program_id(0)
    lt = pl.program_id(1)
    L, D = x_ref.shape
    scale = jnp.float32(1.0 / math.sqrt(D // n_head))

    # Hoisted once per batch element (first L tile): full-sequence self-attn
    # QKV and the cross-attn K/V projection of memory, kept in VMEM scratch.
    @pl.when(lt == 0)
    def _():
        xn = _layernorm(x_ref[...], sa_g[...], sa_b[...])
        qkv_scr[...] = jnp.dot(_bf16(xn), sa_wqkv[...],
                               preferred_element_type=jnp.float32) + sa_bqkv[...]
        kvm_scr[...] = jnp.dot(_bf16(mem_ref[...]), ca_wkv[...],
                               preferred_element_type=jnp.float32) + ca_bkv[...]

    row0 = pl.multiple_of(lt * tile_l, tile_l)
    x_t = x_ref[pl.ds(row0, tile_l), :]              # residual-stream tile

    # ------------------------------- self attention --------------------------
    q = qkv_scr[pl.ds(row0, tile_l), 0:D] * scale
    k = qkv_scr[:, D:2 * D]
    v = qkv_scr[:, 2 * D:3 * D]
    rows = jax.lax.broadcasted_iota(jnp.int32, (tile_l, L), 0) + lt * tile_l
    cols = jax.lax.broadcasted_iota(jnp.int32, (tile_l, L), 1)
    keep = (cols <= rows) & (cols < lens_ref[b])     # causal & key-pad mask
    _attend(q, k, v, keep, n_head, ctx_scr)
    sa_out = jnp.dot(_bf16(ctx_scr[...]), sa_wo[...],
                     preferred_element_type=jnp.float32) + sa_bo[...]
    x1 = x_t + sa_out

    # ------------------------------- cross attention -------------------------
    xn1 = _layernorm(x1, ca_g[...], ca_b[...])
    qc = (jnp.dot(_bf16(xn1), ca_wq[...],
                  preferred_element_type=jnp.float32) + ca_bq[...]) * scale
    kc = kvm_scr[:, 0:D]
    vc = kvm_scr[:, D:2 * D]
    keep_m = memmask_ref[...] > 0                    # (1, T) broadcast
    _attend(qc, kc, vc, keep_m, n_head, ctx_scr)
    ca_out = jnp.dot(_bf16(ctx_scr[...]), ca_wo[...],
                     preferred_element_type=jnp.float32) + ca_bo[...]
    x2 = x1 + ca_out

    # ------------------------------------ FFN --------------------------------
    xn2 = _layernorm(x2, ff_g[...], ff_b[...])
    h = jnp.dot(_bf16(xn2), ff_w1[...],
                preferred_element_type=jnp.float32) + ff_b1[...]
    h = jnp.maximum(h, 0.0)                          # ReLU
    ff_out = jnp.dot(_bf16(h), ff_w2[...],
                     preferred_element_type=jnp.float32) + ff_b2[...]
    o_ref[...] = x2 + ff_out


def decoder_layer(x, memory, mem_mask, lens, lp, *, n_head, tile_l):
    B, L, D = x.shape
    T = memory.shape[1]
    ps, pc, pf = lp["self"], lp["cross"], lp["ffn"]
    weights = [
        ps["ln_g"], ps["ln_b"], ps["wqkv"], ps["bqkv"], ps["wo"], ps["bo"],
        pc["ln_g"], pc["ln_b"], pc["wq"], pc["bq"], pc["wkv"], pc["bkv"],
        pc["wo"], pc["bo"],
        pf["ln_g"], pf["ln_b"], pf["w1"], pf["b1"], pf["w2"], pf["b2"],
    ]
    ntl = L // tile_l
    kern = functools.partial(_decoder_layer_kernel, n_head=n_head, tile_l=tile_l)

    grid_spec = pltpu.PrefetchScalarGridSpec(
        num_scalar_prefetch=1,
        grid=(B, ntl),
        in_specs=[
            pl.BlockSpec((None, L, D), lambda b, lt, _lens: (b, 0, 0)),   # x (full L)
            pl.BlockSpec((None, T, D), lambda b, lt, _lens: (b, 0, 0)),   # memory
            pl.BlockSpec((None, 1, T), lambda b, lt, _lens: (b, 0, 0)),   # mem mask
        ] + [_const_spec(w.shape) for w in weights],
        out_specs=pl.BlockSpec((None, tile_l, D), lambda b, lt, _lens: (b, lt, 0)),
        scratch_shapes=[
            pltpu.VMEM((L, 3 * D), jnp.float32),     # self-attn QKV (full seq)
            pltpu.VMEM((T, 2 * D), jnp.float32),     # cross-attn K/V of memory
            pltpu.VMEM((tile_l, D), jnp.float32),    # per-head context slab
        ],
    )
    act_bytes = 4 * (L * D + T * D + T + tile_l * D)
    scr_bytes = 4 * (L * 3 * D + T * 2 * D + tile_l * D)
    vmem = _vmem_limit(weights, act_bytes, scr_bytes)

    return pl.pallas_call(
        kern,
        out_shape=jax.ShapeDtypeStruct((B, L, D), jnp.float32),
        grid_spec=grid_spec,
        compiler_params=pltpu.CompilerParams(
            # batch is parallel (megacore); L-tiles are arbitrary (innermost)
            # because the hoisted QKV/KV scratch carries across them.
            dimension_semantics=("parallel", "arbitrary"),
            vmem_limit_bytes=vmem),
    )(lens, x, memory, mem_mask, *weights)


# --------------------- after_norm + output_layer (tiled GEMM) ----------------

def _output_kernel(x_ref, g_ref, b_ref, w_ref, bo_ref, o_ref):
    # after_norm recomputed per vocab tile (cheap VPU work under the MXU).
    xn = _layernorm(x_ref[...], g_ref[...], b_ref[...])
    o_ref[...] = jnp.dot(_bf16(xn), w_ref[...],
                         preferred_element_type=jnp.float32) + bo_ref[...]


def output_block(x2d, g, b, w, bo, *, tile_m, tile_v):
    M, D = x2d.shape
    V = w.shape[1]
    blk_bytes = (4 * tile_m * D + 2 * D * tile_v + 4 * tile_v
                 + 4 * tile_m * tile_v + 8 * D)
    vmem = int(min(max(4 * blk_bytes, 16 * 2 ** 20), 56 * 2 ** 20))
    return pl.pallas_call(
        _output_kernel,
        out_shape=jax.ShapeDtypeStruct((M, V), jnp.float32),
        grid=(M // tile_m, V // tile_v),
        in_specs=[
            pl.BlockSpec((tile_m, D), lambda m, n: (m, 0)),
            _const_spec((1, D)), _const_spec((1, D)),
            pl.BlockSpec((D, tile_v), lambda m, n: (0, n)),
            pl.BlockSpec((1, tile_v), lambda m, n: (0, n)),
        ],
        out_specs=pl.BlockSpec((tile_m, tile_v), lambda m, n: (m, n)),
        compiler_params=pltpu.CompilerParams(
            dimension_semantics=("parallel", "parallel"),
            vmem_limit_bytes=vmem),
    )(x2d, g, b, w, bo)


# ------------------------------- forward pass --------------------------------

def transformer_decoder_forward(params, memory, memory_mask, ys_in_pad,
                                ys_in_lens, *, n_head):
    """Mirrors TransformerDecoder.forward (eval mode, normalize_before=True,
    concat_after=False, use_output_layer=True)."""
    B, L = ys_in_pad.shape
    D = params["embed"].shape[1]
    V = params["out_w"].shape[1]
    assert params["pe"].shape[0] >= L, (
        "positional-encoding table shorter than the decoded sequence")

    lens = ys_in_lens.astype(jnp.int32)
    mem_mask = memory_mask.astype(jnp.int32)         # compact (B, 1, T) mask

    # embed: Embedding lookup + PositionalEncoding (x*sqrt(D) + pe), dropout=id
    x = params["embed"][ys_in_pad] * jnp.float32(math.sqrt(D))
    x = x + params["pe"][:L][None, :, :]

    tile_l = _pick_tile(L, (128, 256, 64))
    for lp in params["layers"]:
        x = decoder_layer(x, memory, mem_mask, lens, lp,
                          n_head=n_head, tile_l=tile_l)

    M = B * L
    tile_m = _pick_tile(M, (256, 128, 64))
    tile_v = _pick_tile(V, (512, 256, 128))
    logits = output_block(x.reshape(M, D), params["after_norm_g"],
                          params["after_norm_b"], params["out_w"],
                          params["out_b"], tile_m=tile_m, tile_v=tile_v)
    logits = logits.reshape(B, L, V)

    # olens = tgt_mask.sum(1); tgt_mask[b,i,j] = (j < len_b) & (j <= i)
    j = jnp.arange(L, dtype=jnp.int32)
    olens = jnp.where(j[None, :] < lens[:, None], jnp.int32(L) - j[None, :], 0)
    return logits, jnp.float32(0.0), olens


# ------------------------------- parameters ----------------------------------

def make_pe(max_len, d_model):
    pos = jnp.arange(max_len, dtype=jnp.float32)[:, None]
    div = jnp.exp(jnp.arange(0, d_model, 2, dtype=jnp.float32)
                  * (-math.log(10000.0) / d_model))
    pe = jnp.zeros((max_len, d_model), jnp.float32)
    pe = pe.at[:, 0::2].set(jnp.sin(pos * div))
    pe = pe.at[:, 1::2].set(jnp.cos(pos * div))
    return pe


def init_params(key, vocab, d_model, n_head, ffn_dim, n_blocks, max_len=256):
    state = {"key": key}

    def w(shape, scale=0.02, dtype=jnp.bfloat16):
        state["key"], sub = jax.random.split(state["key"])
        return (scale * jax.random.normal(sub, shape, jnp.float32)).astype(dtype)

    def zeros(n):
        return jnp.zeros((1, n), jnp.float32)

    def ones(n):
        return jnp.ones((1, n), jnp.float32)

    layers = []
    for _ in range(n_blocks):
        layers.append({
            "self": {
                "ln_g": ones(d_model), "ln_b": zeros(d_model),
                "wqkv": w((d_model, 3 * d_model)), "bqkv": zeros(3 * d_model),
                "wo": w((d_model, d_model)), "bo": zeros(d_model),
            },
            "cross": {
                "ln_g": ones(d_model), "ln_b": zeros(d_model),
                "wq": w((d_model, d_model)), "bq": zeros(d_model),
                "wkv": w((d_model, 2 * d_model)), "bkv": zeros(2 * d_model),
                "wo": w((d_model, d_model)), "bo": zeros(d_model),
            },
            "ffn": {
                "ln_g": ones(d_model), "ln_b": zeros(d_model),
                "w1": w((d_model, ffn_dim)), "b1": zeros(ffn_dim),
                "w2": w((ffn_dim, d_model)), "b2": zeros(d_model),
            },
        })

    return {
        "embed": w((vocab, d_model), scale=1.0, dtype=jnp.float32),
        "pe": make_pe(max_len, d_model),
        "layers": layers,
        "after_norm_g": ones(d_model),
        "after_norm_b": zeros(d_model),
        "out_w": w((d_model, vocab)),
        "out_b": zeros(vocab),
    }


# ---------------------------------- main --------------------------------------

if __name__ == "__main__":
    key = jax.random.PRNGKey(0)
    B, L, T = 2, 8, 16                       # batch, maxlen_out, maxlen_in
    vocab, d_model, n_head, ffn_dim, n_blocks = 32, 32, 4, 64, 2

    k_param, k_mem, k_tok = jax.random.split(key, 3)
    params = init_params(k_param, vocab, d_model, n_head, ffn_dim, n_blocks)

    memory = jax.random.normal(k_mem, (B, T, d_model), jnp.float32)
    memory_mask = jnp.ones((B, 1, T), dtype=bool)
    ys_in_pad = jax.random.randint(k_tok, (B, L), 0, vocab, dtype=jnp.int32)
    ys_in_lens = jnp.array([8, 5], dtype=jnp.int32)

    fwd = jax.jit(functools.partial(transformer_decoder_forward, n_head=n_head))
    logits, zero, olens = fwd(params, memory, memory_mask, ys_in_pad, ys_in_lens)
    jax.block_until_ready(logits)
    jax.block_until_ready(olens)

    assert logits.shape == (B, L, vocab)
    assert olens.shape == (B, L)
    assert bool(jnp.all(jnp.isfinite(logits)))
    print("KERNEL_OK")
</pallas_src>

<mosaic_0001>
module attributes {stable_mosaic.version = 11 : i64} {
  func.func @_k(%arg0: i32, %arg1: memref<8x128xf32, #tpu.memory_space<vmem>>, %arg2: memref<8x128xf32, #tpu.memory_space<vmem>>) attributes {dimension_semantics = [#tpu.dimension_semantics<arbitrary>], iteration_bounds = array<i64: 1>, scalar_prefetch = 0 : i64, scratch_operands = 0 : i64, tpu.core_type = #tpu.core_type<tc>, window_params = [{pipeline_mode = #tpu.pipeline_mode<synchronous>, transform_indices = @transform_0, window_bounds = array<i64: 8, 128>}, {pipeline_mode = #tpu.pipeline_mode<synchronous>, transform_indices = @transform_1, window_bounds = array<i64: 8, 128>}]} {
    %c0 = arith.constant 0 : index
    %c0_0 = arith.constant 0 : index
    %0 = vector.load %arg1[%c0, %c0_0] : memref<8x128xf32, #tpu.memory_space<vmem>>, vector<8x128xf32>
    %cst = arith.constant 1.000000e+00 : f32
    %1 = vector.broadcast %cst : f32 to vector<8x128xf32>
    %2 = arith.addf %0, %1 : vector<8x128xf32>
    %c0_1 = arith.constant 0 : index
    %c0_2 = arith.constant 0 : index
    %3 = vector.load %arg2[%c0_1, %c0_2] : memref<8x128xf32, #tpu.memory_space<vmem>>, vector<8x128xf32>
    tpu.vector_store %arg2[%c0_1, %c0_2], %2 {strides = array<i32>} : memref<8x128xf32, #tpu.memory_space<vmem>>, vector<8x128xf32>,
    return
  }
  func.func @transform_0(%arg0: i32) -> (i32, i32) {
    %c0_i32 = arith.constant 0 : i32
    %c0_i32_0 = arith.constant 0 : i32
    %c0_i32_1 = arith.constant 0 : i32
    return %c0_i32, %c0_i32_0 : i32, i32
  }
  func.func @transform_1(%arg0: i32) -> (i32, i32) {
    %c0_i32 = arith.constant 0 : i32
    %c0_i32_0 = arith.constant 0 : i32
    %c0_i32_1 = arith.constant 0 : i32
    return %c0_i32, %c0_i32_0 : i32, i32
  }
}

module attributes {stable_mosaic.version = 11 : i64} {
  func.func @_output_kernel(%arg0: i32, %arg1: i32, %arg2: memref<16x32xf32, #tpu.memory_space<vmem>>, %arg3: memref<1x32xf32, #tpu.memory_space<vmem>>, %arg4: memref<1x32xf32, #tpu.memory_space<vmem>>, %arg5: memref<32x32xbf16, #tpu.memory_space<vmem>>, %arg6: memref<1x32xf32, #tpu.memory_space<vmem>>, %arg7: memref<16x32xf32, #tpu.memory_space<vmem>>) attributes {dimension_semantics = [#tpu.dimension_semantics<parallel>, #tpu.dimension_semantics<parallel>], iteration_bounds = array<i64: 1, 1>, scalar_prefetch = 0 : i64, scratch_operands = 0 : i64, tpu.core_type = #tpu.core_type<tc>, window_params = [{transform_indices = @transform_0, window_bounds = array<i64: 16, 32>}, {pipeline_mode = #tpu.pipeline_mode<synchronous>, transform_indices = @transform_1, window_bounds = array<i64: 1, 32>}, {pipeline_mode = #tpu.pipeline_mode<synchronous>, transform_indices = @transform_2, window_bounds = array<i64: 1, 32>}, {transform_indices = @transform_3, window_bounds = array<i64: 32, 32>}, {transform_indices = @transform_4, window_bounds = array<i64: 1, 32>}, {transform_indices = @transform_5, window_bounds = array<i64: 16, 32>}]} {
    %c0 = arith.constant 0 : index
    %c0_0 = arith.constant 0 : index
    %0 = vector.load %arg2[%c0, %c0_0] : memref<16x32xf32, #tpu.memory_space<vmem>>, vector<16x32xf32>
    %c0_1 = arith.constant 0 : index
    %c0_2 = arith.constant 0 : index
    %1 = vector.load %arg3[%c0_1, %c0_2] : memref<1x32xf32, #tpu.memory_space<vmem>>, vector<1x32xf32>
    %c0_3 = arith.constant 0 : index
    %c0_4 = arith.constant 0 : index
    %2 = vector.load %arg4[%c0_3, %c0_4] : memref<1x32xf32, #tpu.memory_space<vmem>>, vector<1x32xf32>
    %cst = arith.constant dense<0.000000e+00> : vector<16xf32>
    %3 = vector.multi_reduction <add>, %0, %cst [1] : vector<16x32xf32> to vector<16xf32>
    %4 = vector.shape_cast %3 : vector<16xf32> to vector<16x1xf32>
    %cst_5 = arith.constant 3.200000e+01 : f32
    %5 = vector.broadcast %cst_5 : f32 to vector<16x1xf32>
    %6 = arith.divf %4, %5 : vector<16x1xf32>
    %7 = vector.broadcast %6 : vector<16x1xf32> to vector<16x32xf32>
    %8 = arith.subf %0, %7 : vector<16x32xf32>
    %9 = arith.mulf %8, %8 : vector<16x32xf32>
    %cst_6 = arith.constant dense<0.000000e+00> : vector<16xf32>
    %10 = vector.multi_reduction <add>, %9, %cst_6 [1] : vector<16x32xf32> to vector<16xf32>
    %11 = vector.shape_cast %10 : vector<16xf32> to vector<16x1xf32>
    %cst_7 = arith.constant 3.200000e+01 : f32
    %12 = vector.broadcast %cst_7 : f32 to vector<16x1xf32>
    %13 = arith.divf %11, %12 : vector<16x1xf32>
    %14 = vector.broadcast %6 : vector<16x1xf32> to vector<16x32xf32>
    %15 = arith.subf %0, %14 : vector<16x32xf32>
    %cst_8 = arith.constant 9.99999974E-6 : f32
    %16 = vector.broadcast %cst_8 : f32 to vector<16x1xf32>
    %17 = arith.addf %13, %16 : vector<16x1xf32>
    %18 = math.rsqrt %17 : vector<16x1xf32>
    %19 = vector.broadcast %18 : vector<16x1xf32> to vector<16x32xf32>
    %20 = arith.mulf %15, %19 : vector<16x32xf32>
    %21 = vector.broadcast %1 : vector<1x32xf32> to vector<16x32xf32>
    %22 = arith.mulf %20, %21 : vector<16x32xf32>
    %23 = vector.broadcast %2 : vector<1x32xf32> to vector<16x32xf32>
    %24 = arith.addf %22, %23 : vector<16x32xf32>
    %25 = arith.truncf %24 : vector<16x32xf32> to vector<16x32xbf16>
    %c0_9 = arith.constant 0 : index
    %c0_10 = arith.constant 0 : index
    %26 = vector.load %arg5[%c0_9, %c0_10] : memref<32x32xbf16, #tpu.memory_space<vmem>>, vector<32x32xbf16>
    %cst_11 = arith.constant dense<0.000000e+00> : vector<16x32xf32>
    %27 = tpu.matmul %25, %26, %cst_11 {dimension_numbers = #tpu.dot_dimension_numbers<[1], [0], [0], [1], [0, 0, 1, 1], [], []>} : vector<16x32xbf16>, vector<32x32xbf16>, vector<16x32xf32> -> vector<16x32xf32>
    %c0_12 = arith.constant 0 : index
    %c0_13 = arith.constant 0 : index
    %28 = vector.load %arg6[%c0_12, %c0_13] : memref<1x32xf32, #tpu.memory_space<vmem>>, vector<1x32xf32>
    %29 = vector.broadcast %28 : vector<1x32xf32> to vector<16x32xf32>
    %30 = arith.addf %27, %29 : vector<16x32xf32>
    %c0_14 = arith.constant 0 : index
    %c0_15 = arith.constant 0 : index
    %31 = vector.load %arg7[%c0_14, %c0_15] : memref<16x32xf32, #tpu.memory_space<vmem>>, vector<16x32xf32>
    tpu.vector_store %arg7[%c0_14, %c0_15], %30 {strides = array<i32>} : memref<16x32xf32, #tpu.memory_space<vmem>>, vector<16x32xf32>,
    return
  }
  func.func @transform_0(%arg0: i32, %arg1: i32) -> (i32, i32) {
    %c0_i32 = arith.constant 0 : i32
    %c0_i32_0 = arith.constant 0 : i32
    return %arg0, %c0_i32 : i32, i32
  }
  func.func @transform_1(%arg0: i32, %arg1: i32) -> (i32, i32) {
    %c0_i32 = arith.constant 0 : i32
    %c0_i32_0 = arith.constant 0 : i32
    %c0_i32_1 = arith.constant 0 : i32
    return %c0_i32, %c0_i32_0 : i32, i32
  }
  func.func @transform_2(%arg0: i32, %arg1: i32) -> (i32, i32) {
    %c0_i32 = arith.constant 0 : i32
    %c0_i32_0 = arith.constant 0 : i32
    %c0_i32_1 = arith.constant 0 : i32
    return %c0_i32, %c0_i32_0 : i32, i32
  }
  func.func @transform_3(%arg0: i32, %arg1: i32) -> (i32, i32) {
    %c0_i32 = arith.constant 0 : i32
    %c0_i32_0 = arith.constant 0 : i32
    return %c0_i32, %arg1 : i32, i32
  }
  func.func @transform_4(%arg0: i32, %arg1: i32) -> (i32, i32) {
    %c0_i32 = arith.constant 0 : i32
    %c0_i32_0 = arith.constant 0 : i32
    return %c0_i32, %arg1 : i32, i32
  }
  func.func @transform_5(%arg0: i32, %arg1: i32) -> (i32, i32) {
    %c0_i32 = arith.constant 0 : i32
    return %arg0, %arg1 : i32, i32
  }
}

module attributes {stable_mosaic.version = 11 : i64} {
  func.func @_decoder_layer_kernel(%arg0: i32, %arg1: i32, %arg2: memref<2xi32, #tpu.memory_space<smem>>, %arg3: memref<1x8x32xf32, #tpu.memory_space<vmem>>, %arg4: memref<1x16x32xf32, #tpu.memory_space<vmem>>, %arg5: memref<1x1x16xi32, #tpu.memory_space<vmem>>, %arg6: memref<1x32xf32, #tpu.memory_space<vmem>>, %arg7: memref<1x32xf32, #tpu.memory_space<vmem>>, %arg8: memref<32x96xbf16, #tpu.memory_space<vmem>>, %arg9: memref<1x96xf32, #tpu.memory_space<vmem>>, %arg10: memref<32x32xbf16, #tpu.memory_space<vmem>>, %arg11: memref<1x32xf32, #tpu.memory_space<vmem>>, %arg12: memref<1x32xf32, #tpu.memory_space<vmem>>, %arg13: memref<1x32xf32, #tpu.memory_space<vmem>>, %arg14: memref<32x32xbf16, #tpu.memory_space<vmem>>, %arg15: memref<1x32xf32, #tpu.memory_space<vmem>>, %arg16: memref<32x64xbf16, #tpu.memory_space<vmem>>, %arg17: memref<1x64xf32, #tpu.memory_space<vmem>>, %arg18: memref<32x32xbf16, #tpu.memory_space<vmem>>, %arg19: memref<1x32xf32, #tpu.memory_space<vmem>>, %arg20: memref<1x32xf32, #tpu.memory_space<vmem>>, %arg21: memref<1x32xf32, #tpu.memory_space<vmem>>, %arg22: memref<32x64xbf16, #tpu.memory_space<vmem>>, %arg23: memref<1x64xf32, #tpu.memory_space<vmem>>, %arg24: memref<64x32xbf16, #tpu.memory_space<vmem>>, %arg25: memref<1x32xf32, #tpu.memory_space<vmem>>, %arg26: memref<1x8x32xf32, #tpu.memory_space<vmem>>, %arg27: memref<8x96xf32, #tpu.memory_space<vmem>>, %arg28: memref<16x64xf32, #tpu.memory_space<vmem>>, %arg29: memref<8x32xf32, #tpu.memory_space<vmem>>) attributes {dimension_semantics = [#tpu.dimension_semantics<parallel>, #tpu.dimension_semantics<arbitrary>], iteration_bounds = array<i64: 2, 1>, scalar_prefetch = 1 : i64, scratch_operands = 3 : i64, tpu.core_type = #tpu.core_type<tc>, window_params = [{transform_indices = @transform_0, window_bounds = array<i64: 1, 8, 32>}, {transform_indices = @transform_1, window_bounds = array<i64: 1, 16, 32>}, {transform_indices = @transform_2, window_bounds = array<i64: 1, 1, 16>}, {pipeline_mode = #tpu.pipeline_mode<synchronous>, transform_indices = @transform_3, window_bounds = array<i64: 1, 32>}, {pipeline_mode = #tpu.pipeline_mode<synchronous>, transform_indices = @transform_4, window_bounds = array<i64: 1, 32>}, {pipeline_mode = #tpu.pipeline_mode<synchronous>, transform_indices = @transform_5, window_bounds = array<i64: 32, 96>}, {pipeline_mode = #tpu.pipeline_mode<synchronous>, transform_indices = @transform_6, window_bounds = array<i64: 1, 96>}, {pipeline_mode = #tpu.pipeline_mode<synchronous>, transform_indices = @transform_7, window_bounds = array<i64: 32, 32>}, {pipeline_mode = #tpu.pipeline_mode<synchronous>, transform_indices = @transform_8, window_bounds = array<i64: 1, 32>}, {pipeline_mode = #tpu.pipeline_mode<synchronous>, transform_indices = @transform_9, window_bounds = array<i64: 1, 32>}, {pipeline_mode = #tpu.pipeline_mode<synchronous>, transform_indices = @transform_10, window_bounds = array<i64: 1, 32>}, {pipeline_mode = #tpu.pipeline_mode<synchronous>, transform_indices = @transform_11, window_bounds = array<i64: 32, 32>}, {pipeline_mode = #tpu.pipeline_mode<synchronous>, transform_indices = @transform_12, window_bounds = array<i64: 1, 32>}, {pipeline_mode = #tpu.pipeline_mode<synchronous>, transform_indices = @transform_13, window_bounds = array<i64: 32, 64>}, {pipeline_mode = #tpu.pipeline_mode<synchronous>, transform_indices = @transform_14, window_bounds = array<i64: 1, 64>}, {pipeline_mode = #tpu.pipeline_mode<synchronous>, transform_indices = @transform_15, window_bounds = array<i64: 32, 32>}, {pipeline_mode = #tpu.pipeline_mode<synchronous>, transform_indices = @transform_16, window_bounds = array<i64: 1, 32>}, {pipeline_mode = #tpu.pipeline_mode<synchronous>, transform_indices = @transform_17, window_bounds = array<i64: 1, 32>}, {pipeline_mode = #tpu.pipeline_mode<synchronous>, transform_indices = @transform_18, window_bounds = array<i64: 1, 32>}, {pipeline_mode = #tpu.pipeline_mode<synchronous>, transform_indices = @transform_19, window_bounds = array<i64: 32, 64>}, {pipeline_mode = #tpu.pipeline_mode<synchronous>, transform_indices = @transform_20, window_bounds = array<i64: 1, 64>}, {pipeline_mode = #tpu.pipeline_mode<synchronous>, transform_indices = @transform_21, window_bounds = array<i64: 64, 32>}, {pipeline_mode = #tpu.pipeline_mode<synchronous>, transform_indices = @transform_22, window_bounds = array<i64: 1, 32>}, {transform_indices = @transform_23, window_bounds = array<i64: 1, 8, 32>}]} {
    %c0_i32 = arith.constant 0 : i32
    %0 = arith.cmpi eq, %arg1, %c0_i32 : i32
    %1 = arith.extui %0 : i1 to i32
    %c0_i32_0 = arith.constant 0 : i32
    %2 = arith.cmpi ne, %1, %c0_i32_0 : i32
    scf.if %2 {
      %c0_127 = arith.constant 0 : index
      %c0_128 = arith.constant 0 : index
      %c0_129 = arith.constant 0 : index
      %329 = vector.load %arg3[%c0_127, %c0_128, %c0_129] : memref<1x8x32xf32, #tpu.memory_space<vmem>>, vector<1x8x32xf32>
      %330 = vector.shape_cast %329 : vector<1x8x32xf32> to vector<8x32xf32>
      %c0_130 = arith.constant 0 : index
      %c0_131 = arith.constant 0 : index
      %331 = vector.load %arg6[%c0_130, %c0_131] : memref<1x32xf32, #tpu.memory_space<vmem>>, vector<1x32xf32>
      %c0_132 = arith.constant 0 : index
      %c0_133 = arith.constant 0 : index
      %332 = vector.load %arg7[%c0_132, %c0_133] : memref<1x32xf32, #tpu.memory_space<vmem>>, vector<1x32xf32>
      %cst_134 = arith.constant dense<0.000000e+00> : vector<8xf32>
      %333 = vector.multi_reduction <add>, %330, %cst_134 [1] : vector<8x32xf32> to vector<8xf32>
      %334 = vector.shape_cast %333 : vector<8xf32> to vector<8x1xf32>
      %cst_135 = arith.constant 3.200000e+01 : f32
      %335 = vector.broadcast %cst_135 : f32 to vector<8x1xf32>
      %336 = arith.divf %334, %335 : vector<8x1xf32>
      %337 = vector.broadcast %336 : vector<8x1xf32> to vector<8x32xf32>
      %338 = arith.subf %330, %337 : vector<8x32xf32>
      %339 = arith.mulf %338, %338 : vector<8x32xf32>
      %cst_136 = arith.constant dense<0.000000e+00> : vector<8xf32>
      %340 = vector.multi_reduction <add>, %339, %cst_136 [1] : vector<8x32xf32> to vector<8xf32>
      %341 = vector.shape_cast %340 : vector<8xf32> to vector<8x1xf32>
      %cst_137 = arith.constant 3.200000e+01 : f32
      %342 = vector.broadcast %cst_137 : f32 to vector<8x1xf32>
      %343 = arith.divf %341, %342 : vector<8x1xf32>
      %344 = vector.broadcast %336 : vector<8x1xf32> to vector<8x32xf32>
      %345 = arith.subf %330, %344 : vector<8x32xf32>
      %cst_138 = arith.constant 9.99999974E-6 : f32
      %346 = vector.broadcast %cst_138 : f32 to vector<8x1xf32>
      %347 = arith.addf %343, %346 : vector<8x1xf32>
      %348 = math.rsqrt %347 : vector<8x1xf32>
      %349 = vector.broadcast %348 : vector<8x1xf32> to vector<8x32xf32>
      %350 = arith.mulf %345, %349 : vector<8x32xf32>
      %351 = vector.broadcast %331 : vector<1x32xf32> to vector<8x32xf32>
      %352 = arith.mulf %350, %351 : vector<8x32xf32>
      %353 = vector.broadcast %332 : vector<1x32xf32> to vector<8x32xf32>
      %354 = arith.addf %352, %353 : vector<8x32xf32>
      %355 = arith.truncf %354 : vector<8x32xf32> to vector<8x32xbf16>
      %c0_139 = arith.constant 0 : index
      %c0_140 = arith.constant 0 : index
      %356 = vector.load %arg8[%c0_139, %c0_140] : memref<32x96xbf16, #tpu.memory_space<vmem>>, vector<32x96xbf16>
      %cst_141 = arith.constant dense<0.000000e+00> : vector<8x96xf32>
      %357 = tpu.matmul %355, %356, %cst_141 {dimension_numbers = #tpu.dot_dimension_numbers<[1], [0], [0], [1], [0, 0, 1, 1], [], []>} : vector<8x32xbf16>, vector<32x96xbf16>, vector<8x96xf32> -> vector<8x96xf32>
      %c0_142 = arith.constant 0 : index
      %c0_143 = arith.constant 0 : index
      %358 = vector.load %arg9[%c0_142, %c0_143] : memref<1x96xf32, #tpu.memory_space<vmem>>, vector<1x96xf32>
      %359 = vector.broadcast %358 : vector<1x96xf32> to vector<8x96xf32>
      %360 = arith.addf %357, %359 : vector<8x96xf32>
      %c0_144 = arith.constant 0 : index
      %c0_145 = arith.constant 0 : index
      %361 = vector.load %arg27[%c0_144, %c0_145] : memref<8x96xf32, #tpu.memory_space<vmem>>, vector<8x96xf32>
      tpu.vector_store %arg27[%c0_144, %c0_145], %360 {strides = array<i32>} : memref<8x96xf32, #tpu.memory_space<vmem>>, vector<8x96xf32>,
      %c0_146 = arith.constant 0 : index
      %c0_147 = arith.constant 0 : index
      %c0_148 = arith.constant 0 : index
      %362 = vector.load %arg4[%c0_146, %c0_147, %c0_148] : memref<1x16x32xf32, #tpu.memory_space<vmem>>, vector<1x16x32xf32>
      %363 = vector.shape_cast %362 : vector<1x16x32xf32> to vector<16x32xf32>
      %364 = arith.truncf %363 : vector<16x32xf32> to vector<16x32xbf16>
      %c0_149 = arith.constant 0 : index
      %c0_150 = arith.constant 0 : index
      %365 = vector.load %arg16[%c0_149, %c0_150] : memref<32x64xbf16, #tpu.memory_space<vmem>>, vector<32x64xbf16>
      %cst_151 = arith.constant dense<0.000000e+00> : vector<16x64xf32>
      %366 = tpu.matmul %364, %365, %cst_151 {dimension_numbers = #tpu.dot_dimension_numbers<[1], [0], [0], [1], [0, 0, 1, 1], [], []>} : vector<16x32xbf16>, vector<32x64xbf16>, vector<16x64xf32> -> vector<16x64xf32>
      %c0_152 = arith.constant 0 : index
      %c0_153 = arith.constant 0 : index
      %367 = vector.load %arg17[%c0_152, %c0_153] : memref<1x64xf32, #tpu.memory_space<vmem>>, vector<1x64xf32>
      %368 = vector.broadcast %367 : vector<1x64xf32> to vector<16x64xf32>
      %369 = arith.addf %366, %368 : vector<16x64xf32>
      %c0_154 = arith.constant 0 : index
      %c0_155 = arith.constant 0 : index
      %370 = vector.load %arg28[%c0_154, %c0_155] : memref<16x64xf32, #tpu.memory_space<vmem>>, vector<16x64xf32>
      tpu.vector_store %arg28[%c0_154, %c0_155], %369 {strides = array<i32>} : memref<16x64xf32, #tpu.memory_space<vmem>>, vector<16x64xf32>,
    } else {
    }
    %c8_i32 = arith.constant 8 : i32
    %3 = arith.muli %arg1, %c8_i32 : i32
    %4 = tpu.assume_multiple %3, 8 : i32
    %c0 = arith.constant 0 : index
    %5 = arith.index_cast %4 : i32 to index
    %c0_1 = arith.constant 0 : index
    %6 = vector.load %arg3[%c0, %5, %c0_1] : memref<1x8x32xf32, #tpu.memory_space<vmem>>, vector<1x8x32xf32>
    %7 = vector.shape_cast %6 : vector<1x8x32xf32> to vector<8x32xf32>
    %8 = arith.index_cast %4 : i32 to index
    %c0_2 = arith.constant 0 : index
    %9 = vector.load %arg27[%8, %c0_2] : memref<8x96xf32, #tpu.memory_space<vmem>>, vector<8x32xf32>
    %cst = arith.constant 0.353553385 : f32
    %10 = vector.broadcast %cst : f32 to vector<8x32xf32>
    %11 = arith.mulf %9, %10 : vector<8x32xf32>
    %c0_3 = arith.constant 0 : index
    %c32 = arith.constant 32 : index
    %12 = vector.load %arg27[%c0_3, %c32] : memref<8x96xf32, #tpu.memory_space<vmem>>, vector<8x32xf32>
    %c0_4 = arith.constant 0 : index
    %c64 = arith.constant 64 : index
    %13 = vector.load %arg27[%c0_4, %c64] : memref<8x96xf32, #tpu.memory_space<vmem>>, vector<8x32xf32>
    %14 = tpu.iota {dimensions = array<i32: 0>} : vector<8x8xi32>
    %c8_i32_5 = arith.constant 8 : i32
    %15 = arith.muli %arg1, %c8_i32_5 : i32
    %16 = vector.broadcast %15 : i32 to vector<8x8xi32>
    %17 = arith.addi %14, %16 : vector<8x8xi32>
    %18 = tpu.iota {dimensions = array<i32: 1>} : vector<8x8xi32>
    %19 = arith.cmpi sle, %18, %17 : vector<8x8xi32>
    %20 = arith.index_cast %arg0 : i32 to index
    %21 = memref.load %arg2[%20] : memref<2xi32, #tpu.memory_space<smem>>
    %22 = vector.broadcast %21 : i32 to vector<8x8xi32>
    %23 = arith.cmpi slt, %18, %22 : vector<8x8xi32>
    %24 = arith.andi %19, %23 : vector<8x8xi1>
    %25 = vector.extract_strided_slice %11 {offsets = [0, 0], sizes = [8, 8], strides = [1, 1]} : vector<8x32xf32> to vector<8x8xf32>
    %26 = arith.truncf %25 : vector<8x8xf32> to vector<8x8xbf16>
    %27 = vector.extract_strided_slice %12 {offsets = [0, 0], sizes = [8, 8], strides = [1, 1]} : vector<8x32xf32> to vector<8x8xf32>
    %28 = arith.truncf %27 : vector<8x8xf32> to vector<8x8xbf16>
    %cst_6 = arith.constant dense<0.000000e+00> : vector<8x8xf32>
    %29 = tpu.matmul %26, %28, %cst_6 {dimension_numbers = #tpu.dot_dimension_numbers<[1], [1], [0], [0], [0, 0, 1, 0], [], []>} : vector<8x8xbf16>, vector<8x8xbf16>, vector<8x8xf32> -> vector<8x8xf32>
    %cst_7 = arith.constant -1.000000e+30 : f32
    %30 = vector.broadcast %cst_7 : f32 to vector<8x8xf32>
    %31 = arith.select %24, %29, %30 : vector<8x8xi1>, vector<8x8xf32>
    %cst_8 = arith.constant dense<0xFF800000> : vector<8xf32>
    %32 = vector.multi_reduction <maximumf>, %31, %cst_8 [1] : vector<8x8xf32> to vector<8xf32>
    %33 = vector.shape_cast %32 : vector<8xf32> to vector<8x1xf32>
    %34 = vector.broadcast %33 : vector<8x1xf32> to vector<8x8xf32>
    %35 = arith.subf %31, %34 : vector<8x8xf32>
    %36 = math.exp %35 : vector<8x8xf32>
    %cst_9 = arith.constant dense<0.000000e+00> : vector<8xf32>
    %37 = vector.multi_reduction <add>, %36, %cst_9 [1] : vector<8x8xf32> to vector<8xf32>
    %38 = vector.shape_cast %37 : vector<8xf32> to vector<8x1xf32>
    %39 = tpu.reciprocal %38 {approx = true} : vector<8x1xf32> -> vector<8x1xf32>
    %40 = vector.broadcast %39 : vector<8x1xf32> to vector<8x8xf32>
    %41 = arith.mulf %36, %40 : vector<8x8xf32>
    %cst_10 = arith.constant 0.000000e+00 : f32
    %42 = vector.broadcast %cst_10 : f32 to vector<8x8xf32>
    %43 = arith.select %24, %41, %42 : vector<8x8xi1>, vector<8x8xf32>
    %44 = arith.truncf %43 : vector<8x8xf32> to vector<8x8xbf16>
    %45 = vector.extract_strided_slice %13 {offsets = [0, 0], sizes = [8, 8], strides = [1, 1]} : vector<8x32xf32> to vector<8x8xf32>
    %46 = arith.truncf %45 : vector<8x8xf32> to vector<8x8xbf16>
    %cst_11 = arith.constant dense<0.000000e+00> : vector<8x8xf32>
    %47 = tpu.matmul %44, %46, %cst_11 {dimension_numbers = #tpu.dot_dimension_numbers<[1], [0], [0], [1], [0, 0, 1, 1], [], []>} : vector<8x8xbf16>, vector<8x8xbf16>, vector<8x8xf32> -> vector<8x8xf32>
    %c0_12 = arith.constant 0 : index
    %c0_13 = arith.constant 0 : index
    %48 = vector.load %arg29[%c0_12, %c0_13] : memref<8x32xf32, #tpu.memory_space<vmem>>, vector<8x8xf32>
    tpu.vector_store %arg29[%c0_12, %c0_13], %47 {strides = array<i32>} : memref<8x32xf32, #tpu.memory_space<vmem>>, vector<8x8xf32>,
    %49 = vector.extract_strided_slice %11 {offsets = [0, 8], sizes = [8, 8], strides = [1, 1]} : vector<8x32xf32> to vector<8x8xf32>
    %50 = arith.truncf %49 : vector<8x8xf32> to vector<8x8xbf16>
    %51 = vector.extract_strided_slice %12 {offsets = [0, 8], sizes = [8, 8], strides = [1, 1]} : vector<8x32xf32> to vector<8x8xf32>
    %52 = arith.truncf %51 : vector<8x8xf32> to vector<8x8xbf16>
    %cst_14 = arith.constant dense<0.000000e+00> : vector<8x8xf32>
    %53 = tpu.matmul %50, %52, %cst_14 {dimension_numbers = #tpu.dot_dimension_numbers<[1], [1], [0], [0], [0, 0, 1, 0], [], []>} : vector<8x8xbf16>, vector<8x8xbf16>, vector<8x8xf32> -> vector<8x8xf32>
    %cst_15 = arith.constant -1.000000e+30 : f32
    %54 = vector.broadcast %cst_15 : f32 to vector<8x8xf32>
    %55 = arith.select %24, %53, %54 : vector<8x8xi1>, vector<8x8xf32>
    %cst_16 = arith.constant dense<0xFF800000> : vector<8xf32>
    %56 = vector.multi_reduction <maximumf>, %55, %cst_16 [1] : vector<8x8xf32> to vector<8xf32>
    %57 = vector.shape_cast %56 : vector<8xf32> to vector<8x1xf32>
    %58 = vector.broadcast %57 : vector<8x1xf32> to vector<8x8xf32>
    %59 = arith.subf %55, %58 : vector<8x8xf32>
    %60 = math.exp %59 : vector<8x8xf32>
    %cst_17 = arith.constant dense<0.000000e+00> : vector<8xf32>
    %61 = vector.multi_reduction <add>, %60, %cst_17 [1] : vector<8x8xf32> to vector<8xf32>
    %62 = vector.shape_cast %61 : vector<8xf32> to vector<8x1xf32>
    %63 = tpu.reciprocal %62 {approx = true} : vector<8x1xf32> -> vector<8x1xf32>
    %64 = vector.broadcast %63 : vector<8x1xf32> to vector<8x8xf32>
    %65 = arith.mulf %60, %64 : vector<8x8xf32>
    %cst_18 = arith.constant 0.000000e+00 : f32
    %66 = vector.broadcast %cst_18 : f32 to vector<8x8xf32>
    %67 = arith.select %24, %65, %66 : vector<8x8xi1>, vector<8x8xf32>
    %68 = arith.truncf %67 : vector<8x8xf32> to vector<8x8xbf16>
    %69 = vector.extract_strided_slice %13 {offsets = [0, 8], sizes = [8, 8], strides = [1, 1]} : vector<8x32xf32> to vector<8x8xf32>
    %70 = arith.truncf %69 : vector<8x8xf32> to vector<8x8xbf16>
    %cst_19 = arith.constant dense<0.000000e+00> : vector<8x8xf32>
    %71 = tpu.matmul %68, %70, %cst_19 {dimension_numbers = #tpu.dot_dimension_numbers<[1], [0], [0], [1], [0, 0, 1, 1], [], []>} : vector<8x8xbf16>, vector<8x8xbf16>, vector<8x8xf32> -> vector<8x8xf32>
    %c0_20 = arith.constant 0 : index
    %c8 = arith.constant 8 : index
    %72 = vector.load %arg29[%c0_20, %c8] : memref<8x32xf32, #tpu.memory_space<vmem>>, vector<8x8xf32>
    tpu.vector_store %arg29[%c0_20, %c8], %71 {strides = array<i32>} : memref<8x32xf32, #tpu.memory_space<vmem>>, vector<8x8xf32>,
    %73 = vector.extract_strided_slice %11 {offsets = [0, 16], sizes = [8, 8], strides = [1, 1]} : vector<8x32xf32> to vector<8x8xf32>
    %74 = arith.truncf %73 : vector<8x8xf32> to vector<8x8xbf16>
    %75 = vector.extract_strided_slice %12 {offsets = [0, 16], sizes = [8, 8], strides = [1, 1]} : vector<8x32xf32> to vector<8x8xf32>
    %76 = arith.truncf %75 : vector<8x8xf32> to vector<8x8xbf16>
    %cst_21 = arith.constant dense<0.000000e+00> : vector<8x8xf32>
    %77 = tpu.matmul %74, %76, %cst_21 {dimension_numbers = #tpu.dot_dimension_numbers<[1], [1], [0], [0], [0, 0, 1, 0], [], []>} : vector<8x8xbf16>, vector<8x8xbf16>, vector<8x8xf32> -> vector<8x8xf32>
    %cst_22 = arith.constant -1.000000e+30 : f32
    %78 = vector.broadcast %cst_22 : f32 to vector<8x8xf32>
    %79 = arith.select %24, %77, %78 : vector<8x8xi1>, vector<8x8xf32>
    %cst_23 = arith.constant dense<0xFF800000> : vector<8xf32>
    %80 = vector.multi_reduction <maximumf>, %79, %cst_23 [1] : vector<8x8xf32> to vector<8xf32>
    %81 = vector.shape_cast %80 : vector<8xf32> to vector<8x1xf32>
    %82 = vector.broadcast %81 : vector<8x1xf32> to vector<8x8xf32>
    %83 = arith.subf %79, %82 : vector<8x8xf32>
    %84 = math.exp %83 : vector<8x8xf32>
    %cst_24 = arith.constant dense<0.000000e+00> : vector<8xf32>
    %85 = vector.multi_reduction <add>, %84, %cst_24 [1] : vector<8x8xf32> to vector<8xf32>
    %86 = vector.shape_cast %85 : vector<8xf32> to vector<8x1xf32>
    %87 = tpu.reciprocal %86 {approx = true} : vector<8x1xf32> -> vector<8x1xf32>
    %88 = vector.broadcast %87 : vector<8x1xf32> to vector<8x8xf32>
    %89 = arith.mulf %84, %88 : vector<8x8xf32>
    %cst_25 = arith.constant 0.000000e+00 : f32
    %90 = vector.broadcast %cst_25 : f32 to vector<8x8xf32>
    %91 = arith.select %24, %89, %90 : vector<8x8xi1>, vector<8x8xf32>
    %92 = arith.truncf %91 : vector<8x8xf32> to vector<8x8xbf16>
    %93 = vector.extract_strided_slice %13 {offsets = [0, 16], sizes = [8, 8], strides = [1, 1]} : vector<8x32xf32> to vector<8x8xf32>
    %94 = arith.truncf %93 : vector<8x8xf32> to vector<8x8xbf16>
    %cst_26 = arith.constant dense<0.000000e+00> : vector<8x8xf32>
    %95 = tpu.matmul %92, %94, %cst_26 {dimension_numbers = #tpu.dot_dimension_numbers<[1], [0], [0], [1], [0, 0, 1, 1], [], []>} : vector<8x8xbf16>, vector<8x8xbf16>, vector<8x8xf32> -> vector<8x8xf32>
    %c0_27 = arith.constant 0 : index
    %c16 = arith.constant 16 : index
    %96 = vector.load %arg29[%c0_27, %c16] : memref<8x32xf32, #tpu.memory_space<vmem>>, vector<8x8xf32>
    tpu.vector_store %arg29[%c0_27, %c16], %95 {strides = array<i32>} : memref<8x32xf32, #tpu.memory_space<vmem>>, vector<8x8xf32>,
    %97 = vector.extract_strided_slice %11 {offsets = [0, 24], sizes = [8, 8], strides = [1, 1]} : vector<8x32xf32> to vector<8x8xf32>
    %98 = arith.truncf %97 : vector<8x8xf32> to vector<8x8xbf16>
    %99 = vector.extract_strided_slice %12 {offsets = [0, 24], sizes = [8, 8], strides = [1, 1]} : vector<8x32xf32> to vector<8x8xf32>
    %100 = arith.truncf %99 : vector<8x8xf32> to vector<8x8xbf16>
    %cst_28 = arith.constant dense<0.000000e+00> : vector<8x8xf32>
    %101 = tpu.matmul %98, %100, %cst_28 {dimension_numbers = #tpu.dot_dimension_numbers<[1], [1], [0], [0], [0, 0, 1, 0], [], []>} : vector<8x8xbf16>, vector<8x8xbf16>, vector<8x8xf32> -> vector<8x8xf32>
    %cst_29 = arith.constant -1.000000e+30 : f32
    %102 = vector.broadcast %cst_29 : f32 to vector<8x8xf32>
    %103 = arith.select %24, %101, %102 : vector<8x8xi1>, vector<8x8xf32>
    %cst_30 = arith.constant dense<0xFF800000> : vector<8xf32>
    %104 = vector.multi_reduction <maximumf>, %103, %cst_30 [1] : vector<8x8xf32> to vector<8xf32>
    %105 = vector.shape_cast %104 : vector<8xf32> to vector<8x1xf32>
    %106 = vector.broadcast %105 : vector<8x1xf32> to vector<8x8xf32>
    %107 = arith.subf %103, %106 : vector<8x8xf32>
    %108 = math.exp %107 : vector<8x8xf32>
    %cst_31 = arith.constant dense<0.000000e+00> : vector<8xf32>
    %109 = vector.multi_reduction <add>, %108, %cst_31 [1] : vector<8x8xf32> to vector<8xf32>
    %110 = vector.shape_cast %109 : vector<8xf32> to vector<8x1xf32>
    %111 = tpu.reciprocal %110 {approx = true} : vector<8x1xf32> -> vector<8x1xf32>
    %112 = vector.broadcast %111 : vector<8x1xf32> to vector<8x8xf32>
    %113 = arith.mulf %108, %112 : vector<8x8xf32>
    %cst_32 = arith.constant 0.000000e+00 : f32
    %114 = vector.broadcast %cst_32 : f32 to vector<8x8xf32>
    %115 = arith.select %24, %113, %114 : vector<8x8xi1>, vector<8x8xf32>
    %116 = arith.truncf %115 : vector<8x8xf32> to vector<8x8xbf16>
    %117 = vector.extract_strided_slice %13 {offsets = [0, 24], sizes = [8, 8], strides = [1, 1]} : vector<8x32xf32> to vector<8x8xf32>
    %118 = arith.truncf %117 : vector<8x8xf32> to vector<8x8xbf16>
    %cst_33 = arith.constant dense<0.000000e+00> : vector<8x8xf32>
    %119 = tpu.matmul %116, %118, %cst_33 {dimension_numbers = #tpu.dot_dimension_numbers<[1], [0], [0], [1], [0, 0, 1, 1], [], []>} : vector<8x8xbf16>, vector<8x8xbf16>, vector<8x8xf32> -> vector<8x8xf32>
    %c0_34 = arith.constant 0 : index
    %c24 = arith.constant 24 : index
    %120 = vector.load %arg29[%c0_34, %c24] : memref<8x32xf32, #tpu.memory_space<vmem>>, vector<8x8xf32>
    tpu.vector_store %arg29[%c0_34, %c24], %119 {strides = array<i32>} : memref<8x32xf32, #tpu.memory_space<vmem>>, vector<8x8xf32>,
    %c0_35 = arith.constant 0 : index
    %c0_36 = arith.constant 0 : index
    %121 = vector.load %arg29[%c0_35, %c0_36] : memref<8x32xf32, #tpu.memory_space<vmem>>, vector<8x32xf32>
    %122 = arith.truncf %121 : vector<8x32xf32> to vector<8x32xbf16>
    %c0_37 = arith.constant 0 : index
    %c0_38 = arith.constant 0 : index
    %123 = vector.load %arg10[%c0_37, %c0_38] : memref<32x32xbf16, #tpu.memory_space<vmem>>, vector<32x32xbf16>
    %cst_39 = arith.constant dense<0.000000e+00> : vector<8x32xf32>
    %124 = tpu.matmul %122, %123, %cst_39 {dimension_numbers = #tpu.dot_dimension_numbers<[1], [0], [0], [1], [0, 0, 1, 1], [], []>} : vector<8x32xbf16>, vector<32x32xbf16>, vector<8x32xf32> -> vector<8x32xf32>
    %c0_40 = arith.constant 0 : index
    %c0_41 = arith.constant 0 : index
    %125 = vector.load %arg11[%c0_40, %c0_41] : memref<1x32xf32, #tpu.memory_space<vmem>>, vector<1x32xf32>
    %126 = vector.broadcast %125 : vector<1x32xf32> to vector<8x32xf32>
    %127 = arith.addf %124, %126 : vector<8x32xf32>
    %128 = arith.addf %7, %127 : vector<8x32xf32>
    %c0_42 = arith.constant 0 : index
    %c0_43 = arith.constant 0 : index
    %129 = vector.load %arg12[%c0_42, %c0_43] : memref<1x32xf32, #tpu.memory_space<vmem>>, vector<1x32xf32>
    %c0_44 = arith.constant 0 : index
    %c0_45 = arith.constant 0 : index
    %130 = vector.load %arg13[%c0_44, %c0_45] : memref<1x32xf32, #tpu.memory_space<vmem>>, vector<1x32xf32>
    %cst_46 = arith.constant dense<0.000000e+00> : vector<8xf32>
    %131 = vector.multi_reduction <add>, %128, %cst_46 [1] : vector<8x32xf32> to vector<8xf32>
    %132 = vector.shape_cast %131 : vector<8xf32> to vector<8x1xf32>
    %cst_47 = arith.constant 3.200000e+01 : f32
    %133 = vector.broadcast %cst_47 : f32 to vector<8x1xf32>
    %134 = arith.divf %132, %133 : vector<8x1xf32>
    %135 = vector.broadcast %134 : vector<8x1xf32> to vector<8x32xf32>
    %136 = arith.subf %128, %135 : vector<8x32xf32>
    %137 = arith.mulf %136, %136 : vector<8x32xf32>
    %cst_48 = arith.constant dense<0.000000e+00> : vector<8xf32>
    %138 = vector.multi_reduction <add>, %137, %cst_48 [1] : vector<8x32xf32> to vector<8xf32>
    %139 = vector.shape_cast %138 : vector<8xf32> to vector<8x1xf32>
    %cst_49 = arith.constant 3.200000e+01 : f32
    %140 = vector.broadcast %cst_49 : f32 to vector<8x1xf32>
    %141 = arith.divf %139, %140 : vector<8x1xf32>
    %142 = vector.broadcast %134 : vector<8x1xf32> to vector<8x32xf32>
    %143 = arith.subf %128, %142 : vector<8x32xf32>
    %cst_50 = arith.constant 9.99999974E-6 : f32
    %144 = vector.broadcast %cst_50 : f32 to vector<8x1xf32>
    %145 = arith.addf %141, %144 : vector<8x1xf32>
    %146 = math.rsqrt %145 : vector<8x1xf32>
    %147 = vector.broadcast %146 : vector<8x1xf32> to vector<8x32xf32>
    %148 = arith.mulf %143, %147 : vector<8x32xf32>
    %149 = vector.broadcast %129 : vector<1x32xf32> to vector<8x32xf32>
    %150 = arith.mulf %148, %149 : vector<8x32xf32>
    %151 = vector.broadcast %130 : vector<1x32xf32> to vector<8x32xf32>
    %152 = arith.addf %150, %151 : vector<8x32xf32>
    %153 = arith.truncf %152 : vector<8x32xf32> to vector<8x32xbf16>
    %c0_51 = arith.constant 0 : index
    %c0_52 = arith.constant 0 : index
    %154 = vector.load %arg14[%c0_51, %c0_52] : memref<32x32xbf16, #tpu.memory_space<vmem>>, vector<32x32xbf16>
    %cst_53 = arith.constant dense<0.000000e+00> : vector<8x32xf32>
    %155 = tpu.matmul %153, %154, %cst_53 {dimension_numbers = #tpu.dot_dimension_numbers<[1], [0], [0], [1], [0, 0, 1, 1], [], []>} : vector<8x32xbf16>, vector<32x32xbf16>, vector<8x32xf32> -> vector<8x32xf32>
    %c0_54 = arith.constant 0 : index
    %c0_55 = arith.constant 0 : index
    %156 = vector.load %arg15[%c0_54, %c0_55] : memref<1x32xf32, #tpu.memory_space<vmem>>, vector<1x32xf32>
    %157 = vector.broadcast %156 : vector<1x32xf32> to vector<8x32xf32>
    %158 = arith.addf %155, %157 : vector<8x32xf32>
    %cst_56 = arith.constant 0.353553385 : f32
    %159 = vector.broadcast %cst_56 : f32 to vector<8x32xf32>
    %160 = arith.mulf %158, %159 : vector<8x32xf32>
    %c0_57 = arith.constant 0 : index
    %c0_58 = arith.constant 0 : index
    %161 = vector.load %arg28[%c0_57, %c0_58] : memref<16x64xf32, #tpu.memory_space<vmem>>, vector<16x32xf32>
    %c0_59 = arith.constant 0 : index
    %c32_60 = arith.constant 32 : index
    %162 = vector.load %arg28[%c0_59, %c32_60] : memref<16x64xf32, #tpu.memory_space<vmem>>, vector<16x32xf32>
    %c0_61 = arith.constant 0 : index
    %c0_62 = arith.constant 0 : index
    %c0_63 = arith.constant 0 : index
    %163 = vector.load %arg5[%c0_61, %c0_62, %c0_63] : memref<1x1x16xi32, #tpu.memory_space<vmem>>, vector<1x1x16xi32>
    %164 = vector.shape_cast %163 : vector<1x1x16xi32> to vector<1x16xi32>
    %c0_i32_64 = arith.constant 0 : i32
    %165 = vector.broadcast %c0_i32_64 : i32 to vector<1x16xi32>
    %166 = arith.cmpi sgt, %164, %165 : vector<1x16xi32>
    %167 = vector.extract_strided_slice %160 {offsets = [0, 0], sizes = [8, 8], strides = [1, 1]} : vector<8x32xf32> to vector<8x8xf32>
    %168 = arith.truncf %167 : vector<8x8xf32> to vector<8x8xbf16>
    %169 = vector.extract_strided_slice %161 {offsets = [0, 0], sizes = [16, 8], strides = [1, 1]} : vector<16x32xf32> to vector<16x8xf32>
    %170 = arith.truncf %169 : vector<16x8xf32> to vector<16x8xbf16>
    %cst_65 = arith.constant dense<0.000000e+00> : vector<8x16xf32>
    %171 = tpu.matmul %168, %170, %cst_65 {dimension_numbers = #tpu.dot_dimension_numbers<[1], [1], [0], [0], [0, 0, 1, 0], [], []>} : vector<8x8xbf16>, vector<16x8xbf16>, vector<8x16xf32> -> vector<8x16xf32>
    %cst_66 = arith.constant -1.000000e+30 : f32
    %172 = vector.shape_cast %166 : vector<1x16xi1> to vector<1x16xi1>
    %173 = vector.broadcast %172 : vector<1x16xi1> to vector<8x16xi1>
    %174 = vector.broadcast %cst_66 : f32 to vector<8x16xf32>
    %175 = arith.select %173, %171, %174 : vector<8x16xi1>, vector<8x16xf32>
    %cst_67 = arith.constant dense<0xFF800000> : vector<8xf32>
    %176 = vector.multi_reduction <maximumf>, %175, %cst_67 [1] : vector<8x16xf32> to vector<8xf32>
    %177 = vector.shape_cast %176 : vector<8xf32> to vector<8x1xf32>
    %178 = vector.broadcast %177 : vector<8x1xf32> to vector<8x16xf32>
    %179 = arith.subf %175, %178 : vector<8x16xf32>
    %180 = math.exp %179 : vector<8x16xf32>
    %cst_68 = arith.constant dense<0.000000e+00> : vector<8xf32>
    %181 = vector.multi_reduction <add>, %180, %cst_68 [1] : vector<8x16xf32> to vector<8xf32>
    %182 = vector.shape_cast %181 : vector<8xf32> to vector<8x1xf32>
    %183 = tpu.reciprocal %182 {approx = true} : vector<8x1xf32> -> vector<8x1xf32>
    %184 = vector.broadcast %183 : vector<8x1xf32> to vector<8x16xf32>
    %185 = arith.mulf %180, %184 : vector<8x16xf32>
    %cst_69 = arith.constant 0.000000e+00 : f32
    %186 = vector.shape_cast %166 : vector<1x16xi1> to vector<1x16xi1>
    %187 = vector.broadcast %186 : vector<1x16xi1> to vector<8x16xi1>
    %188 = vector.broadcast %cst_69 : f32 to vector<8x16xf32>
    %189 = arith.select %187, %185, %188 : vector<8x16xi1>, vector<8x16xf32>
    %190 = arith.truncf %189 : vector<8x16xf32> to vector<8x16xbf16>
    %191 = vector.extract_strided_slice %162 {offsets = [0, 0], sizes = [16, 8], strides = [1, 1]} : vector<16x32xf32> to vector<16x8xf32>
    %192 = arith.truncf %191 : vector<16x8xf32> to vector<16x8xbf16>
    %cst_70 = arith.constant dense<0.000000e+00> : vector<8x8xf32>
    %193 = tpu.matmul %190, %192, %cst_70 {dimension_numbers = #tpu.dot_dimension_numbers<[1], [0], [0], [1], [0, 0, 1, 1], [], []>} : vector<8x16xbf16>, vector<16x8xbf16>, vector<8x8xf32> -> vector<8x8xf32>
    %c0_71 = arith.constant 0 : index
    %c0_72 = arith.constant 0 : index
    %194 = vector.load %arg29[%c0_71, %c0_72] : memref<8x32xf32, #tpu.memory_space<vmem>>, vector<8x8xf32>
    tpu.vector_store %arg29[%c0_71, %c0_72], %193 {strides = array<i32>} : memref<8x32xf32, #tpu.memory_space<vmem>>, vector<8x8xf32>,
    %195 = vector.extract_strided_slice %160 {offsets = [0, 8], sizes = [8, 8], strides = [1, 1]} : vector<8x32xf32> to vector<8x8xf32>
    %196 = arith.truncf %195 : vector<8x8xf32> to vector<8x8xbf16>
    %197 = vector.extract_strided_slice %161 {offsets = [0, 8], sizes = [16, 8], strides = [1, 1]} : vector<16x32xf32> to vector<16x8xf32>
    %198 = arith.truncf %197 : vector<16x8xf32> to vector<16x8xbf16>
    %cst_73 = arith.constant dense<0.000000e+00> : vector<8x16xf32>
    %199 = tpu.matmul %196, %198, %cst_73 {dimension_numbers = #tpu.dot_dimension_numbers<[1], [1], [0], [0], [0, 0, 1, 0], [], []>} : vector<8x8xbf16>, vector<16x8xbf16>, vector<8x16xf32> -> vector<8x16xf32>
    %cst_74 = arith.constant -1.000000e+30 : f32
    %200 = vector.shape_cast %166 : vector<1x16xi1> to vector<1x16xi1>
    %201 = vector.broadcast %200 : vector<1x16xi1> to vector<8x16xi1>
    %202 = vector.broadcast %cst_74 : f32 to vector<8x16xf32>
    %203 = arith.select %201, %199, %202 : vector<8x16xi1>, vector<8x16xf32>
    %cst_75 = arith.constant dense<0xFF800000> : vector<8xf32>
    %204 = vector.multi_reduction <maximumf>, %203, %cst_75 [1] : vector<8x16xf32> to vector<8xf32>
    %205 = vector.shape_cast %204 : vector<8xf32> to vector<8x1xf32>
    %206 = vector.broadcast %205 : vector<8x1xf32> to vector<8x16xf32>
    %207 = arith.subf %203, %206 : vector<8x16xf32>
    %208 = math.exp %207 : vector<8x16xf32>
    %cst_76 = arith.constant dense<0.000000e+00> : vector<8xf32>
    %209 = vector.multi_reduction <add>, %208, %cst_76 [1] : vector<8x16xf32> to vector<8xf32>
    %210 = vector.shape_cast %209 : vector<8xf32> to vector<8x1xf32>
    %211 = tpu.reciprocal %210 {approx = true} : vector<8x1xf32> -> vector<8x1xf32>
    %212 = vector.broadcast %211 : vector<8x1xf32> to vector<8x16xf32>
    %213 = arith.mulf %208, %212 : vector<8x16xf32>
    %cst_77 = arith.constant 0.000000e+00 : f32
    %214 = vector.shape_cast %166 : vector<1x16xi1> to vector<1x16xi1>
    %215 = vector.broadcast %214 : vector<1x16xi1> to vector<8x16xi1>
    %216 = vector.broadcast %cst_77 : f32 to vector<8x16xf32>
    %217 = arith.select %215, %213, %216 : vector<8x16xi1>, vector<8x16xf32>
    %218 = arith.truncf %217 : vector<8x16xf32> to vector<8x16xbf16>
    %219 = vector.extract_strided_slice %162 {offsets = [0, 8], sizes = [16, 8], strides = [1, 1]} : vector<16x32xf32> to vector<16x8xf32>
    %220 = arith.truncf %219 : vector<16x8xf32> to vector<16x8xbf16>
    %cst_78 = arith.constant dense<0.000000e+00> : vector<8x8xf32>
    %221 = tpu.matmul %218, %220, %cst_78 {dimension_numbers = #tpu.dot_dimension_numbers<[1], [0], [0], [1], [0, 0, 1, 1], [], []>} : vector<8x16xbf16>, vector<16x8xbf16>, vector<8x8xf32> -> vector<8x8xf32>
    %c0_79 = arith.constant 0 : index
    %c8_80 = arith.constant 8 : index
    %222 = vector.load %arg29[%c0_79, %c8_80] : memref<8x32xf32, #tpu.memory_space<vmem>>, vector<8x8xf32>
    tpu.vector_store %arg29[%c0_79, %c8_80], %221 {strides = array<i32>} : memref<8x32xf32, #tpu.memory_space<vmem>>, vector<8x8xf32>,
    %223 = vector.extract_strided_slice %160 {offsets = [0, 16], sizes = [8, 8], strides = [1, 1]} : vector<8x32xf32> to vector<8x8xf32>
    %224 = arith.truncf %223 : vector<8x8xf32> to vector<8x8xbf16>
    %225 = vector.extract_strided_slice %161 {offsets = [0, 16], sizes = [16, 8], strides = [1, 1]} : vector<16x32xf32> to vector<16x8xf32>
    %226 = arith.truncf %225 : vector<16x8xf32> to vector<16x8xbf16>
    %cst_81 = arith.constant dense<0.000000e+00> : vector<8x16xf32>
    %227 = tpu.matmul %224, %226, %cst_81 {dimension_numbers = #tpu.dot_dimension_numbers<[1], [1], [0], [0], [0, 0, 1, 0], [], []>} : vector<8x8xbf16>, vector<16x8xbf16>, vector<8x16xf32> -> vector<8x16xf32>
    %cst_82 = arith.constant -1.000000e+30 : f32
    %228 = vector.shape_cast %166 : vector<1x16xi1> to vector<1x16xi1>
    %229 = vector.broadcast %228 : vector<1x16xi1> to vector<8x16xi1>
    %230 = vector.broadcast %cst_82 : f32 to vector<8x16xf32>
    %231 = arith.select %229, %227, %230 : vector<8x16xi1>, vector<8x16xf32>
    %cst_83 = arith.constant dense<0xFF800000> : vector<8xf32>
    %232 = vector.multi_reduction <maximumf>, %231, %cst_83 [1] : vector<8x16xf32> to vector<8xf32>
    %233 = vector.shape_cast %232 : vector<8xf32> to vector<8x1xf32>
    %234 = vector.broadcast %233 : vector<8x1xf32> to vector<8x16xf32>
    %235 = arith.subf %231, %234 : vector<8x16xf32>
    %236 = math.exp %235 : vector<8x16xf32>
    %cst_84 = arith.constant dense<0.000000e+00> : vector<8xf32>
    %237 = vector.multi_reduction <add>, %236, %cst_84 [1] : vector<8x16xf32> to vector<8xf32>
    %238 = vector.shape_cast %237 : vector<8xf32> to vector<8x1xf32>
    %239 = tpu.reciprocal %238 {approx = true} : vector<8x1xf32> -> vector<8x1xf32>
    %240 = vector.broadcast %239 : vector<8x1xf32> to vector<8x16xf32>
    %241 = arith.mulf %236, %240 : vector<8x16xf32>
    %cst_85 = arith.constant 0.000000e+00 : f32
    %242 = vector.shape_cast %166 : vector<1x16xi1> to vector<1x16xi1>
    %243 = vector.broadcast %242 : vector<1x16xi1> to vector<8x16xi1>
    %244 = vector.broadcast %cst_85 : f32 to vector<8x16xf32>
    %245 = arith.select %243, %241, %244 : vector<8x16xi1>, vector<8x16xf32>
    %246 = arith.truncf %245 : vector<8x16xf32> to vector<8x16xbf16>
    %247 = vector.extract_strided_slice %162 {offsets = [0, 16], sizes = [16, 8], strides = [1, 1]} : vector<16x32xf32> to vector<16x8xf32>
    %248 = arith.truncf %247 : vector<16x8xf32> to vector<16x8xbf16>
    %cst_86 = arith.constant dense<0.000000e+00> : vector<8x8xf32>
    %249 = tpu.matmul %246, %248, %cst_86 {dimension_numbers = #tpu.dot_dimension_numbers<[1], [0], [0], [1], [0, 0, 1, 1], [], []>} : vector<8x16xbf16>, vector<16x8xbf16>, vector<8x8xf32> -> vector<8x8xf32>
    %c0_87 = arith.constant 0 : index
    %c16_88 = arith.constant 16 : index
    %250 = vector.load %arg29[%c0_87, %c16_88] : memref<8x32xf32, #tpu.memory_space<vmem>>, vector<8x8xf32>
    tpu.vector_store %arg29[%c0_87, %c16_88], %249 {strides = array<i32>} : memref<8x32xf32, #tpu.memory_space<vmem>>, vector<8x8xf32>,
    %251 = vector.extract_strided_slice %160 {offsets = [0, 24], sizes = [8, 8], strides = [1, 1]} : vector<8x32xf32> to vector<8x8xf32>
    %252 = arith.truncf %251 : vector<8x8xf32> to vector<8x8xbf16>
    %253 = vector.extract_strided_slice %161 {offsets = [0, 24], sizes = [16, 8], strides = [1, 1]} : vector<16x32xf32> to vector<16x8xf32>
    %254 = arith.truncf %253 : vector<16x8xf32> to vector<16x8xbf16>
    %cst_89 = arith.constant dense<0.000000e+00> : vector<8x16xf32>
    %255 = tpu.matmul %252, %254, %cst_89 {dimension_numbers = #tpu.dot_dimension_numbers<[1], [1], [0], [0], [0, 0, 1, 0], [], []>} : vector<8x8xbf16>, vector<16x8xbf16>, vector<8x16xf32> -> vector<8x16xf32>
    %cst_90 = arith.constant -1.000000e+30 : f32
    %256 = vector.shape_cast %166 : vector<1x16xi1> to vector<1x16xi1>
    %257 = vector.broadcast %256 : vector<1x16xi1> to vector<8x16xi1>
    %258 = vector.broadcast %cst_90 : f32 to vector<8x16xf32>
    %259 = arith.select %257, %255, %258 : vector<8x16xi1>, vector<8x16xf32>
    %cst_91 = arith.constant dense<0xFF800000> : vector<8xf32>
    %260 = vector.multi_reduction <maximumf>, %259, %cst_91 [1] : vector<8x16xf32> to vector<8xf32>
    %261 = vector.shape_cast %260 : vector<8xf32> to vector<8x1xf32>
    %262 = vector.broadcast %261 : vector<8x1xf32> to vector<8x16xf32>
    %263 = arith.subf %259, %262 : vector<8x16xf32>
    %264 = math.exp %263 : vector<8x16xf32>
    %cst_92 = arith.constant dense<0.000000e+00> : vector<8xf32>
    %265 = vector.multi_reduction <add>, %264, %cst_92 [1] : vector<8x16xf32> to vector<8xf32>
    %266 = vector.shape_cast %265 : vector<8xf32> to vector<8x1xf32>
    %267 = tpu.reciprocal %266 {approx = true} : vector<8x1xf32> -> vector<8x1xf32>
    %268 = vector.broadcast %267 : vector<8x1xf32> to vector<8x16xf32>
    %269 = arith.mulf %264, %268 : vector<8x16xf32>
    %cst_93 = arith.constant 0.000000e+00 : f32
    %270 = vector.shape_cast %166 : vector<1x16xi1> to vector<1x16xi1>
    %271 = vector.broadcast %270 : vector<1x16xi1> to vector<8x16xi1>
    %272 = vector.broadcast %cst_93 : f32 to vector<8x16xf32>
    %273 = arith.select %271, %269, %272 : vector<8x16xi1>, vector<8x16xf32>
    %274 = arith.truncf %273 : vector<8x16xf32> to vector<8x16xbf16>
    %275 = vector.extract_strided_slice %162 {offsets = [0, 24], sizes = [16, 8], strides = [1, 1]} : vector<16x32xf32> to vector<16x8xf32>
    %276 = arith.truncf %275 : vector<16x8xf32> to vector<16x8xbf16>
    %cst_94 = arith.constant dense<0.000000e+00> : vector<8x8xf32>
    %277 = tpu.matmul %274, %276, %cst_94 {dimension_numbers = #tpu.dot_dimension_numbers<[1], [0], [0], [1], [0, 0, 1, 1], [], []>} : vector<8x16xbf16>, vector<16x8xbf16>, vector<8x8xf32> -> vector<8x8xf32>
    %c0_95 = arith.constant 0 : index
    %c24_96 = arith.constant 24 : index
    %278 = vector.load %arg29[%c0_95, %c24_96] : memref<8x32xf32, #tpu.memory_space<vmem>>, vector<8x8xf32>
    tpu.vector_store %arg29[%c0_95, %c24_96], %277 {strides = array<i32>} : memref<8x32xf32, #tpu.memory_space<vmem>>, vector<8x8xf32>,
    %c0_97 = arith.constant 0 : index
    %c0_98 = arith.constant 0 : index
    %279 = vector.load %arg29[%c0_97, %c0_98] : memref<8x32xf32, #tpu.memory_space<vmem>>, vector<8x32xf32>
    %280 = arith.truncf %279 : vector<8x32xf32> to vector<8x32xbf16>
    %c0_99 = arith.constant 0 : index
    %c0_100 = arith.constant 0 : index
    %281 = vector.load %arg18[%c0_99, %c0_100] : memref<32x32xbf16, #tpu.memory_space<vmem>>, vector<32x32xbf16>
    %cst_101 = arith.constant dense<0.000000e+00> : vector<8x32xf32>
    %282 = tpu.matmul %280, %281, %cst_101 {dimension_numbers = #tpu.dot_dimension_numbers<[1], [0], [0], [1], [0, 0, 1, 1], [], []>} : vector<8x32xbf16>, vector<32x32xbf16>, vector<8x32xf32> -> vector<8x32xf32>
    %c0_102 = arith.constant 0 : index
    %c0_103 = arith.constant 0 : index
    %283 = vector.load %arg19[%c0_102, %c0_103] : memref<1x32xf32, #tpu.memory_space<vmem>>, vector<1x32xf32>
    %284 = vector.broadcast %283 : vector<1x32xf32> to vector<8x32xf32>
    %285 = arith.addf %282, %284 : vector<8x32xf32>
    %286 = arith.addf %128, %285 : vector<8x32xf32>
    %c0_104 = arith.constant 0 : index
    %c0_105 = arith.constant 0 : index
    %287 = vector.load %arg20[%c0_104, %c0_105] : memref<1x32xf32, #tpu.memory_space<vmem>>, vector<1x32xf32>
    %c0_106 = arith.constant 0 : index
    %c0_107 = arith.constant 0 : index
    %288 = vector.load %arg21[%c0_106, %c0_107] : memref<1x32xf32, #tpu.memory_space<vmem>>, vector<1x32xf32>
    %cst_108 = arith.constant dense<0.000000e+00> : vector<8xf32>
    %289 = vector.multi_reduction <add>, %286, %cst_108 [1] : vector<8x32xf32> to vector<8xf32>
    %290 = vector.shape_cast %289 : vector<8xf32> to vector<8x1xf32>
    %cst_109 = arith.constant 3.200000e+01 : f32
    %291 = vector.broadcast %cst_109 : f32 to vector<8x1xf32>
    %292 = arith.divf %290, %291 : vector<8x1xf32>
    %293 = vector.broadcast %292 : vector<8x1xf32> to vector<8x32xf32>
    %294 = arith.subf %286, %293 : vector<8x32xf32>
    %295 = arith.mulf %294, %294 : vector<8x32xf32>
    %cst_110 = arith.constant dense<0.000000e+00> : vector<8xf32>
    %296 = vector.multi_reduction <add>, %295, %cst_110 [1] : vector<8x32xf32> to vector<8xf32>
    %297 = vector.shape_cast %296 : vector<8xf32> to vector<8x1xf32>
    %cst_111 = arith.constant 3.200000e+01 : f32
    %298 = vector.broadcast %cst_111 : f32 to vector<8x1xf32>
    %299 = arith.divf %297, %298 : vector<8x1xf32>
    %300 = vector.broadcast %292 : vector<8x1xf32> to vector<8x32xf32>
    %301 = arith.subf %286, %300 : vector<8x32xf32>
    %cst_112 = arith.constant 9.99999974E-6 : f32
    %302 = vector.broadcast %cst_112 : f32 to vector<8x1xf32>
    %303 = arith.addf %299, %302 : vector<8x1xf32>
    %304 = math.rsqrt %303 : vector<8x1xf32>
    %305 = vector.broadcast %304 : vector<8x1xf32> to vector<8x32xf32>
    %306 = arith.mulf %301, %305 : vector<8x32xf32>
    %307 = vector.broadcast %287 : vector<1x32xf32> to vector<8x32xf32>
    %308 = arith.mulf %306, %307 : vector<8x32xf32>
    %309 = vector.broadcast %288 : vector<1x32xf32> to vector<8x32xf32>
    %310 = arith.addf %308, %309 : vector<8x32xf32>
    %311 = arith.truncf %310 : vector<8x32xf32> to vector<8x32xbf16>
    %c0_113 = arith.constant 0 : index
    %c0_114 = arith.constant 0 : index
    %312 = vector.load %arg22[%c0_113, %c0_114] : memref<32x64xbf16, #tpu.memory_space<vmem>>, vector<32x64xbf16>
    %cst_115 = arith.constant dense<0.000000e+00> : vector<8x64xf32>
    %313 = tpu.matmul %311, %312, %cst_115 {dimension_numbers = #tpu.dot_dimension_numbers<[1], [0], [0], [1], [0, 0, 1, 1], [], []>} : vector<8x32xbf16>, vector<32x64xbf16>, vector<8x64xf32> -> vector<8x64xf32>
    %c0_116 = arith.constant 0 : index
    %c0_117 = arith.constant 0 : index
    %314 = vector.load %arg23[%c0_116, %c0_117] : memref<1x64xf32, #tpu.memory_space<vmem>>, vector<1x64xf32>
    %315 = vector.broadcast %314 : vector<1x64xf32> to vector<8x64xf32>
    %316 = arith.addf %313, %315 : vector<8x64xf32>
    %cst_118 = arith.constant 0.000000e+00 : f32
    %317 = vector.broadcast %cst_118 : f32 to vector<8x64xf32>
    %318 = arith.maximumf %316, %317 : vector<8x64xf32>
    %319 = arith.truncf %318 : vector<8x64xf32> to vector<8x64xbf16>
    %c0_119 = arith.constant 0 : index
    %c0_120 = arith.constant 0 : index
    %320 = vector.load %arg24[%c0_119, %c0_120] : memref<64x32xbf16, #tpu.memory_space<vmem>>, vector<64x32xbf16>
    %cst_121 = arith.constant dense<0.000000e+00> : vector<8x32xf32>
    %321 = tpu.matmul %319, %320, %cst_121 {dimension_numbers = #tpu.dot_dimension_numbers<[1], [0], [0], [1], [0, 0, 1, 1], [], []>} : vector<8x64xbf16>, vector<64x32xbf16>, vector<8x32xf32> -> vector<8x32xf32>
    %c0_122 = arith.constant 0 : index
    %c0_123 = arith.constant 0 : index
    %322 = vector.load %arg25[%c0_122, %c0_123] : memref<1x32xf32, #tpu.memory_space<vmem>>, vector<1x32xf32>
    %323 = vector.broadcast %322 : vector<1x32xf32> to vector<8x32xf32>
    %324 = arith.addf %321, %323 : vector<8x32xf32>
    %325 = arith.addf %286, %324 : vector<8x32xf32>
    %c0_124 = arith.constant 0 : index
    %c0_125 = arith.constant 0 : index
    %c0_126 = arith.constant 0 : index
    %326 = vector.load %arg26[%c0_124, %c0_125, %c0_126] : memref<1x8x32xf32, #tpu.memory_space<vmem>>, vector<1x8x32xf32>
    %327 = vector.shape_cast %326 : vector<1x8x32xf32> to vector<8x32xf32>
    %328 = vector.shape_cast %325 : vector<8x32xf32> to vector<1x8x32xf32>
    tpu.vector_store %arg26[%c0_124, %c0_125, %c0_126], %328 {strides = array<i32>} : memref<1x8x32xf32, #tpu.memory_space<vmem>>, vector<1x8x32xf32>,
    return
  }
  func.func @transform_0(%arg0: i32, %arg1: i32, %arg2: memref<2xi32, #tpu.memory_space<smem>>) -> (i32, i32, i32) {
    %c0_i32 = arith.constant 0 : i32
    %c0_i32_0 = arith.constant 0 : i32
    %c0_i32_1 = arith.constant 0 : i32
    return %arg0, %c0_i32, %c0_i32_0 : i32, i32, i32
  }
  func.func @transform_1(%arg0: i32, %arg1: i32, %arg2: memref<2xi32, #tpu.memory_space<smem>>) -> (i32, i32, i32) {
    %c0_i32 = arith.constant 0 : i32
    %c0_i32_0 = arith.constant 0 : i32
    %c0_i32_1 = arith.constant 0 : i32
    return %arg0, %c0_i32, %c0_i32_0 : i32, i32, i32
  }
  func.func @transform_2(%arg0: i32, %arg1: i32, %arg2: memref<2xi32, #tpu.memory_space<smem>>) -> (i32, i32, i32) {
    %c0_i32 = arith.constant 0 : i32
    %c0_i32_0 = arith.constant 0 : i32
    %c0_i32_1 = arith.constant 0 : i32
    return %arg0, %c0_i32, %c0_i32_0 : i32, i32, i32
  }
  func.func @transform_3(%arg0: i32, %arg1: i32, %arg2: memref<2xi32, #tpu.memory_space<smem>>) -> (i32, i32) {
    %c0_i32 = arith.constant 0 : i32
    %c0_i32_0 = arith.constant 0 : i32
    %c0_i32_1 = arith.constant 0 : i32
    return %c0_i32, %c0_i32_0 : i32, i32
  }
  func.func @transform_4(%arg0: i32, %arg1: i32, %arg2: memref<2xi32, #tpu.memory_space<smem>>) -> (i32, i32) {
    %c0_i32 = arith.constant 0 : i32
    %c0_i32_0 = arith.constant 0 : i32
    %c0_i32_1 = arith.constant 0 : i32
    return %c0_i32, %c0_i32_0 : i32, i32
  }
  func.func @transform_5(%arg0: i32, %arg1: i32, %arg2: memref<2xi32, #tpu.memory_space<smem>>) -> (i32, i32) {
    %c0_i32 = arith.constant 0 : i32
    %c0_i32_0 = arith.constant 0 : i32
    %c0_i32_1 = arith.constant 0 : i32
    return %c0_i32, %c0_i32_0 : i32, i32
  }
  func.func @transform_6(%arg0: i32, %arg1: i32, %arg2: memref<2xi32, #tpu.memory_space<smem>>) -> (i32, i32) {
    %c0_i32 = arith.constant 0 : i32
    %c0_i32_0 = arith.constant 0 : i32
    %c0_i32_1 = arith.constant 0 : i32
    return %c0_i32, %c0_i32_0 : i32, i32
  }
  func.func @transform_7(%arg0: i32, %arg1: i32, %arg2: memref<2xi32, #tpu.memory_space<smem>>) -> (i32, i32) {
    %c0_i32 = arith.constant 0 : i32
    %c0_i32_0 = arith.constant 0 : i32
    %c0_i32_1 = arith.constant 0 : i32
    return %c0_i32, %c0_i32_0 : i32, i32
  }
  func.func @transform_8(%arg0: i32, %arg1: i32, %arg2: memref<2xi32, #tpu.memory_space<smem>>) -> (i32, i32) {
    %c0_i32 = arith.constant 0 : i32
    %c0_i32_0 = arith.constant 0 : i32
    %c0_i32_1 = arith.constant 0 : i32
    return %c0_i32, %c0_i32_0 : i32, i32
  }
  func.func @transform_9(%arg0: i32, %arg1: i32, %arg2: memref<2xi32, #tpu.memory_space<smem>>) -> (i32, i32) {
    %c0_i32 = arith.constant 0 : i32
    %c0_i32_0 = arith.constant 0 : i32
    %c0_i32_1 = arith.constant 0 : i32
    return %c0_i32, %c0_i32_0 : i32, i32
  }
  func.func @transform_10(%arg0: i32, %arg1: i32, %arg2: memref<2xi32, #tpu.memory_space<smem>>) -> (i32, i32) {
    %c0_i32 = arith.constant 0 : i32
    %c0_i32_0 = arith.constant 0 : i32
    %c0_i32_1 = arith.constant 0 : i32
    return %c0_i32, %c0_i32_0 : i32, i32
  }
  func.func @transform_11(%arg0: i32, %arg1: i32, %arg2: memref<2xi32, #tpu.memory_space<smem>>) -> (i32, i32) {
    %c0_i32 = arith.constant 0 : i32
    %c0_i32_0 = arith.constant 0 : i32
    %c0_i32_1 = arith.constant 0 : i32
    return %c0_i32, %c0_i32_0 : i32, i32
  }
  func.func @transform_12(%arg0: i32, %arg1: i32, %arg2: memref<2xi32, #tpu.memory_space<smem>>) -> (i32, i32) {
    %c0_i32 = arith.constant 0 : i32
    %c0_i32_0 = arith.constant 0 : i32
    %c0_i32_1 = arith.constant 0 : i32
    return %c0_i32, %c0_i32_0 : i32, i32
  }
  func.func @transform_13(%arg0: i32, %arg1: i32, %arg2: memref<2xi32, #tpu.memory_space<smem>>) -> (i32, i32) {
    %c0_i32 = arith.constant 0 : i32
    %c0_i32_0 = arith.constant 0 : i32
    %c0_i32_1 = arith.constant 0 : i32
    return %c0_i32, %c0_i32_0 : i32, i32
  }
  func.func @transform_14(%arg0: i32, %arg1: i32, %arg2: memref<2xi32, #tpu.memory_space<smem>>) -> (i32, i32) {
    %c0_i32 = arith.constant 0 : i32
    %c0_i32_0 = arith.constant 0 : i32
    %c0_i32_1 = arith.constant 0 : i32
    return %c0_i32, %c0_i32_0 : i32, i32
  }
  func.func @transform_15(%arg0: i32, %arg1: i32, %arg2: memref<2xi32, #tpu.memory_space<smem>>) -> (i32, i32) {
    %c0_i32 = arith.constant 0 : i32
    %c0_i32_0 = arith.constant 0 : i32
    %c0_i32_1 = arith.constant 0 : i32
    return %c0_i32, %c0_i32_0 : i32, i32
  }
  func.func @transform_16(%arg0: i32, %arg1: i32, %arg2: memref<2xi32, #tpu.memory_space<smem>>) -> (i32, i32) {
    %c0_i32 = arith.constant 0 : i32
    %c0_i32_0 = arith.constant 0 : i32
    %c0_i32_1 = arith.constant 0 : i32
    return %c0_i32, %c0_i32_0 : i32, i32
  }
  func.func @transform_17(%arg0: i32, %arg1: i32, %arg2: memref<2xi32, #tpu.memory_space<smem>>) -> (i32, i32) {
    %c0_i32 = arith.constant 0 : i32
    %c0_i32_0 = arith.constant 0 : i32
    %c0_i32_1 = arith.constant 0 : i32
    return %c0_i32, %c0_i32_0 : i32, i32
  }
  func.func @transform_18(%arg0: i32, %arg1: i32, %arg2: memref<2xi32, #tpu.memory_space<smem>>) -> (i32, i32) {
    %c0_i32 = arith.constant 0 : i32
    %c0_i32_0 = arith.constant 0 : i32
    %c0_i32_1 = arith.constant 0 : i32
    return %c0_i32, %c0_i32_0 : i32, i32
  }
  func.func @transform_19(%arg0: i32, %arg1: i32, %arg2: memref<2xi32, #tpu.memory_space<smem>>) -> (i32, i32) {
    %c0_i32 = arith.constant 0 : i32
    %c0_i32_0 = arith.constant 0 : i32
    %c0_i32_1 = arith.constant 0 : i32
    return %c0_i32, %c0_i32_0 : i32, i32
  }
  func.func @transform_20(%arg0: i32, %arg1: i32, %arg2: memref<2xi32, #tpu.memory_space<smem>>) -> (i32, i32) {
    %c0_i32 = arith.constant 0 : i32
    %c0_i32_0 = arith.constant 0 : i32
    %c0_i32_1 = arith.constant 0 : i32
    return %c0_i32, %c0_i32_0 : i32, i32
  }
  func.func @transform_21(%arg0: i32, %arg1: i32, %arg2: memref<2xi32, #tpu.memory_space<smem>>) -> (i32, i32) {
    %c0_i32 = arith.constant 0 : i32
    %c0_i32_0 = arith.constant 0 : i32
    %c0_i32_1 = arith.constant 0 : i32
    return %c0_i32, %c0_i32_0 : i32, i32
  }
  func.func @transform_22(%arg0: i32, %arg1: i32, %arg2: memref<2xi32, #tpu.memory_space<smem>>) -> (i32, i32) {
    %c0_i32 = arith.constant 0 : i32
    %c0_i32_0 = arith.constant 0 : i32
    %c0_i32_1 = arith.constant 0 : i32
    return %c0_i32, %c0_i32_0 : i32, i32
  }
  func.func @transform_23(%arg0: i32, %arg1: i32, %arg2: memref<2xi32, #tpu.memory_space<smem>>) -> (i32, i32, i32) {
    %c0_i32 = arith.constant 0 : i32
    %c0_i32_0 = arith.constant 0 : i32
    return %arg0, %arg1, %c0_i32 : i32, i32, i32
  }
}

module attributes {stable_mosaic.version = 11 : i64} {
  func.func @_decoder_layer_kernel(%arg0: i32, %arg1: i32, %arg2: memref<2xi32, #tpu.memory_space<smem>>, %arg3: memref<1x8x32xf32, #tpu.memory_space<vmem>>, %arg4: memref<1x16x32xf32, #tpu.memory_space<vmem>>, %arg5: memref<1x1x16xi32, #tpu.memory_space<vmem>>, %arg6: memref<1x32xf32, #tpu.memory_space<vmem>>, %arg7: memref<1x32xf32, #tpu.memory_space<vmem>>, %arg8: memref<32x96xbf16, #tpu.memory_space<vmem>>, %arg9: memref<1x96xf32, #tpu.memory_space<vmem>>, %arg10: memref<32x32xbf16, #tpu.memory_space<vmem>>, %arg11: memref<1x32xf32, #tpu.memory_space<vmem>>, %arg12: memref<1x32xf32, #tpu.memory_space<vmem>>, %arg13: memref<1x32xf32, #tpu.memory_space<vmem>>, %arg14: memref<32x32xbf16, #tpu.memory_space<vmem>>, %arg15: memref<1x32xf32, #tpu.memory_space<vmem>>, %arg16: memref<32x64xbf16, #tpu.memory_space<vmem>>, %arg17: memref<1x64xf32, #tpu.memory_space<vmem>>, %arg18: memref<32x32xbf16, #tpu.memory_space<vmem>>, %arg19: memref<1x32xf32, #tpu.memory_space<vmem>>, %arg20: memref<1x32xf32, #tpu.memory_space<vmem>>, %arg21: memref<1x32xf32, #tpu.memory_space<vmem>>, %arg22: memref<32x64xbf16, #tpu.memory_space<vmem>>, %arg23: memref<1x64xf32, #tpu.memory_space<vmem>>, %arg24: memref<64x32xbf16, #tpu.memory_space<vmem>>, %arg25: memref<1x32xf32, #tpu.memory_space<vmem>>, %arg26: memref<1x8x32xf32, #tpu.memory_space<vmem>>, %arg27: memref<8x96xf32, #tpu.memory_space<vmem>>, %arg28: memref<16x64xf32, #tpu.memory_space<vmem>>, %arg29: memref<8x32xf32, #tpu.memory_space<vmem>>) attributes {dimension_semantics = [#tpu.dimension_semantics<parallel>, #tpu.dimension_semantics<arbitrary>], iteration_bounds = array<i64: 2, 1>, scalar_prefetch = 1 : i64, scratch_operands = 3 : i64, tpu.core_type = #tpu.core_type<tc>, window_params = [{transform_indices = @transform_0, window_bounds = array<i64: 1, 8, 32>}, {transform_indices = @transform_1, window_bounds = array<i64: 1, 16, 32>}, {transform_indices = @transform_2, window_bounds = array<i64: 1, 1, 16>}, {pipeline_mode = #tpu.pipeline_mode<synchronous>, transform_indices = @transform_3, window_bounds = array<i64: 1, 32>}, {pipeline_mode = #tpu.pipeline_mode<synchronous>, transform_indices = @transform_4, window_bounds = array<i64: 1, 32>}, {pipeline_mode = #tpu.pipeline_mode<synchronous>, transform_indices = @transform_5, window_bounds = array<i64: 32, 96>}, {pipeline_mode = #tpu.pipeline_mode<synchronous>, transform_indices = @transform_6, window_bounds = array<i64: 1, 96>}, {pipeline_mode = #tpu.pipeline_mode<synchronous>, transform_indices = @transform_7, window_bounds = array<i64: 32, 32>}, {pipeline_mode = #tpu.pipeline_mode<synchronous>, transform_indices = @transform_8, window_bounds = array<i64: 1, 32>}, {pipeline_mode = #tpu.pipeline_mode<synchronous>, transform_indices = @transform_9, window_bounds = array<i64: 1, 32>}, {pipeline_mode = #tpu.pipeline_mode<synchronous>, transform_indices = @transform_10, window_bounds = array<i64: 1, 32>}, {pipeline_mode = #tpu.pipeline_mode<synchronous>, transform_indices = @transform_11, window_bounds = array<i64: 32, 32>}, {pipeline_mode = #tpu.pipeline_mode<synchronous>, transform_indices = @transform_12, window_bounds = array<i64: 1, 32>}, {pipeline_mode = #tpu.pipeline_mode<synchronous>, transform_indices = @transform_13, window_bounds = array<i64: 32, 64>}, {pipeline_mode = #tpu.pipeline_mode<synchronous>, transform_indices = @transform_14, window_bounds = array<i64: 1, 64>}, {pipeline_mode = #tpu.pipeline_mode<synchronous>, transform_indices = @transform_15, window_bounds = array<i64: 32, 32>}, {pipeline_mode = #tpu.pipeline_mode<synchronous>, transform_indices = @transform_16, window_bounds = array<i64: 1, 32>}, {pipeline_mode = #tpu.pipeline_mode<synchronous>, transform_indices = @transform_17, window_bounds = array<i64: 1, 32>}, {pipeline_mode = #tpu.pipeline_mode<synchronous>, transform_indices = @transform_18, window_bounds = array<i64: 1, 32>}, {pipeline_mode = #tpu.pipeline_mode<synchronous>, transform_indices = @transform_19, window_bounds = array<i64: 32, 64>}, {pipeline_mode = #tpu.pipeline_mode<synchronous>, transform_indices = @transform_20, window_bounds = array<i64: 1, 64>}, {pipeline_mode = #tpu.pipeline_mode<synchronous>, transform_indices = @transform_21, window_bounds = array<i64: 64, 32>}, {pipeline_mode = #tpu.pipeline_mode<synchronous>, transform_indices = @transform_22, window_bounds = array<i64: 1, 32>}, {transform_indices = @transform_23, window_bounds = array<i64: 1, 8, 32>}]} {
    %c0_i32 = arith.constant 0 : i32
    %0 = arith.cmpi eq, %arg1, %c0_i32 : i32
    %1 = arith.extui %0 : i1 to i32
    %c0_i32_0 = arith.constant 0 : i32
    %2 = arith.cmpi ne, %1, %c0_i32_0 : i32
    scf.if %2 {
      %c0_127 = arith.constant 0 : index
      %c0_128 = arith.constant 0 : index
      %c0_129 = arith.constant 0 : index
      %329 = vector.load %arg3[%c0_127, %c0_128, %c0_129] : memref<1x8x32xf32, #tpu.memory_space<vmem>>, vector<1x8x32xf32>
      %330 = vector.shape_cast %329 : vector<1x8x32xf32> to vector<8x32xf32>
      %c0_130 = arith.constant 0 : index
      %c0_131 = arith.constant 0 : index
      %331 = vector.load %arg6[%c0_130, %c0_131] : memref<1x32xf32, #tpu.memory_space<vmem>>, vector<1x32xf32>
      %c0_132 = arith.constant 0 : index
      %c0_133 = arith.constant 0 : index
      %332 = vector.load %arg7[%c0_132, %c0_133] : memref<1x32xf32, #tpu.memory_space<vmem>>, vector<1x32xf32>
      %cst_134 = arith.constant dense<0.000000e+00> : vector<8xf32>
      %333 = vector.multi_reduction <add>, %330, %cst_134 [1] : vector<8x32xf32> to vector<8xf32>
      %334 = vector.shape_cast %333 : vector<8xf32> to vector<8x1xf32>
      %cst_135 = arith.constant 3.200000e+01 : f32
      %335 = vector.broadcast %cst_135 : f32 to vector<8x1xf32>
      %336 = arith.divf %334, %335 : vector<8x1xf32>
      %337 = vector.broadcast %336 : vector<8x1xf32> to vector<8x32xf32>
      %338 = arith.subf %330, %337 : vector<8x32xf32>
      %339 = arith.mulf %338, %338 : vector<8x32xf32>
      %cst_136 = arith.constant dense<0.000000e+00> : vector<8xf32>
      %340 = vector.multi_reduction <add>, %339, %cst_136 [1] : vector<8x32xf32> to vector<8xf32>
      %341 = vector.shape_cast %340 : vector<8xf32> to vector<8x1xf32>
      %cst_137 = arith.constant 3.200000e+01 : f32
      %342 = vector.broadcast %cst_137 : f32 to vector<8x1xf32>
      %343 = arith.divf %341, %342 : vector<8x1xf32>
      %344 = vector.broadcast %336 : vector<8x1xf32> to vector<8x32xf32>
      %345 = arith.subf %330, %344 : vector<8x32xf32>
      %cst_138 = arith.constant 9.99999974E-6 : f32
      %346 = vector.broadcast %cst_138 : f32 to vector<8x1xf32>
      %347 = arith.addf %343, %346 : vector<8x1xf32>
      %348 = math.rsqrt %347 : vector<8x1xf32>
      %349 = vector.broadcast %348 : vector<8x1xf32> to vector<8x32xf32>
      %350 = arith.mulf %345, %349 : vector<8x32xf32>
      %351 = vector.broadcast %331 : vector<1x32xf32> to vector<8x32xf32>
      %352 = arith.mulf %350, %351 : vector<8x32xf32>
      %353 = vector.broadcast %332 : vector<1x32xf32> to vector<8x32xf32>
      %354 = arith.addf %352, %353 : vector<8x32xf32>
      %355 = arith.truncf %354 : vector<8x32xf32> to vector<8x32xbf16>
      %c0_139 = arith.constant 0 : index
      %c0_140 = arith.constant 0 : index
      %356 = vector.load %arg8[%c0_139, %c0_140] : memref<32x96xbf16, #tpu.memory_space<vmem>>, vector<32x96xbf16>
      %cst_141 = arith.constant dense<0.000000e+00> : vector<8x96xf32>
      %357 = tpu.matmul %355, %356, %cst_141 {dimension_numbers = #tpu.dot_dimension_numbers<[1], [0], [0], [1], [0, 0, 1, 1], [], []>} : vector<8x32xbf16>, vector<32x96xbf16>, vector<8x96xf32> -> vector<8x96xf32>
      %c0_142 = arith.constant 0 : index
      %c0_143 = arith.constant 0 : index
      %358 = vector.load %arg9[%c0_142, %c0_143] : memref<1x96xf32, #tpu.memory_space<vmem>>, vector<1x96xf32>
      %359 = vector.broadcast %358 : vector<1x96xf32> to vector<8x96xf32>
      %360 = arith.addf %357, %359 : vector<8x96xf32>
      %c0_144 = arith.constant 0 : index
      %c0_145 = arith.constant 0 : index
      %361 = vector.load %arg27[%c0_144, %c0_145] : memref<8x96xf32, #tpu.memory_space<vmem>>, vector<8x96xf32>
      tpu.vector_store %arg27[%c0_144, %c0_145], %360 {strides = array<i32>} : memref<8x96xf32, #tpu.memory_space<vmem>>, vector<8x96xf32>,
      %c0_146 = arith.constant 0 : index
      %c0_147 = arith.constant 0 : index
      %c0_148 = arith.constant 0 : index
      %362 = vector.load %arg4[%c0_146, %c0_147, %c0_148] : memref<1x16x32xf32, #tpu.memory_space<vmem>>, vector<1x16x32xf32>
      %363 = vector.shape_cast %362 : vector<1x16x32xf32> to vector<16x32xf32>
      %364 = arith.truncf %363 : vector<16x32xf32> to vector<16x32xbf16>
      %c0_149 = arith.constant 0 : index
      %c0_150 = arith.constant 0 : index
      %365 = vector.load %arg16[%c0_149, %c0_150] : memref<32x64xbf16, #tpu.memory_space<vmem>>, vector<32x64xbf16>
      %cst_151 = arith.constant dense<0.000000e+00> : vector<16x64xf32>
      %366 = tpu.matmul %364, %365, %cst_151 {dimension_numbers = #tpu.dot_dimension_numbers<[1], [0], [0], [1], [0, 0, 1, 1], [], []>} : vector<16x32xbf16>, vector<32x64xbf16>, vector<16x64xf32> -> vector<16x64xf32>
      %c0_152 = arith.constant 0 : index
      %c0_153 = arith.constant 0 : index
      %367 = vector.load %arg17[%c0_152, %c0_153] : memref<1x64xf32, #tpu.memory_space<vmem>>, vector<1x64xf32>
      %368 = vector.broadcast %367 : vector<1x64xf32> to vector<16x64xf32>
      %369 = arith.addf %366, %368 : vector<16x64xf32>
      %c0_154 = arith.constant 0 : index
      %c0_155 = arith.constant 0 : index
      %370 = vector.load %arg28[%c0_154, %c0_155] : memref<16x64xf32, #tpu.memory_space<vmem>>, vector<16x64xf32>
      tpu.vector_store %arg28[%c0_154, %c0_155], %369 {strides = array<i32>} : memref<16x64xf32, #tpu.memory_space<vmem>>, vector<16x64xf32>,
    } else {
    }
    %c8_i32 = arith.constant 8 : i32
    %3 = arith.muli %arg1, %c8_i32 : i32
    %4 = tpu.assume_multiple %3, 8 : i32
    %c0 = arith.constant 0 : index
    %5 = arith.index_cast %4 : i32 to index
    %c0_1 = arith.constant 0 : index
    %6 = vector.load %arg3[%c0, %5, %c0_1] : memref<1x8x32xf32, #tpu.memory_space<vmem>>, vector<1x8x32xf32>
    %7 = vector.shape_cast %6 : vector<1x8x32xf32> to vector<8x32xf32>
    %8 = arith.index_cast %4 : i32 to index
    %c0_2 = arith.constant 0 : index
    %9 = vector.load %arg27[%8, %c0_2] : memref<8x96xf32, #tpu.memory_space<vmem>>, vector<8x32xf32>
    %cst = arith.constant 0.353553385 : f32
    %10 = vector.broadcast %cst : f32 to vector<8x32xf32>
    %11 = arith.mulf %9, %10 : vector<8x32xf32>
    %c0_3 = arith.constant 0 : index
    %c32 = arith.constant 32 : index
    %12 = vector.load %arg27[%c0_3, %c32] : memref<8x96xf32, #tpu.memory_space<vmem>>, vector<8x32xf32>
    %c0_4 = arith.constant 0 : index
    %c64 = arith.constant 64 : index
    %13 = vector.load %arg27[%c0_4, %c64] : memref<8x96xf32, #tpu.memory_space<vmem>>, vector<8x32xf32>
    %14 = tpu.iota {dimensions = array<i32: 0>} : vector<8x8xi32>
    %c8_i32_5 = arith.constant 8 : i32
    %15 = arith.muli %arg1, %c8_i32_5 : i32
    %16 = vector.broadcast %15 : i32 to vector<8x8xi32>
    %17 = arith.addi %14, %16 : vector<8x8xi32>
    %18 = tpu.iota {dimensions = array<i32: 1>} : vector<8x8xi32>
    %19 = arith.cmpi sle, %18, %17 : vector<8x8xi32>
    %20 = arith.index_cast %arg0 : i32 to index
    %21 = memref.load %arg2[%20] : memref<2xi32, #tpu.memory_space<smem>>
    %22 = vector.broadcast %21 : i32 to vector<8x8xi32>
    %23 = arith.cmpi slt, %18, %22 : vector<8x8xi32>
    %24 = arith.andi %19, %23 : vector<8x8xi1>
    %25 = vector.extract_strided_slice %11 {offsets = [0, 0], sizes = [8, 8], strides = [1, 1]} : vector<8x32xf32> to vector<8x8xf32>
    %26 = arith.truncf %25 : vector<8x8xf32> to vector<8x8xbf16>
    %27 = vector.extract_strided_slice %12 {offsets = [0, 0], sizes = [8, 8], strides = [1, 1]} : vector<8x32xf32> to vector<8x8xf32>
    %28 = arith.truncf %27 : vector<8x8xf32> to vector<8x8xbf16>
    %cst_6 = arith.constant dense<0.000000e+00> : vector<8x8xf32>
    %29 = tpu.matmul %26, %28, %cst_6 {dimension_numbers = #tpu.dot_dimension_numbers<[1], [1], [0], [0], [0, 0, 1, 0], [], []>} : vector<8x8xbf16>, vector<8x8xbf16>, vector<8x8xf32> -> vector<8x8xf32>
    %cst_7 = arith.constant -1.000000e+30 : f32
    %30 = vector.broadcast %cst_7 : f32 to vector<8x8xf32>
    %31 = arith.select %24, %29, %30 : vector<8x8xi1>, vector<8x8xf32>
    %cst_8 = arith.constant dense<0xFF800000> : vector<8xf32>
    %32 = vector.multi_reduction <maximumf>, %31, %cst_8 [1] : vector<8x8xf32> to vector<8xf32>
    %33 = vector.shape_cast %32 : vector<8xf32> to vector<8x1xf32>
    %34 = vector.broadcast %33 : vector<8x1xf32> to vector<8x8xf32>
    %35 = arith.subf %31, %34 : vector<8x8xf32>
    %36 = math.exp %35 : vector<8x8xf32>
    %cst_9 = arith.constant dense<0.000000e+00> : vector<8xf32>
    %37 = vector.multi_reduction <add>, %36, %cst_9 [1] : vector<8x8xf32> to vector<8xf32>
    %38 = vector.shape_cast %37 : vector<8xf32> to vector<8x1xf32>
    %39 = tpu.reciprocal %38 {approx = true} : vector<8x1xf32> -> vector<8x1xf32>
    %40 = vector.broadcast %39 : vector<8x1xf32> to vector<8x8xf32>
    %41 = arith.mulf %36, %40 : vector<8x8xf32>
    %cst_10 = arith.constant 0.000000e+00 : f32
    %42 = vector.broadcast %cst_10 : f32 to vector<8x8xf32>
    %43 = arith.select %24, %41, %42 : vector<8x8xi1>, vector<8x8xf32>
    %44 = arith.truncf %43 : vector<8x8xf32> to vector<8x8xbf16>
    %45 = vector.extract_strided_slice %13 {offsets = [0, 0], sizes = [8, 8], strides = [1, 1]} : vector<8x32xf32> to vector<8x8xf32>
    %46 = arith.truncf %45 : vector<8x8xf32> to vector<8x8xbf16>
    %cst_11 = arith.constant dense<0.000000e+00> : vector<8x8xf32>
    %47 = tpu.matmul %44, %46, %cst_11 {dimension_numbers = #tpu.dot_dimension_numbers<[1], [0], [0], [1], [0, 0, 1, 1], [], []>} : vector<8x8xbf16>, vector<8x8xbf16>, vector<8x8xf32> -> vector<8x8xf32>
    %c0_12 = arith.constant 0 : index
    %c0_13 = arith.constant 0 : index
    %48 = vector.load %arg29[%c0_12, %c0_13] : memref<8x32xf32, #tpu.memory_space<vmem>>, vector<8x8xf32>
    tpu.vector_store %arg29[%c0_12, %c0_13], %47 {strides = array<i32>} : memref<8x32xf32, #tpu.memory_space<vmem>>, vector<8x8xf32>,
    %49 = vector.extract_strided_slice %11 {offsets = [0, 8], sizes = [8, 8], strides = [1, 1]} : vector<8x32xf32> to vector<8x8xf32>
    %50 = arith.truncf %49 : vector<8x8xf32> to vector<8x8xbf16>
    %51 = vector.extract_strided_slice %12 {offsets = [0, 8], sizes = [8, 8], strides = [1, 1]} : vector<8x32xf32> to vector<8x8xf32>
    %52 = arith.truncf %51 : vector<8x8xf32> to vector<8x8xbf16>
    %cst_14 = arith.constant dense<0.000000e+00> : vector<8x8xf32>
    %53 = tpu.matmul %50, %52, %cst_14 {dimension_numbers = #tpu.dot_dimension_numbers<[1], [1], [0], [0], [0, 0, 1, 0], [], []>} : vector<8x8xbf16>, vector<8x8xbf16>, vector<8x8xf32> -> vector<8x8xf32>
    %cst_15 = arith.constant -1.000000e+30 : f32
    %54 = vector.broadcast %cst_15 : f32 to vector<8x8xf32>
    %55 = arith.select %24, %53, %54 : vector<8x8xi1>, vector<8x8xf32>
    %cst_16 = arith.constant dense<0xFF800000> : vector<8xf32>
    %56 = vector.multi_reduction <maximumf>, %55, %cst_16 [1] : vector<8x8xf32> to vector<8xf32>
    %57 = vector.shape_cast %56 : vector<8xf32> to vector<8x1xf32>
    %58 = vector.broadcast %57 : vector<8x1xf32> to vector<8x8xf32>
    %59 = arith.subf %55, %58 : vector<8x8xf32>
    %60 = math.exp %59 : vector<8x8xf32>
    %cst_17 = arith.constant dense<0.000000e+00> : vector<8xf32>
    %61 = vector.multi_reduction <add>, %60, %cst_17 [1] : vector<8x8xf32> to vector<8xf32>
    %62 = vector.shape_cast %61 : vector<8xf32> to vector<8x1xf32>
    %63 = tpu.reciprocal %62 {approx = true} : vector<8x1xf32> -> vector<8x1xf32>
    %64 = vector.broadcast %63 : vector<8x1xf32> to vector<8x8xf32>
    %65 = arith.mulf %60, %64 : vector<8x8xf32>
    %cst_18 = arith.constant 0.000000e+00 : f32
    %66 = vector.broadcast %cst_18 : f32 to vector<8x8xf32>
    %67 = arith.select %24, %65, %66 : vector<8x8xi1>, vector<8x8xf32>
    %68 = arith.truncf %67 : vector<8x8xf32> to vector<8x8xbf16>
    %69 = vector.extract_strided_slice %13 {offsets = [0, 8], sizes = [8, 8], strides = [1, 1]} : vector<8x32xf32> to vector<8x8xf32>
    %70 = arith.truncf %69 : vector<8x8xf32> to vector<8x8xbf16>
    %cst_19 = arith.constant dense<0.000000e+00> : vector<8x8xf32>
    %71 = tpu.matmul %68, %70, %cst_19 {dimension_numbers = #tpu.dot_dimension_numbers<[1], [0], [0], [1], [0, 0, 1, 1], [], []>} : vector<8x8xbf16>, vector<8x8xbf16>, vector<8x8xf32> -> vector<8x8xf32>
    %c0_20 = arith.constant 0 : index
    %c8 = arith.constant 8 : index
    %72 = vector.load %arg29[%c0_20, %c8] : memref<8x32xf32, #tpu.memory_space<vmem>>, vector<8x8xf32>
    tpu.vector_store %arg29[%c0_20, %c8], %71 {strides = array<i32>} : memref<8x32xf32, #tpu.memory_space<vmem>>, vector<8x8xf32>,
    %73 = vector.extract_strided_slice %11 {offsets = [0, 16], sizes = [8, 8], strides = [1, 1]} : vector<8x32xf32> to vector<8x8xf32>
    %74 = arith.truncf %73 : vector<8x8xf32> to vector<8x8xbf16>
    %75 = vector.extract_strided_slice %12 {offsets = [0, 16], sizes = [8, 8], strides = [1, 1]} : vector<8x32xf32> to vector<8x8xf32>
    %76 = arith.truncf %75 : vector<8x8xf32> to vector<8x8xbf16>
    %cst_21 = arith.constant dense<0.000000e+00> : vector<8x8xf32>
    %77 = tpu.matmul %74, %76, %cst_21 {dimension_numbers = #tpu.dot_dimension_numbers<[1], [1], [0], [0], [0, 0, 1, 0], [], []>} : vector<8x8xbf16>, vector<8x8xbf16>, vector<8x8xf32> -> vector<8x8xf32>
    %cst_22 = arith.constant -1.000000e+30 : f32
    %78 = vector.broadcast %cst_22 : f32 to vector<8x8xf32>
    %79 = arith.select %24, %77, %78 : vector<8x8xi1>, vector<8x8xf32>
    %cst_23 = arith.constant dense<0xFF800000> : vector<8xf32>
    %80 = vector.multi_reduction <maximumf>, %79, %cst_23 [1] : vector<8x8xf32> to vector<8xf32>
    %81 = vector.shape_cast %80 : vector<8xf32> to vector<8x1xf32>
    %82 = vector.broadcast %81 : vector<8x1xf32> to vector<8x8xf32>
    %83 = arith.subf %79, %82 : vector<8x8xf32>
    %84 = math.exp %83 : vector<8x8xf32>
    %cst_24 = arith.constant dense<0.000000e+00> : vector<8xf32>
    %85 = vector.multi_reduction <add>, %84, %cst_24 [1] : vector<8x8xf32> to vector<8xf32>
    %86 = vector.shape_cast %85 : vector<8xf32> to vector<8x1xf32>
    %87 = tpu.reciprocal %86 {approx = true} : vector<8x1xf32> -> vector<8x1xf32>
    %88 = vector.broadcast %87 : vector<8x1xf32> to vector<8x8xf32>
    %89 = arith.mulf %84, %88 : vector<8x8xf32>
    %cst_25 = arith.constant 0.000000e+00 : f32
    %90 = vector.broadcast %cst_25 : f32 to vector<8x8xf32>
    %91 = arith.select %24, %89, %90 : vector<8x8xi1>, vector<8x8xf32>
    %92 = arith.truncf %91 : vector<8x8xf32> to vector<8x8xbf16>
    %93 = vector.extract_strided_slice %13 {offsets = [0, 16], sizes = [8, 8], strides = [1, 1]} : vector<8x32xf32> to vector<8x8xf32>
    %94 = arith.truncf %93 : vector<8x8xf32> to vector<8x8xbf16>
    %cst_26 = arith.constant dense<0.000000e+00> : vector<8x8xf32>
    %95 = tpu.matmul %92, %94, %cst_26 {dimension_numbers = #tpu.dot_dimension_numbers<[1], [0], [0], [1], [0, 0, 1, 1], [], []>} : vector<8x8xbf16>, vector<8x8xbf16>, vector<8x8xf32> -> vector<8x8xf32>
    %c0_27 = arith.constant 0 : index
    %c16 = arith.constant 16 : index
    %96 = vector.load %arg29[%c0_27, %c16] : memref<8x32xf32, #tpu.memory_space<vmem>>, vector<8x8xf32>
    tpu.vector_store %arg29[%c0_27, %c16], %95 {strides = array<i32>} : memref<8x32xf32, #tpu.memory_space<vmem>>, vector<8x8xf32>,
    %97 = vector.extract_strided_slice %11 {offsets = [0, 24], sizes = [8, 8], strides = [1, 1]} : vector<8x32xf32> to vector<8x8xf32>
    %98 = arith.truncf %97 : vector<8x8xf32> to vector<8x8xbf16>
    %99 = vector.extract_strided_slice %12 {offsets = [0, 24], sizes = [8, 8], strides = [1, 1]} : vector<8x32xf32> to vector<8x8xf32>
    %100 = arith.truncf %99 : vector<8x8xf32> to vector<8x8xbf16>
    %cst_28 = arith.constant dense<0.000000e+00> : vector<8x8xf32>
    %101 = tpu.matmul %98, %100, %cst_28 {dimension_numbers = #tpu.dot_dimension_numbers<[1], [1], [0], [0], [0, 0, 1, 0], [], []>} : vector<8x8xbf16>, vector<8x8xbf16>, vector<8x8xf32> -> vector<8x8xf32>
    %cst_29 = arith.constant -1.000000e+30 : f32
    %102 = vector.broadcast %cst_29 : f32 to vector<8x8xf32>
    %103 = arith.select %24, %101, %102 : vector<8x8xi1>, vector<8x8xf32>
    %cst_30 = arith.constant dense<0xFF800000> : vector<8xf32>
    %104 = vector.multi_reduction <maximumf>, %103, %cst_30 [1] : vector<8x8xf32> to vector<8xf32>
    %105 = vector.shape_cast %104 : vector<8xf32> to vector<8x1xf32>
    %106 = vector.broadcast %105 : vector<8x1xf32> to vector<8x8xf32>
    %107 = arith.subf %103, %106 : vector<8x8xf32>
    %108 = math.exp %107 : vector<8x8xf32>
    %cst_31 = arith.constant dense<0.000000e+00> : vector<8xf32>
    %109 = vector.multi_reduction <add>, %108, %cst_31 [1] : vector<8x8xf32> to vector<8xf32>
    %110 = vector.shape_cast %109 : vector<8xf32> to vector<8x1xf32>
    %111 = tpu.reciprocal %110 {approx = true} : vector<8x1xf32> -> vector<8x1xf32>
    %112 = vector.broadcast %111 : vector<8x1xf32> to vector<8x8xf32>
    %113 = arith.mulf %108, %112 : vector<8x8xf32>
    %cst_32 = arith.constant 0.000000e+00 : f32
    %114 = vector.broadcast %cst_32 : f32 to vector<8x8xf32>
    %115 = arith.select %24, %113, %114 : vector<8x8xi1>, vector<8x8xf32>
    %116 = arith.truncf %115 : vector<8x8xf32> to vector<8x8xbf16>
    %117 = vector.extract_strided_slice %13 {offsets = [0, 24], sizes = [8, 8], strides = [1, 1]} : vector<8x32xf32> to vector<8x8xf32>
    %118 = arith.truncf %117 : vector<8x8xf32> to vector<8x8xbf16>
    %cst_33 = arith.constant dense<0.000000e+00> : vector<8x8xf32>
    %119 = tpu.matmul %116, %118, %cst_33 {dimension_numbers = #tpu.dot_dimension_numbers<[1], [0], [0], [1], [0, 0, 1, 1], [], []>} : vector<8x8xbf16>, vector<8x8xbf16>, vector<8x8xf32> -> vector<8x8xf32>
    %c0_34 = arith.constant 0 : index
    %c24 = arith.constant 24 : index
    %120 = vector.load %arg29[%c0_34, %c24] : memref<8x32xf32, #tpu.memory_space<vmem>>, vector<8x8xf32>
    tpu.vector_store %arg29[%c0_34, %c24], %119 {strides = array<i32>} : memref<8x32xf32, #tpu.memory_space<vmem>>, vector<8x8xf32>,
    %c0_35 = arith.constant 0 : index
    %c0_36 = arith.constant 0 : index
    %121 = vector.load %arg29[%c0_35, %c0_36] : memref<8x32xf32, #tpu.memory_space<vmem>>, vector<8x32xf32>
    %122 = arith.truncf %121 : vector<8x32xf32> to vector<8x32xbf16>
    %c0_37 = arith.constant 0 : index
    %c0_38 = arith.constant 0 : index
    %123 = vector.load %arg10[%c0_37, %c0_38] : memref<32x32xbf16, #tpu.memory_space<vmem>>, vector<32x32xbf16>
    %cst_39 = arith.constant dense<0.000000e+00> : vector<8x32xf32>
    %124 = tpu.matmul %122, %123, %cst_39 {dimension_numbers = #tpu.dot_dimension_numbers<[1], [0], [0], [1], [0, 0, 1, 1], [], []>} : vector<8x32xbf16>, vector<32x32xbf16>, vector<8x32xf32> -> vector<8x32xf32>
    %c0_40 = arith.constant 0 : index
    %c0_41 = arith.constant 0 : index
    %125 = vector.load %arg11[%c0_40, %c0_41] : memref<1x32xf32, #tpu.memory_space<vmem>>, vector<1x32xf32>
    %126 = vector.broadcast %125 : vector<1x32xf32> to vector<8x32xf32>
    %127 = arith.addf %124, %126 : vector<8x32xf32>
    %128 = arith.addf %7, %127 : vector<8x32xf32>
    %c0_42 = arith.constant 0 : index
    %c0_43 = arith.constant 0 : index
    %129 = vector.load %arg12[%c0_42, %c0_43] : memref<1x32xf32, #tpu.memory_space<vmem>>, vector<1x32xf32>
    %c0_44 = arith.constant 0 : index
    %c0_45 = arith.constant 0 : index
    %130 = vector.load %arg13[%c0_44, %c0_45] : memref<1x32xf32, #tpu.memory_space<vmem>>, vector<1x32xf32>
    %cst_46 = arith.constant dense<0.000000e+00> : vector<8xf32>
    %131 = vector.multi_reduction <add>, %128, %cst_46 [1] : vector<8x32xf32> to vector<8xf32>
    %132 = vector.shape_cast %131 : vector<8xf32> to vector<8x1xf32>
    %cst_47 = arith.constant 3.200000e+01 : f32
    %133 = vector.broadcast %cst_47 : f32 to vector<8x1xf32>
    %134 = arith.divf %132, %133 : vector<8x1xf32>
    %135 = vector.broadcast %134 : vector<8x1xf32> to vector<8x32xf32>
    %136 = arith.subf %128, %135 : vector<8x32xf32>
    %137 = arith.mulf %136, %136 : vector<8x32xf32>
    %cst_48 = arith.constant dense<0.000000e+00> : vector<8xf32>
    %138 = vector.multi_reduction <add>, %137, %cst_48 [1] : vector<8x32xf32> to vector<8xf32>
    %139 = vector.shape_cast %138 : vector<8xf32> to vector<8x1xf32>
    %cst_49 = arith.constant 3.200000e+01 : f32
    %140 = vector.broadcast %cst_49 : f32 to vector<8x1xf32>
    %141 = arith.divf %139, %140 : vector<8x1xf32>
    %142 = vector.broadcast %134 : vector<8x1xf32> to vector<8x32xf32>
    %143 = arith.subf %128, %142 : vector<8x32xf32>
    %cst_50 = arith.constant 9.99999974E-6 : f32
    %144 = vector.broadcast %cst_50 : f32 to vector<8x1xf32>
    %145 = arith.addf %141, %144 : vector<8x1xf32>
    %146 = math.rsqrt %145 : vector<8x1xf32>
    %147 = vector.broadcast %146 : vector<8x1xf32> to vector<8x32xf32>
    %148 = arith.mulf %143, %147 : vector<8x32xf32>
    %149 = vector.broadcast %129 : vector<1x32xf32> to vector<8x32xf32>
    %150 = arith.mulf %148, %149 : vector<8x32xf32>
    %151 = vector.broadcast %130 : vector<1x32xf32> to vector<8x32xf32>
    %152 = arith.addf %150, %151 : vector<8x32xf32>
    %153 = arith.truncf %152 : vector<8x32xf32> to vector<8x32xbf16>
    %c0_51 = arith.constant 0 : index
    %c0_52 = arith.constant 0 : index
    %154 = vector.load %arg14[%c0_51, %c0_52] : memref<32x32xbf16, #tpu.memory_space<vmem>>, vector<32x32xbf16>
    %cst_53 = arith.constant dense<0.000000e+00> : vector<8x32xf32>
    %155 = tpu.matmul %153, %154, %cst_53 {dimension_numbers = #tpu.dot_dimension_numbers<[1], [0], [0], [1], [0, 0, 1, 1], [], []>} : vector<8x32xbf16>, vector<32x32xbf16>, vector<8x32xf32> -> vector<8x32xf32>
    %c0_54 = arith.constant 0 : index
    %c0_55 = arith.constant 0 : index
    %156 = vector.load %arg15[%c0_54, %c0_55] : memref<1x32xf32, #tpu.memory_space<vmem>>, vector<1x32xf32>
    %157 = vector.broadcast %156 : vector<1x32xf32> to vector<8x32xf32>
    %158 = arith.addf %155, %157 : vector<8x32xf32>
    %cst_56 = arith.constant 0.353553385 : f32
    %159 = vector.broadcast %cst_56 : f32 to vector<8x32xf32>
    %160 = arith.mulf %158, %159 : vector<8x32xf32>
    %c0_57 = arith.constant 0 : index
    %c0_58 = arith.constant 0 : index
    %161 = vector.load %arg28[%c0_57, %c0_58] : memref<16x64xf32, #tpu.memory_space<vmem>>, vector<16x32xf32>
    %c0_59 = arith.constant 0 : index
    %c32_60 = arith.constant 32 : index
    %162 = vector.load %arg28[%c0_59, %c32_60] : memref<16x64xf32, #tpu.memory_space<vmem>>, vector<16x32xf32>
    %c0_61 = arith.constant 0 : index
    %c0_62 = arith.constant 0 : index
    %c0_63 = arith.constant 0 : index
    %163 = vector.load %arg5[%c0_61, %c0_62, %c0_63] : memref<1x1x16xi32, #tpu.memory_space<vmem>>, vector<1x1x16xi32>
    %164 = vector.shape_cast %163 : vector<1x1x16xi32> to vector<1x16xi32>
    %c0_i32_64 = arith.constant 0 : i32
    %165 = vector.broadcast %c0_i32_64 : i32 to vector<1x16xi32>
    %166 = arith.cmpi sgt, %164, %165 : vector<1x16xi32>
    %167 = vector.extract_strided_slice %160 {offsets = [0, 0], sizes = [8, 8], strides = [1, 1]} : vector<8x32xf32> to vector<8x8xf32>
    %168 = arith.truncf %167 : vector<8x8xf32> to vector<8x8xbf16>
    %169 = vector.extract_strided_slice %161 {offsets = [0, 0], sizes = [16, 8], strides = [1, 1]} : vector<16x32xf32> to vector<16x8xf32>
    %170 = arith.truncf %169 : vector<16x8xf32> to vector<16x8xbf16>
    %cst_65 = arith.constant dense<0.000000e+00> : vector<8x16xf32>
    %171 = tpu.matmul %168, %170, %cst_65 {dimension_numbers = #tpu.dot_dimension_numbers<[1], [1], [0], [0], [0, 0, 1, 0], [], []>} : vector<8x8xbf16>, vector<16x8xbf16>, vector<8x16xf32> -> vector<8x16xf32>
    %cst_66 = arith.constant -1.000000e+30 : f32
    %172 = vector.shape_cast %166 : vector<1x16xi1> to vector<1x16xi1>
    %173 = vector.broadcast %172 : vector<1x16xi1> to vector<8x16xi1>
    %174 = vector.broadcast %cst_66 : f32 to vector<8x16xf32>
    %175 = arith.select %173, %171, %174 : vector<8x16xi1>, vector<8x16xf32>
    %cst_67 = arith.constant dense<0xFF800000> : vector<8xf32>
    %176 = vector.multi_reduction <maximumf>, %175, %cst_67 [1] : vector<8x16xf32> to vector<8xf32>
    %177 = vector.shape_cast %176 : vector<8xf32> to vector<8x1xf32>
    %178 = vector.broadcast %177 : vector<8x1xf32> to vector<8x16xf32>
    %179 = arith.subf %175, %178 : vector<8x16xf32>
    %180 = math.exp %179 : vector<8x16xf32>
    %cst_68 = arith.constant dense<0.000000e+00> : vector<8xf32>
    %181 = vector.multi_reduction <add>, %180, %cst_68 [1] : vector<8x16xf32> to vector<8xf32>
    %182 = vector.shape_cast %181 : vector<8xf32> to vector<8x1xf32>
    %183 = tpu.reciprocal %182 {approx = true} : vector<8x1xf32> -> vector<8x1xf32>
    %184 = vector.broadcast %183 : vector<8x1xf32> to vector<8x16xf32>
    %185 = arith.mulf %180, %184 : vector<8x16xf32>
    %cst_69 = arith.constant 0.000000e+00 : f32
    %186 = vector.shape_cast %166 : vector<1x16xi1> to vector<1x16xi1>
    %187 = vector.broadcast %186 : vector<1x16xi1> to vector<8x16xi1>
    %188 = vector.broadcast %cst_69 : f32 to vector<8x16xf32>
    %189 = arith.select %187, %185, %188 : vector<8x16xi1>, vector<8x16xf32>
    %190 = arith.truncf %189 : vector<8x16xf32> to vector<8x16xbf16>
    %191 = vector.extract_strided_slice %162 {offsets = [0, 0], sizes = [16, 8], strides = [1, 1]} : vector<16x32xf32> to vector<16x8xf32>
    %192 = arith.truncf %191 : vector<16x8xf32> to vector<16x8xbf16>
    %cst_70 = arith.constant dense<0.000000e+00> : vector<8x8xf32>
    %193 = tpu.matmul %190, %192, %cst_70 {dimension_numbers = #tpu.dot_dimension_numbers<[1], [0], [0], [1], [0, 0, 1, 1], [], []>} : vector<8x16xbf16>, vector<16x8xbf16>, vector<8x8xf32> -> vector<8x8xf32>
    %c0_71 = arith.constant 0 : index
    %c0_72 = arith.constant 0 : index
    %194 = vector.load %arg29[%c0_71, %c0_72] : memref<8x32xf32, #tpu.memory_space<vmem>>, vector<8x8xf32>
    tpu.vector_store %arg29[%c0_71, %c0_72], %193 {strides = array<i32>} : memref<8x32xf32, #tpu.memory_space<vmem>>, vector<8x8xf32>,
    %195 = vector.extract_strided_slice %160 {offsets = [0, 8], sizes = [8, 8], strides = [1, 1]} : vector<8x32xf32> to vector<8x8xf32>
    %196 = arith.truncf %195 : vector<8x8xf32> to vector<8x8xbf16>
    %197 = vector.extract_strided_slice %161 {offsets = [0, 8], sizes = [16, 8], strides = [1, 1]} : vector<16x32xf32> to vector<16x8xf32>
    %198 = arith.truncf %197 : vector<16x8xf32> to vector<16x8xbf16>
    %cst_73 = arith.constant dense<0.000000e+00> : vector<8x16xf32>
    %199 = tpu.matmul %196, %198, %cst_73 {dimension_numbers = #tpu.dot_dimension_numbers<[1], [1], [0], [0], [0, 0, 1, 0], [], []>} : vector<8x8xbf16>, vector<16x8xbf16>, vector<8x16xf32> -> vector<8x16xf32>
    %cst_74 = arith.constant -1.000000e+30 : f32
    %200 = vector.shape_cast %166 : vector<1x16xi1> to vector<1x16xi1>
    %201 = vector.broadcast %200 : vector<1x16xi1> to vector<8x16xi1>
    %202 = vector.broadcast %cst_74 : f32 to vector<8x16xf32>
    %203 = arith.select %201, %199, %202 : vector<8x16xi1>, vector<8x16xf32>
    %cst_75 = arith.constant dense<0xFF800000> : vector<8xf32>
    %204 = vector.multi_reduction <maximumf>, %203, %cst_75 [1] : vector<8x16xf32> to vector<8xf32>
    %205 = vector.shape_cast %204 : vector<8xf32> to vector<8x1xf32>
    %206 = vector.broadcast %205 : vector<8x1xf32> to vector<8x16xf32>
    %207 = arith.subf %203, %206 : vector<8x16xf32>
    %208 = math.exp %207 : vector<8x16xf32>
    %cst_76 = arith.constant dense<0.000000e+00> : vector<8xf32>
    %209 = vector.multi_reduction <add>, %208, %cst_76 [1] : vector<8x16xf32> to vector<8xf32>
    %210 = vector.shape_cast %209 : vector<8xf32> to vector<8x1xf32>
    %211 = tpu.reciprocal %210 {approx = true} : vector<8x1xf32> -> vector<8x1xf32>
    %212 = vector.broadcast %211 : vector<8x1xf32> to vector<8x16xf32>
    %213 = arith.mulf %208, %212 : vector<8x16xf32>
    %cst_77 = arith.constant 0.000000e+00 : f32
    %214 = vector.shape_cast %166 : vector<1x16xi1> to vector<1x16xi1>
    %215 = vector.broadcast %214 : vector<1x16xi1> to vector<8x16xi1>
    %216 = vector.broadcast %cst_77 : f32 to vector<8x16xf32>
    %217 = arith.select %215, %213, %216 : vector<8x16xi1>, vector<8x16xf32>
    %218 = arith.truncf %217 : vector<8x16xf32> to vector<8x16xbf16>
    %219 = vector.extract_strided_slice %162 {offsets = [0, 8], sizes = [16, 8], strides = [1, 1]} : vector<16x32xf32> to vector<16x8xf32>
    %220 = arith.truncf %219 : vector<16x8xf32> to vector<16x8xbf16>
    %cst_78 = arith.constant dense<0.000000e+00> : vector<8x8xf32>
    %221 = tpu.matmul %218, %220, %cst_78 {dimension_numbers = #tpu.dot_dimension_numbers<[1], [0], [0], [1], [0, 0, 1, 1], [], []>} : vector<8x16xbf16>, vector<16x8xbf16>, vector<8x8xf32> -> vector<8x8xf32>
    %c0_79 = arith.constant 0 : index
    %c8_80 = arith.constant 8 : index
    %222 = vector.load %arg29[%c0_79, %c8_80] : memref<8x32xf32, #tpu.memory_space<vmem>>, vector<8x8xf32>
    tpu.vector_store %arg29[%c0_79, %c8_80], %221 {strides = array<i32>} : memref<8x32xf32, #tpu.memory_space<vmem>>, vector<8x8xf32>,
    %223 = vector.extract_strided_slice %160 {offsets = [0, 16], sizes = [8, 8], strides = [1, 1]} : vector<8x32xf32> to vector<8x8xf32>
    %224 = arith.truncf %223 : vector<8x8xf32> to vector<8x8xbf16>
    %225 = vector.extract_strided_slice %161 {offsets = [0, 16], sizes = [16, 8], strides = [1, 1]} : vector<16x32xf32> to vector<16x8xf32>
    %226 = arith.truncf %225 : vector<16x8xf32> to vector<16x8xbf16>
    %cst_81 = arith.constant dense<0.000000e+00> : vector<8x16xf32>
    %227 = tpu.matmul %224, %226, %cst_81 {dimension_numbers = #tpu.dot_dimension_numbers<[1], [1], [0], [0], [0, 0, 1, 0], [], []>} : vector<8x8xbf16>, vector<16x8xbf16>, vector<8x16xf32> -> vector<8x16xf32>
    %cst_82 = arith.constant -1.000000e+30 : f32
    %228 = vector.shape_cast %166 : vector<1x16xi1> to vector<1x16xi1>
    %229 = vector.broadcast %228 : vector<1x16xi1> to vector<8x16xi1>
    %230 = vector.broadcast %cst_82 : f32 to vector<8x16xf32>
    %231 = arith.select %229, %227, %230 : vector<8x16xi1>, vector<8x16xf32>
    %cst_83 = arith.constant dense<0xFF800000> : vector<8xf32>
    %232 = vector.multi_reduction <maximumf>, %231, %cst_83 [1] : vector<8x16xf32> to vector<8xf32>
    %233 = vector.shape_cast %232 : vector<8xf32> to vector<8x1xf32>
    %234 = vector.broadcast %233 : vector<8x1xf32> to vector<8x16xf32>
    %235 = arith.subf %231, %234 : vector<8x16xf32>
    %236 = math.exp %235 : vector<8x16xf32>
    %cst_84 = arith.constant dense<0.000000e+00> : vector<8xf32>
    %237 = vector.multi_reduction <add>, %236, %cst_84 [1] : vector<8x16xf32> to vector<8xf32>
    %238 = vector.shape_cast %237 : vector<8xf32> to vector<8x1xf32>
    %239 = tpu.reciprocal %238 {approx = true} : vector<8x1xf32> -> vector<8x1xf32>
    %240 = vector.broadcast %239 : vector<8x1xf32> to vector<8x16xf32>
    %241 = arith.mulf %236, %240 : vector<8x16xf32>
    %cst_85 = arith.constant 0.000000e+00 : f32
    %242 = vector.shape_cast %166 : vector<1x16xi1> to vector<1x16xi1>
    %243 = vector.broadcast %242 : vector<1x16xi1> to vector<8x16xi1>
    %244 = vector.broadcast %cst_85 : f32 to vector<8x16xf32>
    %245 = arith.select %243, %241, %244 : vector<8x16xi1>, vector<8x16xf32>
    %246 = arith.truncf %245 : vector<8x16xf32> to vector<8x16xbf16>
    %247 = vector.extract_strided_slice %162 {offsets = [0, 16], sizes = [16, 8], strides = [1, 1]} : vector<16x32xf32> to vector<16x8xf32>
    %248 = arith.truncf %247 : vector<16x8xf32> to vector<16x8xbf16>
    %cst_86 = arith.constant dense<0.000000e+00> : vector<8x8xf32>
    %249 = tpu.matmul %246, %248, %cst_86 {dimension_numbers = #tpu.dot_dimension_numbers<[1], [0], [0], [1], [0, 0, 1, 1], [], []>} : vector<8x16xbf16>, vector<16x8xbf16>, vector<8x8xf32> -> vector<8x8xf32>
    %c0_87 = arith.constant 0 : index
    %c16_88 = arith.constant 16 : index
    %250 = vector.load %arg29[%c0_87, %c16_88] : memref<8x32xf32, #tpu.memory_space<vmem>>, vector<8x8xf32>
    tpu.vector_store %arg29[%c0_87, %c16_88], %249 {strides = array<i32>} : memref<8x32xf32, #tpu.memory_space<vmem>>, vector<8x8xf32>,
    %251 = vector.extract_strided_slice %160 {offsets = [0, 24], sizes = [8, 8], strides = [1, 1]} : vector<8x32xf32> to vector<8x8xf32>
    %252 = arith.truncf %251 : vector<8x8xf32> to vector<8x8xbf16>
    %253 = vector.extract_strided_slice %161 {offsets = [0, 24], sizes = [16, 8], strides = [1, 1]} : vector<16x32xf32> to vector<16x8xf32>
    %254 = arith.truncf %253 : vector<16x8xf32> to vector<16x8xbf16>
    %cst_89 = arith.constant dense<0.000000e+00> : vector<8x16xf32>
    %255 = tpu.matmul %252, %254, %cst_89 {dimension_numbers = #tpu.dot_dimension_numbers<[1], [1], [0], [0], [0, 0, 1, 0], [], []>} : vector<8x8xbf16>, vector<16x8xbf16>, vector<8x16xf32> -> vector<8x16xf32>
    %cst_90 = arith.constant -1.000000e+30 : f32
    %256 = vector.shape_cast %166 : vector<1x16xi1> to vector<1x16xi1>
    %257 = vector.broadcast %256 : vector<1x16xi1> to vector<8x16xi1>
    %258 = vector.broadcast %cst_90 : f32 to vector<8x16xf32>
    %259 = arith.select %257, %255, %258 : vector<8x16xi1>, vector<8x16xf32>
    %cst_91 = arith.constant dense<0xFF800000> : vector<8xf32>
    %260 = vector.multi_reduction <maximumf>, %259, %cst_91 [1] : vector<8x16xf32> to vector<8xf32>
    %261 = vector.shape_cast %260 : vector<8xf32> to vector<8x1xf32>
    %262 = vector.broadcast %261 : vector<8x1xf32> to vector<8x16xf32>
    %263 = arith.subf %259, %262 : vector<8x16xf32>
    %264 = math.exp %263 : vector<8x16xf32>
    %cst_92 = arith.constant dense<0.000000e+00> : vector<8xf32>
    %265 = vector.multi_reduction <add>, %264, %cst_92 [1] : vector<8x16xf32> to vector<8xf32>
    %266 = vector.shape_cast %265 : vector<8xf32> to vector<8x1xf32>
    %267 = tpu.reciprocal %266 {approx = true} : vector<8x1xf32> -> vector<8x1xf32>
    %268 = vector.broadcast %267 : vector<8x1xf32> to vector<8x16xf32>
    %269 = arith.mulf %264, %268 : vector<8x16xf32>
    %cst_93 = arith.constant 0.000000e+00 : f32
    %270 = vector.shape_cast %166 : vector<1x16xi1> to vector<1x16xi1>
    %271 = vector.broadcast %270 : vector<1x16xi1> to vector<8x16xi1>
    %272 = vector.broadcast %cst_93 : f32 to vector<8x16xf32>
    %273 = arith.select %271, %269, %272 : vector<8x16xi1>, vector<8x16xf32>
    %274 = arith.truncf %273 : vector<8x16xf32> to vector<8x16xbf16>
    %275 = vector.extract_strided_slice %162 {offsets = [0, 24], sizes = [16, 8], strides = [1, 1]} : vector<16x32xf32> to vector<16x8xf32>
    %276 = arith.truncf %275 : vector<16x8xf32> to vector<16x8xbf16>
    %cst_94 = arith.constant dense<0.000000e+00> : vector<8x8xf32>
    %277 = tpu.matmul %274, %276, %cst_94 {dimension_numbers = #tpu.dot_dimension_numbers<[1], [0], [0], [1], [0, 0, 1, 1], [], []>} : vector<8x16xbf16>, vector<16x8xbf16>, vector<8x8xf32> -> vector<8x8xf32>
    %c0_95 = arith.constant 0 : index
    %c24_96 = arith.constant 24 : index
    %278 = vector.load %arg29[%c0_95, %c24_96] : memref<8x32xf32, #tpu.memory_space<vmem>>, vector<8x8xf32>
    tpu.vector_store %arg29[%c0_95, %c24_96], %277 {strides = array<i32>} : memref<8x32xf32, #tpu.memory_space<vmem>>, vector<8x8xf32>,
    %c0_97 = arith.constant 0 : index
    %c0_98 = arith.constant 0 : index
    %279 = vector.load %arg29[%c0_97, %c0_98] : memref<8x32xf32, #tpu.memory_space<vmem>>, vector<8x32xf32>
    %280 = arith.truncf %279 : vector<8x32xf32> to vector<8x32xbf16>
    %c0_99 = arith.constant 0 : index
    %c0_100 = arith.constant 0 : index
    %281 = vector.load %arg18[%c0_99, %c0_100] : memref<32x32xbf16, #tpu.memory_space<vmem>>, vector<32x32xbf16>
    %cst_101 = arith.constant dense<0.000000e+00> : vector<8x32xf32>
    %282 = tpu.matmul %280, %281, %cst_101 {dimension_numbers = #tpu.dot_dimension_numbers<[1], [0], [0], [1], [0, 0, 1, 1], [], []>} : vector<8x32xbf16>, vector<32x32xbf16>, vector<8x32xf32> -> vector<8x32xf32>
    %c0_102 = arith.constant 0 : index
    %c0_103 = arith.constant 0 : index
    %283 = vector.load %arg19[%c0_102, %c0_103] : memref<1x32xf32, #tpu.memory_space<vmem>>, vector<1x32xf32>
    %284 = vector.broadcast %283 : vector<1x32xf32> to vector<8x32xf32>
    %285 = arith.addf %282, %284 : vector<8x32xf32>
    %286 = arith.addf %128, %285 : vector<8x32xf32>
    %c0_104 = arith.constant 0 : index
    %c0_105 = arith.constant 0 : index
    %287 = vector.load %arg20[%c0_104, %c0_105] : memref<1x32xf32, #tpu.memory_space<vmem>>, vector<1x32xf32>
    %c0_106 = arith.constant 0 : index
    %c0_107 = arith.constant 0 : index
    %288 = vector.load %arg21[%c0_106, %c0_107] : memref<1x32xf32, #tpu.memory_space<vmem>>, vector<1x32xf32>
    %cst_108 = arith.constant dense<0.000000e+00> : vector<8xf32>
    %289 = vector.multi_reduction <add>, %286, %cst_108 [1] : vector<8x32xf32> to vector<8xf32>
    %290 = vector.shape_cast %289 : vector<8xf32> to vector<8x1xf32>
    %cst_109 = arith.constant 3.200000e+01 : f32
    %291 = vector.broadcast %cst_109 : f32 to vector<8x1xf32>
    %292 = arith.divf %290, %291 : vector<8x1xf32>
    %293 = vector.broadcast %292 : vector<8x1xf32> to vector<8x32xf32>
    %294 = arith.subf %286, %293 : vector<8x32xf32>
    %295 = arith.mulf %294, %294 : vector<8x32xf32>
    %cst_110 = arith.constant dense<0.000000e+00> : vector<8xf32>
    %296 = vector.multi_reduction <add>, %295, %cst_110 [1] : vector<8x32xf32> to vector<8xf32>
    %297 = vector.shape_cast %296 : vector<8xf32> to vector<8x1xf32>
    %cst_111 = arith.constant 3.200000e+01 : f32
    %298 = vector.broadcast %cst_111 : f32 to vector<8x1xf32>
    %299 = arith.divf %297, %298 : vector<8x1xf32>
    %300 = vector.broadcast %292 : vector<8x1xf32> to vector<8x32xf32>
    %301 = arith.subf %286, %300 : vector<8x32xf32>
    %cst_112 = arith.constant 9.99999974E-6 : f32
    %302 = vector.broadcast %cst_112 : f32 to vector<8x1xf32>
    %303 = arith.addf %299, %302 : vector<8x1xf32>
    %304 = math.rsqrt %303 : vector<8x1xf32>
    %305 = vector.broadcast %304 : vector<8x1xf32> to vector<8x32xf32>
    %306 = arith.mulf %301, %305 : vector<8x32xf32>
    %307 = vector.broadcast %287 : vector<1x32xf32> to vector<8x32xf32>
    %308 = arith.mulf %306, %307 : vector<8x32xf32>
    %309 = vector.broadcast %288 : vector<1x32xf32> to vector<8x32xf32>
    %310 = arith.addf %308, %309 : vector<8x32xf32>
    %311 = arith.truncf %310 : vector<8x32xf32> to vector<8x32xbf16>
    %c0_113 = arith.constant 0 : index
    %c0_114 = arith.constant 0 : index
    %312 = vector.load %arg22[%c0_113, %c0_114] : memref<32x64xbf16, #tpu.memory_space<vmem>>, vector<32x64xbf16>
    %cst_115 = arith.constant dense<0.000000e+00> : vector<8x64xf32>
    %313 = tpu.matmul %311, %312, %cst_115 {dimension_numbers = #tpu.dot_dimension_numbers<[1], [0], [0], [1], [0, 0, 1, 1], [], []>} : vector<8x32xbf16>, vector<32x64xbf16>, vector<8x64xf32> -> vector<8x64xf32>
    %c0_116 = arith.constant 0 : index
    %c0_117 = arith.constant 0 : index
    %314 = vector.load %arg23[%c0_116, %c0_117] : memref<1x64xf32, #tpu.memory_space<vmem>>, vector<1x64xf32>
    %315 = vector.broadcast %314 : vector<1x64xf32> to vector<8x64xf32>
    %316 = arith.addf %313, %315 : vector<8x64xf32>
    %cst_118 = arith.constant 0.000000e+00 : f32
    %317 = vector.broadcast %cst_118 : f32 to vector<8x64xf32>
    %318 = arith.maximumf %316, %317 : vector<8x64xf32>
    %319 = arith.truncf %318 : vector<8x64xf32> to vector<8x64xbf16>
    %c0_119 = arith.constant 0 : index
    %c0_120 = arith.constant 0 : index
    %320 = vector.load %arg24[%c0_119, %c0_120] : memref<64x32xbf16, #tpu.memory_space<vmem>>, vector<64x32xbf16>
    %cst_121 = arith.constant dense<0.000000e+00> : vector<8x32xf32>
    %321 = tpu.matmul %319, %320, %cst_121 {dimension_numbers = #tpu.dot_dimension_numbers<[1], [0], [0], [1], [0, 0, 1, 1], [], []>} : vector<8x64xbf16>, vector<64x32xbf16>, vector<8x32xf32> -> vector<8x32xf32>
    %c0_122 = arith.constant 0 : index
    %c0_123 = arith.constant 0 : index
    %322 = vector.load %arg25[%c0_122, %c0_123] : memref<1x32xf32, #tpu.memory_space<vmem>>, vector<1x32xf32>
    %323 = vector.broadcast %322 : vector<1x32xf32> to vector<8x32xf32>
    %324 = arith.addf %321, %323 : vector<8x32xf32>
    %325 = arith.addf %286, %324 : vector<8x32xf32>
    %c0_124 = arith.constant 0 : index
    %c0_125 = arith.constant 0 : index
    %c0_126 = arith.constant 0 : index
    %326 = vector.load %arg26[%c0_124, %c0_125, %c0_126] : memref<1x8x32xf32, #tpu.memory_space<vmem>>, vector<1x8x32xf32>
    %327 = vector.shape_cast %326 : vector<1x8x32xf32> to vector<8x32xf32>
    %328 = vector.shape_cast %325 : vector<8x32xf32> to vector<1x8x32xf32>
    tpu.vector_store %arg26[%c0_124, %c0_125, %c0_126], %328 {strides = array<i32>} : memref<1x8x32xf32, #tpu.memory_space<vmem>>, vector<1x8x32xf32>,
    return
  }
  func.func @transform_0(%arg0: i32, %arg1: i32, %arg2: memref<2xi32, #tpu.memory_space<smem>>) -> (i32, i32, i32) {
    %c0_i32 = arith.constant 0 : i32
    %c0_i32_0 = arith.constant 0 : i32
    %c0_i32_1 = arith.constant 0 : i32
    return %arg0, %c0_i32, %c0_i32_0 : i32, i32, i32
  }
  func.func @transform_1(%arg0: i32, %arg1: i32, %arg2: memref<2xi32, #tpu.memory_space<smem>>) -> (i32, i32, i32) {
    %c0_i32 = arith.constant 0 : i32
    %c0_i32_0 = arith.constant 0 : i32
    %c0_i32_1 = arith.constant 0 : i32
    return %arg0, %c0_i32, %c0_i32_0 : i32, i32, i32
  }
  func.func @transform_2(%arg0: i32, %arg1: i32, %arg2: memref<2xi32, #tpu.memory_space<smem>>) -> (i32, i32, i32) {
    %c0_i32 = arith.constant 0 : i32
    %c0_i32_0 = arith.constant 0 : i32
    %c0_i32_1 = arith.constant 0 : i32
    return %arg0, %c0_i32, %c0_i32_0 : i32, i32, i32
  }
  func.func @transform_3(%arg0: i32, %arg1: i32, %arg2: memref<2xi32, #tpu.memory_space<smem>>) -> (i32, i32) {
    %c0_i32 = arith.constant 0 : i32
    %c0_i32_0 = arith.constant 0 : i32
    %c0_i32_1 = arith.constant 0 : i32
    return %c0_i32, %c0_i32_0 : i32, i32
  }
  func.func @transform_4(%arg0: i32, %arg1: i32, %arg2: memref<2xi32, #tpu.memory_space<smem>>) -> (i32, i32) {
    %c0_i32 = arith.constant 0 : i32
    %c0_i32_0 = arith.constant 0 : i32
    %c0_i32_1 = arith.constant 0 : i32
    return %c0_i32, %c0_i32_0 : i32, i32
  }
  func.func @transform_5(%arg0: i32, %arg1: i32, %arg2: memref<2xi32, #tpu.memory_space<smem>>) -> (i32, i32) {
    %c0_i32 = arith.constant 0 : i32
    %c0_i32_0 = arith.constant 0 : i32
    %c0_i32_1 = arith.constant 0 : i32
    return %c0_i32, %c0_i32_0 : i32, i32
  }
  func.func @transform_6(%arg0: i32, %arg1: i32, %arg2: memref<2xi32, #tpu.memory_space<smem>>) -> (i32, i32) {
    %c0_i32 = arith.constant 0 : i32
    %c0_i32_0 = arith.constant 0 : i32
    %c0_i32_1 = arith.constant 0 : i32
    return %c0_i32, %c0_i32_0 : i32, i32
  }
  func.func @transform_7(%arg0: i32, %arg1: i32, %arg2: memref<2xi32, #tpu.memory_space<smem>>) -> (i32, i32) {
    %c0_i32 = arith.constant 0 : i32
    %c0_i32_0 = arith.constant 0 : i32
    %c0_i32_1 = arith.constant 0 : i32
    return %c0_i32, %c0_i32_0 : i32, i32
  }
  func.func @transform_8(%arg0: i32, %arg1: i32, %arg2: memref<2xi32, #tpu.memory_space<smem>>) -> (i32, i32) {
    %c0_i32 = arith.constant 0 : i32
    %c0_i32_0 = arith.constant 0 : i32
    %c0_i32_1 = arith.constant 0 : i32
    return %c0_i32, %c0_i32_0 : i32, i32
  }
  func.func @transform_9(%arg0: i32, %arg1: i32, %arg2: memref<2xi32, #tpu.memory_space<smem>>) -> (i32, i32) {
    %c0_i32 = arith.constant 0 : i32
    %c0_i32_0 = arith.constant 0 : i32
    %c0_i32_1 = arith.constant 0 : i32
    return %c0_i32, %c0_i32_0 : i32, i32
  }
  func.func @transform_10(%arg0: i32, %arg1: i32, %arg2: memref<2xi32, #tpu.memory_space<smem>>) -> (i32, i32) {
    %c0_i32 = arith.constant 0 : i32
    %c0_i32_0 = arith.constant 0 : i32
    %c0_i32_1 = arith.constant 0 : i32
    return %c0_i32, %c0_i32_0 : i32, i32
  }
  func.func @transform_11(%arg0: i32, %arg1: i32, %arg2: memref<2xi32, #tpu.memory_space<smem>>) -> (i32, i32) {
    %c0_i32 = arith.constant 0 : i32
    %c0_i32_0 = arith.constant 0 : i32
    %c0_i32_1 = arith.constant 0 : i32
    return %c0_i32, %c0_i32_0 : i32, i32
  }
  func.func @transform_12(%arg0: i32, %arg1: i32, %arg2: memref<2xi32, #tpu.memory_space<smem>>) -> (i32, i32) {
    %c0_i32 = arith.constant 0 : i32
    %c0_i32_0 = arith.constant 0 : i32
    %c0_i32_1 = arith.constant 0 : i32
    return %c0_i32, %c0_i32_0 : i32, i32
  }
  func.func @transform_13(%arg0: i32, %arg1: i32, %arg2: memref<2xi32, #tpu.memory_space<smem>>) -> (i32, i32) {
    %c0_i32 = arith.constant 0 : i32
    %c0_i32_0 = arith.constant 0 : i32
    %c0_i32_1 = arith.constant 0 : i32
    return %c0_i32, %c0_i32_0 : i32, i32
  }
  func.func @transform_14(%arg0: i32, %arg1: i32, %arg2: memref<2xi32, #tpu.memory_space<smem>>) -> (i32, i32) {
    %c0_i32 = arith.constant 0 : i32
    %c0_i32_0 = arith.constant 0 : i32
    %c0_i32_1 = arith.constant 0 : i32
    return %c0_i32, %c0_i32_0 : i32, i32
  }
  func.func @transform_15(%arg0: i32, %arg1: i32, %arg2: memref<2xi32, #tpu.memory_space<smem>>) -> (i32, i32) {
    %c0_i32 = arith.constant 0 : i32
    %c0_i32_0 = arith.constant 0 : i32
    %c0_i32_1 = arith.constant 0 : i32
    return %c0_i32, %c0_i32_0 : i32, i32
  }
  func.func @transform_16(%arg0: i32, %arg1: i32, %arg2: memref<2xi32, #tpu.memory_space<smem>>) -> (i32, i32) {
    %c0_i32 = arith.constant 0 : i32
    %c0_i32_0 = arith.constant 0 : i32
    %c0_i32_1 = arith.constant 0 : i32
    return %c0_i32, %c0_i32_0 : i32, i32
  }
  func.func @transform_17(%arg0: i32, %arg1: i32, %arg2: memref<2xi32, #tpu.memory_space<smem>>) -> (i32, i32) {
    %c0_i32 = arith.constant 0 : i32
    %c0_i32_0 = arith.constant 0 : i32
    %c0_i32_1 = arith.constant 0 : i32
    return %c0_i32, %c0_i32_0 : i32, i32
  }
  func.func @transform_18(%arg0: i32, %arg1: i32, %arg2: memref<2xi32, #tpu.memory_space<smem>>) -> (i32, i32) {
    %c0_i32 = arith.constant 0 : i32
    %c0_i32_0 = arith.constant 0 : i32
    %c0_i32_1 = arith.constant 0 : i32
    return %c0_i32, %c0_i32_0 : i32, i32
  }
  func.func @transform_19(%arg0: i32, %arg1: i32, %arg2: memref<2xi32, #tpu.memory_space<smem>>) -> (i32, i32) {
    %c0_i32 = arith.constant 0 : i32
    %c0_i32_0 = arith.constant 0 : i32
    %c0_i32_1 = arith.constant 0 : i32
    return %c0_i32, %c0_i32_0 : i32, i32
  }
  func.func @transform_20(%arg0: i32, %arg1: i32, %arg2: memref<2xi32, #tpu.memory_space<smem>>) -> (i32, i32) {
    %c0_i32 = arith.constant 0 : i32
    %c0_i32_0 = arith.constant 0 : i32
    %c0_i32_1 = arith.constant 0 : i32
    return %c0_i32, %c0_i32_0 : i32, i32
  }
  func.func @transform_21(%arg0: i32, %arg1: i32, %arg2: memref<2xi32, #tpu.memory_space<smem>>) -> (i32, i32) {
    %c0_i32 = arith.constant 0 : i32
    %c0_i32_0 = arith.constant 0 : i32
    %c0_i32_1 = arith.constant 0 : i32
    return %c0_i32, %c0_i32_0 : i32, i32
  }
  func.func @transform_22(%arg0: i32, %arg1: i32, %arg2: memref<2xi32, #tpu.memory_space<smem>>) -> (i32, i32) {
    %c0_i32 = arith.constant 0 : i32
    %c0_i32_0 = arith.constant 0 : i32
    %c0_i32_1 = arith.constant 0 : i32
    return %c0_i32, %c0_i32_0 : i32, i32
  }
  func.func @transform_23(%arg0: i32, %arg1: i32, %arg2: memref<2xi32, #tpu.memory_space<smem>>) -> (i32, i32, i32) {
    %c0_i32 = arith.constant 0 : i32
    %c0_i32_0 = arith.constant 0 : i32
    return %arg0, %arg1, %c0_i32 : i32, i32, i32
  }
}

</mosaic_0001>

<bundles_post_ra>
// kernel: tpu_custom_call.1
= control target key start
LH: loop header
LB: loop body
LE: loop exit
PB: predicated region body
PF: predicated region fallthrough
CT: control target
= control target key end

     0   :  { %6 = vsyncpa [#allocation3], 0  ;;  %s115_s0 = inlined_call_operand.hbm [shape: f32[8,128], index: 0, kind: input, shape index: {}]   ;;  %s116_s1 = inlined_call_operand.hbm [shape: f32[8,128], index: 1, kind: output, shape index: {}]  }
   0x1   :  { %7 = vsyncpa [#allocation4], 0  ;;  %s13_s8 = sshll.u32 %s115_s0, 4  ;;  %s97_s9 = smov [#allocation2]   ;;  %s14_s8 = int_to_ptr.hbm [resolvable:$true] %s13_s8 }
   0x2   :  { %s15_s10 = sshll.u32 %s97_s9, 4  ;;  %s16_s10 = int_to_ptr.vmem [resolvable:$true] %s15_s10 }
   0x3   :  { %18 = dma.hbm_to_vmem [thread:$0]  %s14_s8, 128, %s16_s10, [#allocation3]  }
   0x4   :  { %93 = dma.done.wait [#allocation3], 128  }
   0x5   :  { %94 = vsyncadd [#allocation3], 4294967168  ;;  %s98_s11 = smov [#allocation5]   ;;  %s33_s15 = sshll.u32 %s116_s1, 4  ;;  %v23_v0 = vld [vmem:[#allocation2] sm:$0xff]  ;;  %s34_s15 = int_to_ptr.hbm [resolvable:$true] %s33_s15 }
   0x6   :  { %s31_s12 = sshll.u32 %s98_s11, 4  ;;  %v24_v1 = vadd.f32 1.0, %v23_v0  ;;  %s32_s12 = int_to_ptr.vmem [resolvable:$true] %s31_s12 }
   0x8   :  { %25 = vst [vmem:[#allocation5] sm:$0xff] %v24_v1 }
   0x9   :  { %36 = dma.vmem_to_hbm [thread:$0]  %s32_s12, 128, %s34_s15, [#allocation4]  }
   0xa   :  { %95 = dma.done.wait [#allocation4], 128  }
   0xb   :  { %96 = vsyncadd [#allocation4], 4294967168 }
   0xc   :  { %41 = vsyncpa [#allocation3], 1 }
   0xd   :  { %42 = vsyncpa [#allocation4], 1 }

// kernel: transformer_decoder_forward.5
= control target key start
LH: loop header
LB: loop body
LE: loop exit
PB: predicated region body
PF: predicated region fallthrough
CT: control target
= control target key end

     0   :  { %10 = vsyncpa [#allocation3], 0  ;;  %s347_s0 = inlined_call_operand.vmem [shape: f32[16,32], index: 0, kind: input, shape index: {}]   ;;  %s348_s1 = inlined_call_operand.vmem [shape: f32[1,32], index: 1, kind: input, shape index: {}]   ;;  %s349_s2 = inlined_call_operand.hbm [shape: f32[1,32], index: 2, kind: input, shape index: {}]   ;;  %s350_s3 = inlined_call_operand.vmem [shape: bf16[32,32], index: 3, kind: input, shape index: {}]   ;;  %s351_s4 = inlined_call_operand.hbm [shape: f32[1,32], index: 4, kind: input, shape index: {}]   ;;  %s352_s5 = inlined_call_operand.hbm [shape: f32[16,32], index: 5, kind: output, shape index: {}]  }
   0x1   :  { %11 = vsyncpa [#allocation6], 0 }
   0x2   :  { %12 = vsyncpa [#allocation4], 0  ;;  %s22_s20 = sshll.u32 %s349_s2, 4  ;;  %s280_s21 = smov [#allocation2]   ;;  %s23_s20 = int_to_ptr.hbm [resolvable:$true] %s22_s20 }
   0x3   :  { %s24_s22 = sshll.u32 %s280_s21, 4  ;;  %s35_s25 = sshll.u32 %s351_s4, 4  ;;  %s25_s22 = int_to_ptr.vmem [resolvable:$true] %s24_s22  ;;  %s36_s25 = int_to_ptr.hbm [resolvable:$true] %s35_s25 }
   0x4   :  { %27 = dma.hbm_to_vmem [thread:$0]  %s23_s20, 16, %s25_s22, [#allocation3]  }
   0x5   :  { %s281_s26 = smov [#allocation5]  }
   0x6   :  { %s37_s27 = sshll.u32 %s281_s26, 4  ;;  %s38_s27 = int_to_ptr.vmem [resolvable:$true] %s37_s27 }
   0x7   :  { %40 = dma.hbm_to_vmem [thread:$0]  %s36_s25, 16, %s38_s27, [#allocation6]  }
   0x8   :  { %274 = dma.done.wait [#allocation3], 16  }
   0x9   :  { %275 = vsyncadd [#allocation3], 4294967280 }
   0xa   :  { %276 = dma.done.wait [#allocation6], 16  }
   0xb   :  { %277 = vsyncadd [#allocation6], 4294967280  ;;  %vm54_vm0 = vcmask 261120   ;;  %v50_v0 = vld [vmem:[%s347_s0] sm:$0xff]  ;;  %v51_v2 = vld [vmem:[%s347_s0 + $0x8] sm:$0xff]  ;;  %v282_v4 = vmov 32.0  }
   0xc   :  { %v55_v1 = vsel %vm54_vm0, %v50_v0, 0.0  ;;  %v58_v3 = vsel %vm54_vm0, %v51_v2, 0.0  ;;  %196 = vrcp.f32 %v282_v4  ;;  %v186_v21 = vld [vmem:[%s350_s3 + $0x8] sm:$0xff]  ;;  %v185_v23 = vld [vmem:[%s350_s3] sm:$0xff]  ;;  %s283_s9 = smov [#allocation7]   ;;  %s162_s12 = sshll.u32 %s352_s5, 4  ;;  %s163_s12 = int_to_ptr.hbm [resolvable:$true] %s162_s12 }
   0xd   :  { %56 = vadd.xlane.f32.xlu0 %v55_v1  ;;  %146 = vmatpush.bf16.msra.mxu0 %v186_v21  ;;  %v193_v42 = vld [vmem:[%s348_s1] ss:$0 sm:$0xff]  ;;  %v195_v52 = vld [vmem:[#allocation5] ss:$0 sm:$0xff]  ;;  %s160_s1 = sshll.u32 %s283_s9, 4  ;;  %s284_s13 = smov 128   ;;  %s161_s1 = int_to_ptr.vmem [resolvable:$true] %s160_s1 }
   0xe   :  { %v194_v47 = vld [vmem:[#allocation2] ss:$0 sm:$0xff]  ;;  %s285_s14 = smov 8  }
  0x11   :  { %147 = vmatpush.bf16.msra.mxu0 %v185_v23 }
  0x12   :  { %v197_v5 = vpop.eup %196 }
  0x13   :  { %v62_v6 = vmul.f32 32.0, %v197_v5  ;;  %vm66_vm1 = vweird.f32 %v197_v5 }
  0x15   :  { %59 = vadd.xlane.f32.xlu0 %v58_v3  ;;  %v63_v7 = vsub.f32 1.0, %v62_v6 }
  0x17   :  { %v64_v8 = vmul.f32 %v197_v5, %v63_v7 }
  0x19   :  { %v65_v9 = vadd.f32 %v197_v5, %v64_v8 }
  0x1b   :  { %v67_v10 = vsel %vm66_vm1, %v197_v5, %v65_v9 }
  0x80   :  { %v57_v11 = vpop.xlane.xlu0 %56 }
  0x81   :  { %v68_v12 = vmul.f32 %v67_v10, %v57_v11 }
  0x83   :  { %v70_v13 = vsub.f32 %v50_v0, %v68_v12 }
  0x85   :  { %v72_v14 = vmul.f32 %v70_v13, %v70_v13 }
  0x87   :  { %v74_v15 = vsel %vm54_vm0, %v72_v14, 0.0 }
  0x88   :  { %75 = vadd.xlane.f32.xlu1 %v74_v15  ;;  %v60_v16 = vpop.xlane.xlu0 %59 }
  0x89   :  { %v69_v17 = vmul.f32 %v67_v10, %v60_v16 }
  0x8b   :  { %v71_v18 = vsub.f32 %v51_v2, %v69_v17 }
  0x8d   :  { %v73_v19 = vmul.f32 %v71_v18, %v71_v18 }
  0x8f   :  { %v77_v20 = vsel %vm54_vm0, %v73_v19, 0.0 }
  0x90   :  { %78 = vadd.xlane.f32.xlu1 %v77_v20 }
  0xfb   :  { %v76_v22 = vpop.xlane.xlu1 %75 }
  0xfc   :  { %v80_v24 = vmul.f32 %v76_v22, %v67_v10 }
  0xfe   :  { %v82_v25 = vadd.f32 1e-05, %v80_v24 }
 0x100   :  { %198 = vrsqrt.f32 %v82_v25  ;;  %vm90_vm3 = vweird.f32 %v82_v25 }
 0x103   :  { %v79_v26 = vpop.xlane.xlu1 %78 }
 0x104   :  { %v81_v27 = vmul.f32 %v79_v26, %v67_v10 }
 0x106   :  { %v199_v28 = vpop.eup %198  ;;  %v83_v29 = vadd.f32 1e-05, %v81_v27 }
 0x107   :  { %v85_v30 = vmul.f32 %v199_v28, %v82_v25  ;;  %vm91_vm2 = vweird.f32 %v199_v28 }
 0x108   :  { %200 = vrsqrt.f32 %v83_v29  ;;  %vm92_vm4 = vmor %vm90_vm3, %vm91_vm2  ;;  %vm100_vm6 = vweird.f32 %v83_v29 }
 0x109   :  { %v86_v31 = vmul.f32 %v199_v28, %v85_v30 }
 0x10b   :  { %v87_v32 = vmul.f32 0.5, %v86_v31 }
 0x10d   :  { %v88_v33 = vsub.f32 1.5, %v87_v32 }
 0x10e   :  { %v201_v34 = vpop.eup %200 }
 0x10f   :  { %v89_v35 = vmul.f32 %v199_v28, %v88_v33  ;;  %v95_v36 = vmul.f32 %v201_v34, %v83_v29  ;;  %vm101_vm5 = vweird.f32 %v201_v34 }
 0x110   :  { %vm102_vm7 = vmor %vm100_vm6, %vm101_vm5 }
 0x111   :  { %v96_v37 = vmul.f32 %v201_v34, %v95_v36  ;;  %v93_v38 = vsel %vm92_vm4, %v199_v28, %v89_v35 }
 0x112   :  { %v104_v41 = vmul.f32 %v93_v38, %v70_v13 }
 0x113   :  { %v97_v39 = vmul.f32 0.5, %v96_v37 }
 0x114   :  { %v109_v46 = vmul.f32 %v193_v42, %v104_v41 }
 0x115   :  { %v98_v40 = vsub.f32 1.5, %v97_v39 }
 0x116   :  { %v114_v49 = vadd.f32 %v194_v47, %v109_v46 }
 0x117   :  { %v99_v43 = vmul.f32 %v201_v34, %v98_v40 }
 0x119   :  { %v103_v44 = vsel %vm102_vm7, %v201_v34, %v99_v43 }
 0x11a   :  { %v105_v45 = vmul.f32 %v103_v44, %v71_v18 }
 0x11c   :  { %v110_v48 = vmul.f32 %v193_v42, %v105_v45 }
 0x11e   :  { %v115_v50 = vadd.f32 %v194_v47, %v110_v48 }
 0x120   :  { %v116_v51 = vpack.c.bf16 %v115_v50, %v114_v49 }
 0x122   :  { %184 = vmatmul.msk.bf16.vlgmr.msra.gmra.mxu0 %vm54_vm0, %v116_v51 }
 0x19f   :  { %v149_v53 = vpop.f32.mrf.mxu0 }
 0x1a0   :  { %v150_v54 = vadd.f32 %v195_v52, %v149_v53 }
 0x1a2   :  { %154 = vst.msk [vmem:[#allocation7] sm:$0xff] %vm54_vm0, %v150_v54 }
 0x1a7   :  { %v151_v55 = vpop.f32.mrf.mxu0 }
 0x1a8   :  { %v152_v56 = vadd.f32 %v195_v52, %v151_v55 }
 0x1aa   :  { %155 = vst.msk [vmem:[#allocation7 + $0x8] sm:$0xff] %vm54_vm0, %v152_v56 }
 0x1ab   :  { %168 = dma.vmem_to_hbm [thread:$0]  %s161_s1, 256, %s163_s12, [#allocation4], %s284_s13, %s284_s13, %s285_s14  }
 0x1ac   :  { %278 = dma.done.wait [#allocation4], 256  }
 0x1ad   :  { %279 = vsyncadd [#allocation4], 4294967040 }
 0x1ae   :  { %173 = vsyncpa [#allocation3], 1 }
 0x1af   :  { %174 = vsyncpa [#allocation6], 1 }
 0x1b0   :  { %175 = vsyncpa [#allocation4], 1 }

// kernel: transformer_decoder_forward.3
= control target key start
LH: loop header
LB: loop body
LE: loop exit
PB: predicated region body
PF: predicated region fallthrough
CT: control target
= control target key end

     0   :  { %s2043_s28 = smov [#allocation6]   ;;  %s2507_s0 = inlined_call_operand.vmem [shape: s32[2], index: 0, kind: input, shape index: {}]   ;;  %s2508_s1 = inlined_call_operand.vmem [shape: f32[2,8,32], index: 1, kind: input, shape index: {}]   ;;  %s2509_s2 = inlined_call_operand.vmem [shape: f32[2,16,32], index: 2, kind: input, shape index: {}]   ;;  %s2510_s3 = inlined_call_operand.vmem [shape: s32[2,1,16], index: 3, kind: input, shape index: {}]   ;;  %s2511_s4 = inlined_call_operand.vmem [shape: f32[1,32], index: 4, kind: input, shape index: {}]   ;;  %s2512_s5 = inlined_call_operand.vmem [shape: f32[1,32], index: 5, kind: input, shape index: {}]   ;;  %s2513_s6 = inlined_call_operand.vmem [shape: bf16[32,96], index: 6, kind: input, shape index: {}]   ;;  %s2514_s7 = inlined_call_operand.vmem [shape: f32[1,96], index: 7, kind: input, shape index: {}]   ;;  %s2515_s8 = inlined_call_operand.vmem [shape: bf16[32,32], index: 8, kind: input, shape index: {}]   ;;  %s2516_s9 = inlined_call_operand.vmem [shape: f32[1,32], index: 9, kind: input, shape index: {}]   ;;  %s2517_s10 = inlined_call_operand.vmem [shape: f32[1,32], index: 10, kind: input, shape index: {}]   ;;  %s2518_s11 = inlined_call_operand.vmem [shape: f32[1,32], index: 11, kind: input, shape index: {}]   ;;  %s2519_s12 = inlined_call_operand.vmem [shape: bf16[32,32], index: 12, kind: input, shape index: {}]   ;;  %s2520_s13 = inlined_call_operand.vmem [shape: f32[1,32], index: 13, kind: input, shape index: {}]   ;;  %s2521_s14 = inlined_call_operand.vmem [shape: bf16[32,64], index: 14, kind: input, shape index: {}]   ;;  %s2522_s15 = inlined_call_operand.vmem [shape: f32[1,64], index: 15, kind: input, shape index: {}]   ;;  %s2523_s16 = inlined_call_operand.vmem [shape: bf16[32,32], index: 16, kind: input, shape index: {}]   ;;  %s2524_s17 = inlined_call_operand.vmem [shape: f32[1,32], index: 17, kind: input, shape index: {}]   ;;  %s2525_s18 = inlined_call_operand.vmem [shape: f32[1,32], index: 18, kind: input, shape index: {}]   ;;  %s2526_s19 = inlined_call_operand.vmem [shape: f32[1,32], index: 19, kind: input, shape index: {}]   ;;  %s2527_s20 = inlined_call_operand.vmem [shape: bf16[32,64], index: 20, kind: input, shape index: {}]   ;;  %s2528_s21 = inlined_call_operand.vmem [shape: f32[1,64], index: 21, kind: input, shape index: {}]   ;;  %s2529_s22 = inlined_call_operand.vmem [shape: bf16[64,32], index: 22, kind: input, shape index: {}]   ;;  %s2530_s23 = inlined_call_operand.vmem [shape: f32[1,32], index: 23, kind: input, shape index: {}]   ;;  %s2531_s24 = inlined_call_operand.vmem [shape: f32[2,8,32], index: 24, kind: output, shape index: {}]  }
   0x1   :  { %2541 = sst [smem:[#allocation8_spill]] %s2507_s0 }
   0x2   :  { %2542 = sst [smem:[#allocation9_spill]] %s2508_s1 }
   0x3   :  { %2543 = sst [smem:[#allocation10_spill]] %s2509_s2 }
   0x4   :  { %2544 = sst [smem:[#allocation11_spill]] %s2510_s3 }
   0x5   :  { %2545 = sst [smem:[#allocation12_spill]] %s2511_s4 }
   0x6   :  { %2546 = sst [smem:[#allocation13_spill]] %s2512_s5 }
   0x7   :  { %2547 = sst [smem:[#allocation14_spill]] %s2513_s6 }
   0x8   :  { %2548 = sst [smem:[#allocation15_spill]] %s2514_s7 }
   0x9   :  { %2549 = sst [smem:[#allocation16_spill]] %s2515_s8 }
   0xa   :  { %2550 = sst [smem:[#allocation17_spill]] %s2525_s18 }
   0xb   :  { %s2551_s27 = sld [smem:[#allocation8_spill]] }
  0x11   :  { %s30_s18 = sshll.u32 %s2551_s27, 4  ;;  %s31_s18 = int_to_ptr.vmem [resolvable:$true] %s30_s18 }
  0x12   :  { %33 = dma.vmem_to_smem %s31_s18, 16, %s2043_s28, [#allocation5] }
  0x13   :  { %2029 = dma.done.wait [#allocation5], 16 }
  0x14   :  { %2030 = vsyncadd [#allocation5], 4294967280 }
  0x15   :  { %36 = sfence }
  0x16   :  { %s2188_s6 = smov 0   ;;  %s2190_s2 = smov 0  }
  0x17   :  { %s2192_s29 = smov 0  }
  0x18 LB: > { %s54_s18 = sadd.s32 1, %s2037_s2  ;;  %p1800_p0 = scmp.ge.s32.totalorder %s2041_s29, 1  ;;  %s2041_s29 = sphi %s2192_s29, %s42_s29   ;;  %s2037_s2 = sphi %s2190_s2, %s2572_s2   ;;  %s2033_s6 = sphi %s2188_s6, %s2571_s6  }
  0x19   : > { %p56_p1 = scmp.ge.s32.totalorder %s54_s18, 2  ;;  %p677_p2 = scmp.lt.s32.totalorder %s2041_s29, 3 }
  0x1b   : > { %s2574_s18 = smov (%p56_p1, %s54_s18), 0  ;;  %p678_p3 = pnand %p1800_p0, %p677_p2 }
  0x1c   : > { %p750_p4 = scmp.lt.s32.totalorder (!%p678_p3), %s2033_s6, 1  ;;  %s2552_s25 = sld [smem:[#allocation9_spill]] (!%p678_p3) }
  0x1d   : > { %681 = sbr.rel (%p678_p3) target bundleno = 3715 (0xe83), region = 112  ;;  %s2553_s5 = sld [smem:[#allocation14_spill]] (!%p678_p3) }
  0x1e   : > { %s2554_s3 = sld [smem:[#allocation12_spill]] (!%p678_p3)  ;;  %s2535_s28 = smov (!%p678_p3), 88  }
  0x1f   : > { %s2555_s4 = sld [smem:[#allocation13_spill]] (!%p678_p3)  ;;  %s2046_s30 = smov (!%p678_p3), 64  }
  0x20   : > { %s2556_s27 = sld [smem:[#allocation15_spill]] (!%p678_p3)  ;;  %s2054_s1 = smov (!%p678_p3), 56  }
  0x21   : > { %s2055_s26 = smov (!%p678_p3), 40  }
  0x22   : > { %s2210_s0 = scalar_select %p750_p4, %s2033_s6, 1  ;;  %vm777_vm0 = vcmask 261120   ;;  %v2044_v2 = vmov 32.0   ;;  %vm852_vm5 = vcmask 785408   ;;  %v1898_v40 = vld [vmem:[%s2521_s14 + $0x8] sm:$0xff]  ;;  %v1897_v41 = vld [vmem:[%s2521_s14] sm:$0xff]  ;;  %v904_v59 = vlaneseq }
  0x23   : > { %1965 = vrcp.f32 %v2044_v2  ;;  %v1896_v14 = vld [vmem:[%s2553_s5 + $0x8] sm:$0xff]  ;;  %v1895_v15 = vld [vmem:[%s2553_s5] sm:$0xff]  ;;  %886 = vmatpush.bf16.msra.mxu1 %v1898_v40  ;;  %vm959_vm6 = vcmask 1043456   ;;  %vm920_vm7 = vcmask 64512   ;;  %vm894_vm8 = vcmask 523264  }
  0x24   : > { %s2534_s7 = sshll.u32 %s2210_s0, 3  ;;  %845 = vmatpush.bf16.msra.mxu0 %v1896_v14  ;;  %v1952_v25 = vld [vmem:[%s2554_s3] ss:$0 sm:$0xff]  ;;  %s2537_s3 = smov 96   ;;  %v905_v60 = vshrl.u32 %v904_v59, 7  ;;  %v909_v61 = vand.u32 127, %v904_v59 }
  0x25   : > { %s753_s8 = scalar_lea.vmem %s2552_s25, %s2534_s7  ;;  %v1953_v28 = vld [vmem:[%s2555_s4] ss:$0 sm:$0xff]  ;;  %s2536_s25 = smov 80   ;;  %vm1040_vm12 = vcmask 130112   ;;  %vm1104_vm13 = vcmask 195712   ;;  %vm1168_vm14 = vcmask 261312  }
  0x26   : > { %v2218_v0 = vld [vmem:[%s753_s8] sm:$0xff]  ;;  %s2049_s8 = smov 120   ;;  %s2050_s4 = smov 112   ;;  %vm910_vm9 = vcmp.le.s32.totalorder %v909_v61, %v905_v60 }
  0x27   : > { %v778_v1 = vsel %vm777_vm0, %v2218_v0, 0.0  ;;  %v1954_v32 = vld [vmem:[%s2556_s27] ss:$0 sm:$0xff]  ;;  %887 = vmatpush.bf16.msra.mxu1 %v1897_v41  ;;  %s1894_s7 = sshll.u32 %s2210_s0, 4  ;;  %s2056_s27 = smov 8  }
  0x28   : > { %779 = vadd.xlane.f32.xlu0 %v778_v1  ;;  %846 = vmatpush.bf16.msra.mxu0 %v1895_v15  ;;  %v1955_v54 = vld [vmem:[%s2522_s15] ss:$0 sm:$0xff] }
  0x29   : > { %v1966_v3 = vpop.eup %1965 }
  0x2a   : > { %v782_v4 = vmul.f32 32.0, %v1966_v3  ;;  %vm786_vm1 = vweird.f32 %v1966_v3 }
  0x2c   : > { %v783_v5 = vsub.f32 1.0, %v782_v4 }
  0x2e   : > { %v784_v6 = vmul.f32 %v1966_v3, %v783_v5 }
  0x30   : > { %v785_v7 = vadd.f32 %v1966_v3, %v784_v6 }
  0x32   : > { %v2222_v8 = vsel %vm786_vm1, %v1966_v3, %v785_v7 }
  0x9b   : > { %v780_v9 = vpop.xlane.xlu0 %779 }
  0x9c   : > { %v788_v10 = vmul.f32 %v2222_v8, %v780_v9 }
  0x9e   : > { %v789_v11 = vsub.f32 %v2218_v0, %v788_v10 }
  0xa0   : > { %v790_v12 = vmul.f32 %v789_v11, %v789_v11 }
  0xa2   : > { %v791_v13 = vsel %vm777_vm0, %v790_v12, 0.0 }
  0xa3   : > { %792 = vadd.xlane.f32.xlu0 %v791_v13 }
 0x116   : > { %v793_v16 = vpop.xlane.xlu0 %792 }
 0x117   : > { %v794_v17 = vmul.f32 %v793_v16, %v2222_v8 }
 0x119   : > { %v795_v18 = vadd.f32 1e-05, %v794_v17 }
 0x11b   : > { %1967 = vrsqrt.f32 %v795_v18  ;;  %vm802_vm3 = vweird.f32 %v795_v18 }
 0x121   : > { %v1968_v19 = vpop.eup %1967 }
 0x122   : > { %v797_v20 = vmul.f32 %v1968_v19, %v795_v18  ;;  %vm803_vm2 = vweird.f32 %v1968_v19 }
 0x123   : > { %vm804_vm4 = vmor %vm802_vm3, %vm803_vm2 }
 0x124   : > { %v798_v21 = vmul.f32 %v1968_v19, %v797_v20 }
 0x126   : > { %v799_v22 = vmul.f32 0.5, %v798_v21 }
 0x128   : > { %v800_v23 = vsub.f32 1.5, %v799_v22 }
 0x12a   : > { %v801_v24 = vmul.f32 %v1968_v19, %v800_v23 }
 0x12c   : > { %v805_v26 = vsel %vm804_vm4, %v1968_v19, %v801_v24 }
 0x12d   : > { %v806_v27 = vmul.f32 %v805_v26, %v789_v11 }
 0x12f   : > { %v810_v29 = vmul.f32 %v1952_v25, %v806_v27 }
 0x131   : > { %v814_v30 = vadd.f32 %v1953_v28, %v810_v29 }
 0x133   : > { %v815_v31 = vpack.c.bf16 %v814_v30, %v814_v30 }
 0x135   : > { %1813 = vmatmul.msk.bf16.vlgmr.msra.gmra.mxu0 %vm777_vm0, %v815_v31 }
 0x1b2   : > { %v848_v33 = vpop.f32.mrf.mxu0 }
 0x1b3   : > { %v849_v34 = vadd.f32 %v1954_v32, %v848_v33 }
 0x1b5   : > { %853 = vst.msk [vmem:[#allocation2] sm:$0xff] %vm852_vm5, %v849_v34  ;;  %vm1316_vm5 = vcmask 130048  }
 0x1ba   : > { %v850_v35 = vpop.f32.mrf.mxu0 }
 0x1bc   : > { %v903_v36 = vld [vmem:[#allocation2] sm:$0xff] }
 0x1bd   : > { %v2244_v37 = vpack.c.bf16 %v903_v36, %v903_v36  ;;  %v902_v38 = vmul.f32 0.35355338, %v903_v36 }
 0x1bf   : > { %980 = vrot.lane.b32.xlu0 %v2244_v37, %s2535_s28  ;;  %954 = vrot.lane.b32.xlu2 %v2244_v37, %s2046_s30  ;;  %v2251_v39 = vpack.c.bf16 %v902_v38, %v902_v38  ;;  %s911_s28 = sld [smem:[#allocation6 + %s2033_s6]]  ;;  %s2051_s6 = smov 72  }
 0x1c0   : > { %918 = vrot.lane.b32.xlu1 %v2244_v37, %s2537_s3  ;;  %s2557_s3 = sld [smem:[#allocation10_spill]]  ;;  %s2540_s30 = smov 24  }
 0x1c5   : > { %v912_v62 = vstv %s911_s28 }
 0x1c6   : > { %s758_s5 = scalar_lea.vmem %s2557_s3, %s1894_s7  ;;  %vm913_vm10 = vcmp.lt.s32.totalorder %v909_v61, %v912_v62  ;;  %s2052_s3 = smov 104  }
 0x1c7   : > { %1044 = vrot.lane.b32.xlu0 %v2244_v37, %s2536_s25  ;;  %978 = vrot.lane.b32.xlu2 %v2251_v39, %s2049_s8  ;;  %v854_v42 = vld [vmem:[%s758_s5] sm:$0xff]  ;;  %v855_v43 = vld [vmem:[%s758_s5 + $0x8] sm:$0xff]  ;;  %vm2283_vm11 = vmand %vm910_vm9, %vm913_vm10  ;;  %s2053_s25 = smov 48   ;;  %s2539_s7 = smov 16  }
 0x1c8   : > { %v856_v44 = vpack.c.bf16 %v855_v43, %v854_v42  ;;  %s2568_s5 = smov 16  }
 0x1ca   : > { %1822 = vmatmul.msk.bf16.vlgmr.msra.gmra.mxu1 %vm777_vm0, %v856_v44 }
 0x1cf   : > { %1042 = vrot.lane.b32.xlu0 %v2251_v39, %s2050_s4 }
 0x219   : > { %v955_v45 = vpop.permute.xlu2 %954 }
 0x21a   : > { %v961_v46 = vsel %vm959_vm6, %v955_v45, 0 }
 0x21b   : > { %970 = vmatpush.bf16.msra.mxu3 %v961_v46 }
 0x221   : > { %v979_v15 = vpop.permute.xlu2 %978 }
 0x231   : > { %v981_v47 = vpop.permute.xlu0 %980 }
 0x232   : > { %v919_v48 = vpop.permute.xlu1 %918  ;;  %v986_v49 = vsel %vm920_vm7, %v981_v47, 0 }
 0x233   : > { %v925_v50 = vsel %vm920_vm7, %v919_v48, 0  ;;  %995 = vmatpush.bf16.xpose.msrb.mxu3 %v986_v49 }
 0x234   : > { %934 = vmatpush.bf16.xpose.msra.mxu2 %v925_v50 }
 0x239   : > { %v1045_v51 = vpop.permute.xlu0 %1044 }
 0x23a   : > { %v1050_v52 = vsel %vm920_vm7, %v1045_v51, 0 }
 0x23b   : > { %1823 = vmatmul.msk.bf16.vlgmr.msra.gmra.mxu2 %vm920_vm7, %v2251_v39  ;;  %1059 = vmatpush.bf16.xpose.msrb.mxu1 %v1050_v52 }
 0x241   : > { %v1043_v53 = vpop.permute.xlu0 %1042 }
 0x242   : > { %1827 = vmatmul.msk.bf16.vlgmr.msrb.gmra.mxu1 %vm920_vm7, %v1043_v53 }
 0x247   : > { %v889_v55 = vpop.f32.mrf.mxu1 }
 0x248   : > { %v890_v56 = vadd.f32 %v1955_v54, %v889_v55 }
 0x24a   : > { %895 = vst.msk [vmem:[#allocation3] sm:$0xff] %vm894_vm8, %v890_v56 }
 0x24f   : > { %v891_v57 = vpop.f32.mrf.mxu1 }
 0x250   : > { %v892_v58 = vadd.f32 %v1955_v54, %v891_v57 }
 0x251   : > { %v1287_v29 = vld [vmem:[#allocation3] sm:$0xff] }
 0x252   : > { %896 = vst.msk [vmem:[#allocation3 + $0x8] sm:$0xff] %vm894_vm8, %v892_v58 }
 0x259   : > { %v1288_v30 = vld [vmem:[#allocation3 + $0x8] sm:$0xff] }
 0x25a   : > { %v2311_v32 = vpack.c.bf16 %v1288_v30, %v1287_v29 }
 0x25c   : > { %v1297_v33 = vsel %vm920_vm7, %v2311_v32, 0 }
 0x2be   : > { %v936_v1 = vpop.f32.mrf.mxu2 }
 0x2bf   : > { %v940_v2 = vsel %vm2283_vm11, %v936_v1, -1e+30  ;;  %v1061_v3 = vpop.f32.mrf.mxu1 }
 0x2c0   : > { %v2291_v4 = vsel %vm2283_vm11, %v1061_v3, -1e+30  ;;  %v941_v5 = vsel %vm920_vm7, %v940_v2, -inf }
 0x2c1   : > { %942 = vmax.xlane.f32.xlu1 %v941_v5  ;;  %v1066_v6 = vsel %vm920_vm7, %v2291_v4, -inf }
 0x2c2   : > { %1067 = vmax.xlane.f32.xlu0 %v1066_v6 }
 0x2c6   : > { %v938_v7 = vpop.f32.mrf.mxu2 }
 0x2c7   : > { %v1063_v9 = vpop.f32.mrf.mxu1 }
 0x334   : > { %v943_v10 = vpop.xlane.xlu1 %942 }
 0x335   : > { %v944_v11 = vsub.f32 %v940_v2, %v943_v10  ;;  %v1068_v51 = vpop.xlane.xlu0 %1067 }
 0x336   : > { %v1069_v52 = vsub.f32 %v2291_v4, %v1068_v51 }
 0x337   : > { %v945_v12 = vmul.f32 1.442695, %v944_v11 }
 0x338   : > { %v1070_v53 = vmul.f32 1.442695, %v1069_v52 }
 0x339   : > { %1969 = vpow2.f32 %v945_v12 }
 0x33f   : > { %v1970_v13 = vpop.eup %1969 }
 0x340   : > { %v947_v14 = vsel %vm920_vm7, %v1970_v13, 0.0 }
 0x341   : > { %948 = vadd.xlane.f32.xlu2 %v947_v14 }
 0x359   : > { %1108 = vrot.lane.b32.xlu2 %v2244_v37, %s2051_s6 }
 0x361   : > { %1106 = vrot.lane.b32.xlu2 %v2251_v39, %s2052_s3 }
 0x3b4   : > { %v949_v16 = vpop.xlane.xlu2 %948 }
 0x3b5   : > { %1971 = vrcp.f32 %v949_v16 }
 0x3bb   : > { %v1972_v17 = vpop.eup %1971 }
 0x3bc   : > { %v951_v18 = vmul.f32 %v1972_v17, %v1970_v13  ;;  %v1109_v19 = vpop.permute.xlu2 %1108 }
 0x3bd   : > { %v1114_v22 = vsel %vm920_vm7, %v1109_v19, 0 }
 0x3be   : > { %v952_v20 = vsel %vm2283_vm11, %v951_v18, 0.0 }
 0x3bf   : > { %v953_v21 = vpack.c.bf16 %v952_v20, %v952_v20 }
 0x3c1   : > { %1824 = vmatmul.msk.bf16.vlgmr.msra.gmra.mxu3 %vm920_vm7, %v953_v21 }
 0x3c2   : > { %1123 = vmatpush.bf16.xpose.msra.mxu3 %v1114_v22 }
 0x3c4   : > { %v1107_v23 = vpop.permute.xlu2 %1106 }
 0x3d1   : > { %1825 = vmatmul.msk.bf16.vlgmr.msrb.gmra.mxu3 %vm920_vm7, %v979_v15 }
 0x3d2   : > { %1306 = vmatpush.bf16.xpose.msrb.mxu3 %v1297_v33 }
 0x3e1   : > { %1829 = vmatmul.msk.bf16.vlgmr.msra.gmra.mxu3 %vm920_vm7, %v1107_v23 }
 0x444   : > { %v972_v24 = vpop.f32.mrf.mxu3 }
 0x445   : > { %976 = vst.msk [vmem:[#allocation4] sm:$0xff] %vm920_vm7, %v972_v24 }
 0x44c   : > { %v974_v25 = vpop.f32.mrf.mxu3 }
 0x454   : > { %v997_v26 = vpop.f32.mrf.mxu3 }
 0x455   : > { %v1001_v27 = vsel %vm2283_vm11, %v997_v26, -1e+30 }
 0x456   : > { %v1002_v28 = vsel %vm920_vm7, %v1001_v27, -inf }
 0x457   : > { %1003 = vmax.xlane.f32.xlu1 %v1002_v28 }
 0x45c   : > { %v999_v31 = vpop.f32.mrf.mxu3 }
 0x45d   : > { %v1956_v31 = vld [vmem:[%s2516_s9] ss:$0 sm:$0xff] }
 0x464   : > { %v1125_v34 = vpop.f32.mrf.mxu3 }
 0x465   : > { %v1129_v35 = vsel %vm2283_vm11, %v1125_v34, -1e+30 }
 0x466   : > { %v1130_v36 = vsel %vm920_vm7, %v1129_v35, -inf }
 0x467   : > { %1131 = vmax.xlane.f32.xlu2 %v1130_v36 }
 0x46c   : > { %v1127_v38 = vpop.f32.mrf.mxu3 }
 0x47f   : > { %1079 = vrot.lane.b32.xlu2 %v2244_v37, %s2053_s25  ;;  %s2560_s25 = sld [smem:[#allocation16_spill]] }
 0x485   : > { %v1900_v18 = vld [vmem:[%s2560_s25 + $0x8] sm:$0xff]  ;;  %v1899_v19 = vld [vmem:[%s2560_s25] sm:$0xff] }
 0x486   : > { %1202 = vmatpush.bf16.msra.mxu1 %v1900_v18 }
 0x48a   : > { %1203 = vmatpush.bf16.msra.mxu1 %v1899_v19 }
 0x4ca   : > { %v1004_v39 = vpop.xlane.xlu1 %1003 }
 0x4cb   : > { %v1005_v40 = vsub.f32 %v1001_v27, %v1004_v39 }
 0x4cd   : > { %v1006_v41 = vmul.f32 1.442695, %v1005_v40 }
 0x4cf   : > { %1973 = vpow2.f32 %v1006_v41 }
 0x4d5   : > { %v1974_v42 = vpop.eup %1973 }
 0x4d6   : > { %v1008_v43 = vsel %vm920_vm7, %v1974_v42, 0.0 }
 0x4d7   : > { %1009 = vadd.xlane.f32.xlu1 %v1008_v43 }
 0x4da   : > { %v1132_v44 = vpop.xlane.xlu2 %1131 }
 0x4db   : > { %v1133_v45 = vsub.f32 %v1129_v35, %v1132_v44  ;;  %v1902_v44 = vld [vmem:[%s2519_s12 + $0x8] sm:$0xff] }
 0x4dd   : > { %v1134_v46 = vmul.f32 1.442695, %v1133_v45 }
 0x4df   : > { %1975 = vpow2.f32 %v1134_v46 }
 0x4e0   : > { %1977 = vpow2.f32 %v1070_v53 }
 0x4e2   : > { %v1080_v47 = vpop.permute.xlu2 %1079 }
 0x4e3   : > { %v1085_v48 = vsel %vm959_vm6, %v1080_v47, 0 }
 0x4e4   : > { %1094 = vmatpush.bf16.msrb.mxu2 %v1085_v48 }
 0x4e5   : > { %v1976_v49 = vpop.eup %1975 }
 0x4e6   : > { %v1136_v50 = vsel %vm920_vm7, %v1976_v49, 0.0  ;;  %v1978_v54 = vpop.eup %1977 }
 0x4e7   : > { %1137 = vadd.xlane.f32.xlu0 %v1136_v50  ;;  %v1072_v55 = vsel %vm920_vm7, %v1978_v54, 0.0 }
 0x4e8   : > { %1279 = vmatpush.bf16.msra.mxu2 %v1902_v44 }
 0x4f0   : > { %1015 = vrot.lane.b32.xlu1 %v2244_v37, %s2054_s1 }
 0x4fb   : > { %1143 = vrot.lane.b32.xlu0 %v2244_v37, %s2055_s26 }
 0x51a   : > { %1073 = vadd.xlane.f32.xlu1 %v1072_v55 }
 0x54a   : > { %v1010_v56 = vpop.xlane.xlu1 %1009 }
 0x54b   : > { %1979 = vrcp.f32 %v1010_v56 }
 0x551   : > { %v1980_v57 = vpop.eup %1979 }
 0x552   : > { %v1012_v58 = vmul.f32 %v1980_v57, %v1974_v42  ;;  %v1958_v57 = vld [vmem:[%s2518_s11] ss:$0 sm:$0xff] }
 0x554   : > { %v1013_v61 = vsel %vm2283_vm11, %v1012_v58, 0.0 }
 0x555   : > { %v1014_v62 = vpack.c.bf16 %v1013_v61, %v1013_v61  ;;  %v1959_v61 = vld [vmem:[%s2520_s13] ss:$0 sm:$0xff] }
 0x55a   : > { %v1138_v59 = vpop.xlane.xlu0 %1137 }
 0x55b   : > { %1981 = vrcp.f32 %v1138_v59 }
 0x561   : > { %v1982_v1 = vpop.eup %1981 }
 0x562   : > { %v1016_v60 = vpop.permute.xlu1 %1015  ;;  %v1140_v3 = vmul.f32 %v1982_v1, %v1976_v49 }
 0x563   : > { %v1021_v37 = vsel %vm959_vm6, %v1016_v60, 0 }
 0x564   : > { %1030 = vmatpush.bf16.msrb.mxu0 %v1021_v37  ;;  %v1141_v5 = vsel %vm2283_vm11, %v1140_v3, 0.0 }
 0x565   : > { %v1142_v6 = vpack.c.bf16 %v1141_v5, %v1141_v5 }
 0x567   : > { %1826 = vmatmul.msk.bf16.vlgmr.msrb.gmra.mxu0 %vm920_vm7, %v1014_v62 }
 0x56d   : > { %v1144_v2 = vpop.permute.xlu0 %1143 }
 0x56e   : > { %v1149_v4 = vsel %vm959_vm6, %v1144_v2, 0 }
 0x56f   : > { %1158 = vmatpush.bf16.msra.mxu0 %v1149_v4 }
 0x577   : > { %1830 = vmatmul.msk.bf16.vlgmr.msra.gmra.mxu0 %vm920_vm7, %v1142_v6 }
 0x58d   : > { %v1074_v7 = vpop.xlane.xlu1 %1073 }
 0x58e   : > { %1983 = vrcp.f32 %v1074_v7  ;;  %v2059_v7 = vmov 0  }
 0x594   : > { %v1984_v9 = vpop.eup %1983 }
 0x595   : > { %v1076_v10 = vmul.f32 %v1984_v9, %v1978_v54  ;;  %v1957_v54 = vld [vmem:[%s2517_s10] ss:$0 sm:$0xff] }
 0x597   : > { %v1077_v11 = vsel %vm2283_vm11, %v1076_v10, 0.0 }
 0x598   : > { %v1078_v12 = vpack.c.bf16 %v1077_v11, %v1077_v11  ;;  %v1904_v11 = vld [vmem:[%s2523_s16 + $0x8] sm:$0xff] }
 0x59a   : > { %1828 = vmatmul.msk.bf16.vlgmr.msrb.gmra.mxu2 %vm920_vm7, %v1078_v12 }
 0x5e4   : > { %v1032_v13 = vpop.f32.mrf.mxu0 }
 0x5e5   : > { %1037 = vrot.lane.b32.xlu2 %v1032_v13, %s2056_s27 }
 0x5ec   : > { %v1034_v14 = vpop.f32.mrf.mxu0 }
 0x5f4   : > { %v1160_v15 = vpop.f32.mrf.mxu0 }
 0x5f5   : > { %1165 = vrot.lane.b32.xlu2 %v1160_v15, %s2540_s30  ;;  %s2561_s30 = sld [smem:[#allocation11_spill]] }
 0x5fc   : > { %v1162_v16 = vpop.f32.mrf.mxu0 }
 0x5fd   : > { %1354 = vrot.lane.b32.xlu2 %v2311_v32, %s2049_s8 }
 0x605   : > { %1415 = vrot.lane.b32.xlu2 %v2311_v32, %s2050_s4 }
 0x60d   : > { %1476 = vrot.lane.b32.xlu2 %v2311_v32, %s2052_s3 }
 0x61d   : > { %v1096_v63 = vpop.f32.mrf.mxu2 }
 0x61e   : > { %1101 = vrot.lane.b32.xlu0 %v1096_v63, %s2539_s7  ;;  %s761_s7 = scalar_lea.vmem %s2561_s30, %s2210_s0 }
 0x61f   : > { %v1289_v6 = vld [vmem:[%s761_s7] sm:$0x1]  ;;  %s2570_s7 = sshll.u32 %s2210_s0, 3 }
 0x620   : > { %vm1290_vm3 = vcmp.gt.s32.totalorder %v1289_v6, 0 }
 0x621   : > { %v1312_v9 = vsel %vm1290_vm3, 1, %v2059_v7 }
 0x622   : > { %v1313_v10 = vperm.slane %v1312_v9, 0 }
 0x624   : > { %vm2397_vm4 = vcmp.eq.s32.totalorder %v1313_v10, 1 }
 0x625   : > { %v1098_v17 = vpop.f32.mrf.mxu2 }
 0x63f   : > { %v1038_v20 = vpop.permute.xlu2 %1037 }
 0x640   : > { %1041 = vst.msk [vmem:[#allocation4] sm:$0xff] %vm1040_vm12, %v1038_v20 }
 0x64f   : > { %v1166_v21 = vpop.permute.xlu2 %1165 }
 0x657   : > { %v1355_v22 = vpop.permute.xlu2 %1354 }
 0x658   : > { %v1360_v23 = vsel %vm920_vm7, %v1355_v22, 0 }
 0x659   : > { %1369 = vmatpush.bf16.xpose.msrb.mxu1 %v1360_v23 }
 0x65f   : > { %v1416_v24 = vpop.permute.xlu2 %1415 }
 0x660   : > { %v1421_v25 = vsel %vm920_vm7, %v1416_v24, 0 }
 0x661   : > { %1430 = vmatpush.bf16.xpose.msra.mxu3 %v1421_v25 }
 0x667   : > { %v1477_v27 = vpop.permute.xlu2 %1476 }
 0x668   : > { %v1482_v30 = vsel %vm920_vm7, %v1477_v27, 0 }
 0x690   : > { %v1102_v26 = vpop.permute.xlu0 %1101 }
 0x691   : > { %1105 = vst.msk [vmem:[#allocation4] sm:$0xff] %vm1104_vm13, %v1102_v26 }
 0x692   : > { %1169 = vst.msk [vmem:[#allocation4] sm:$0xff] %vm1168_vm14, %v1166_v21 }
 0x699   : > { %v1170_v28 = vld [vmem:[#allocation4] sm:$0xff] }
 0x69a   : > { %v1171_v29 = vpack.c.bf16 %v1170_v28, %v1170_v28 }
 0x69c   : > { %1839 = vmatmul.msk.bf16.vlgmr.msra.gmra.mxu1 %vm777_vm0, %v1171_v29 }
 0x69d   : > { %1491 = vmatpush.bf16.xpose.msra.mxu1 %v1482_v30 }
 0x719   : > { %v1205_v33 = vpop.f32.mrf.mxu1 }
 0x71a   : > { %v1206_v34 = vadd.f32 %v1956_v31, %v1205_v33 }
 0x71c   : > { %v2363_v35 = vadd.f32 %v1206_v34, %v2218_v0  ;;  %v1901_v0 = vld [vmem:[%s2519_s12] sm:$0xff] }
 0x71d   : > { %1280 = vmatpush.bf16.msra.mxu2 %v1901_v0 }
 0x71e   : > { %v1212_v36 = vsel %vm777_vm0, %v2363_v35, 0.0 }
 0x71f   : > { %1213 = vadd.xlane.f32.xlu0 %v1212_v36 }
 0x721   : > { %v1207_v38 = vpop.f32.mrf.mxu1 }
 0x792   : > { %v1214_v39 = vpop.xlane.xlu0 %1213 }
 0x793   : > { %v1222_v40 = vmul.f32 %v1214_v39, %v2222_v8 }
 0x795   : > { %v1223_v41 = vsub.f32 %v2363_v35, %v1222_v40 }
 0x797   : > { %v1224_v42 = vmul.f32 %v1223_v41, %v1223_v41 }
 0x799   : > { %v1225_v43 = vsel %vm777_vm0, %v1224_v42, 0.0 }
 0x79a   : > { %1226 = vadd.xlane.f32.xlu1 %v1225_v43 }
 0x80d   : > { %v1227_v45 = vpop.xlane.xlu1 %1226 }
 0x80e   : > { %v1228_v46 = vmul.f32 %v1227_v45, %v2222_v8 }
 0x810   : > { %v1229_v47 = vadd.f32 1e-05, %v1228_v46 }
 0x812   : > { %1985 = vrsqrt.f32 %v1229_v47  ;;  %vm1236_vm1 = vweird.f32 %v1229_v47 }
 0x818   : > { %v1986_v48 = vpop.eup %1985 }
 0x819   : > { %v1231_v49 = vmul.f32 %v1986_v48, %v1229_v47  ;;  %vm1237_vm15 = vweird.f32 %v1986_v48 }
 0x81a   : > { %vm1238_vm2 = vmor %vm1236_vm1, %vm1237_vm15 }
 0x81b   : > { %v1232_v50 = vmul.f32 %v1986_v48, %v1231_v49 }
 0x81d   : > { %v1233_v51 = vmul.f32 0.5, %v1232_v50 }
 0x81f   : > { %v1234_v52 = vsub.f32 1.5, %v1233_v51 }
 0x821   : > { %v1235_v53 = vmul.f32 %v1986_v48, %v1234_v52 }
 0x823   : > { %v1239_v55 = vsel %vm1238_vm2, %v1986_v48, %v1235_v53 }
 0x824   : > { %v1240_v56 = vmul.f32 %v1239_v55, %v1223_v41 }
 0x826   : > { %v1244_v58 = vmul.f32 %v1957_v54, %v1240_v56 }
 0x828   : > { %v1248_v59 = vadd.f32 %v1958_v57, %v1244_v58 }
 0x82a   : > { %v1249_v60 = vpack.c.bf16 %v1248_v59, %v1248_v59 }
 0x82c   : > { %1848 = vmatmul.msk.bf16.vlgmr.msra.gmra.mxu2 %vm777_vm0, %v1249_v60 }
 0x8af   : > { %v1282_v37 = vpop.f32.mrf.mxu2 }
 0x8b0   : > { %v1283_v62 = vadd.f32 %v1959_v61, %v1282_v37 }
 0x8b2   : > { %v1286_v1 = vmul.f32 0.35355338, %v1283_v62 }
 0x8b4   : > { %v1291_v2 = vpack.c.bf16 %v1286_v1, %v1286_v1 }
 0x8b6   : > { %1413 = vrot.lane.b32.xlu2 %v1291_v2, %s2050_s4  ;;  %1352 = vrot.lane.b32.xlu1 %v1291_v2, %s2049_s8  ;;  %s2564_s8 = smov 96   ;;  %s2565_s4 = smov 80  }
 0x8b7   : > { %1849 = vmatmul.msk.bf16.vlgmr.msrb.gmra.mxu3 %vm920_vm7, %v1291_v2  ;;  %v1284_v3 = vpop.f32.mrf.mxu2 }
 0x8b8   : > { %1566 = vmatpush.bf16.msrb.mxu3 %v1904_v11 }
 0x8be   : > { %1474 = vrot.lane.b32.xlu1 %v1291_v2, %s2052_s3  ;;  %s2566_s3 = smov 88  }
 0x910   : > { %v1414_v4 = vpop.permute.xlu2 %1413 }
 0x911   : > { %1853 = vmatmul.msk.bf16.vlgmr.msra.gmra.mxu3 %vm920_vm7, %v1414_v4 }
 0x928   : > { %v1353_v5 = vpop.permute.xlu1 %1352 }
 0x929   : > { %1851 = vmatmul.msk.bf16.vlgmr.msrb.gmra.mxu1 %vm920_vm7, %v1353_v5 }
 0x930   : > { %v1475_v12 = vpop.permute.xlu1 %1474 }
 0x939   : > { %1855 = vmatmul.msk.bf16.vlgmr.msra.gmra.mxu1 %vm920_vm7, %v1475_v12 }
 0x93a   : > { %v1308_v13 = vpop.f32.mrf.mxu3 }
 0x93b   : > { %v1315_v14 = vsel %vm2397_vm4, %v1308_v13, -1e+30 }
 0x93c   : > { %v1317_v15 = vsel %vm1316_vm5, %v1315_v14, -inf }
 0x93d   : > { %1318 = vmax.xlane.f32.xlu0 %v1317_v15 }
 0x942   : > { %v1310_v16 = vpop.f32.mrf.mxu3 }
 0x994   : > { %v1432_v63 = vpop.f32.mrf.mxu3 }
 0x995   : > { %v1436_v17 = vsel %vm2397_vm4, %v1432_v63, -1e+30 }
 0x996   : > { %v1437_v18 = vsel %vm1316_vm5, %v1436_v17, -inf }
 0x997   : > { %1438 = vmax.xlane.f32.xlu0 %v1437_v18 }
 0x99c   : > { %v1434_v19 = vpop.f32.mrf.mxu3 }
 0x9a6   : > { %v1371_v20 = vpop.f32.mrf.mxu1 }
 0x9a7   : > { %v1375_v21 = vsel %vm2397_vm4, %v1371_v20, -1e+30  ;;  %v1903_v20 = vld [vmem:[%s2523_s16] sm:$0xff] }
 0x9a8   : > { %v1376_v22 = vsel %vm1316_vm5, %v1375_v21, -inf  ;;  %1567 = vmatpush.bf16.msrb.mxu3 %v1903_v20 }
 0x9a9   : > { %1377 = vmax.xlane.f32.xlu2 %v1376_v22 }
 0x9ae   : > { %v1373_v23 = vpop.f32.mrf.mxu1 }
 0x9b0   : > { %v1319_v24 = vpop.xlane.xlu0 %1318 }
 0x9b1   : > { %v1320_v25 = vsub.f32 %v1315_v14, %v1319_v24 }
 0x9b3   : > { %v1321_v26 = vmul.f32 1.442695, %v1320_v25  ;;  %v1960_v25 = vld [vmem:[%s2524_s17] ss:$0 sm:$0xff] }
 0x9b5   : > { %1987 = vpow2.f32 %v1321_v26 }
 0x9b6   : > { %v1493_v27 = vpop.f32.mrf.mxu1 }
 0x9b7   : > { %v1497_v28 = vsel %vm2397_vm4, %v1493_v27, -1e+30 }
 0x9b8   : > { %v1498_v29 = vsel %vm1316_vm5, %v1497_v28, -inf }
 0x9b9   : > { %1499 = vmax.xlane.f32.xlu1 %v1498_v29 }
 0x9bb   : > { %v1988_v30 = vpop.eup %1987 }
 0x9bc   : > { %v1323_v31 = vsel %vm1316_vm5, %v1988_v30, 0.0 }
 0x9bd   : > { %1324 = vadd.xlane.f32.xlu0 %v1323_v31 }
 0x9be   : > { %v1495_v33 = vpop.f32.mrf.mxu1 }
 0x9c1   : > { %1331 = vrot.lane.b32.xlu2 %v2311_v32, %s2564_s8 }
 0x9c9   : > { %1450 = vrot.lane.b32.xlu2 %v2311_v32, %s2565_s4  ;;  %s2569_s4 = sld [smem:[#allocation17_spill]] }
 0xa0a   : > { %v1439_v41 = vpop.xlane.xlu0 %1438 }
 0xa0b   : > { %v1440_v53 = vsub.f32 %v1436_v17, %v1439_v41 }
 0xa0d   : > { %v1441_v54 = vmul.f32 1.442695, %v1440_v53  ;;  %v1962_v53 = vld [vmem:[%s2526_s19] ss:$0 sm:$0xff] }
 0xa1c   : > { %v1378_v34 = vpop.xlane.xlu2 %1377 }
 0xa1d   : > { %v1379_v36 = vsub.f32 %v1375_v21, %v1378_v34 }
 0xa1f   : > { %v1380_v38 = vmul.f32 1.442695, %v1379_v36 }
 0xa21   : > { %1989 = vpow2.f32 %v1380_v38 }
 0xa24   : > { %v1332_v39 = vpop.permute.xlu2 %1331 }
 0xa25   : > { %1344 = vmatpush.bf16.msrb.mxu0 %v1332_v39  ;;  %v1906_v39 = vld [vmem:[%s2527_s20 + $0x8] sm:$0xff] }
 0xa27   : > { %v1990_v40 = vpop.eup %1989 }
 0xa28   : > { %v1382_v42 = vsel %vm1316_vm5, %v1990_v40, 0.0 }
 0xa29   : > { %1383 = vadd.xlane.f32.xlu0 %v1382_v42 }
 0xa2c   : > { %v1451_v43 = vpop.permute.xlu2 %1450  ;;  %v1500_v44 = vpop.xlane.xlu1 %1499 }
 0xa2d   : > { %v1501_v0 = vsub.f32 %v1497_v28, %v1500_v44  ;;  %1463 = vmatpush.bf16.msra.mxu0 %v1451_v43  ;;  %v1909_v43 = vld [vmem:[%s2529_s22 + $0x10] sm:$0xff] }
 0xa2f   : > { %v1502_v45 = vmul.f32 1.442695, %v1501_v0  ;;  %v1908_v0 = vld [vmem:[%s2529_s22 + $0x8] sm:$0xff] }
 0xa30   : > { %v1325_v46 = vpop.xlane.xlu0 %1324 }
 0xa31   : > { %1991 = vpow2.f32 %v1502_v45 }
 0xa32   : > { %1993 = vrcp.f32 %v1325_v46 }
 0xa33   : > { %1995 = vpow2.f32 %v1441_v54 }
 0xa37   : > { %v1992_v47 = vpop.eup %1991 }
 0xa38   : > { %v1994_v48 = vpop.eup %1993  ;;  %v1504_v49 = vsel %vm1316_vm5, %v1992_v47, 0.0 }
 0xa39   : > { %v1327_v50 = vmul.f32 %v1994_v48, %v1988_v30  ;;  %1505 = vadd.xlane.f32.xlu1 %v1504_v49  ;;  %v1996_v55 = vpop.eup %1995 }
 0xa3a   : > { %v1443_v56 = vsel %vm1316_vm5, %v1996_v55, 0.0 }
 0xa3b   : > { %v1328_v51 = vsel %vm2397_vm4, %v1327_v50, 0.0  ;;  %v1961_v50 = vld [vmem:[%s2569_s4] ss:$0 sm:$0xff] }
 0xa3c   : > { %v1329_v52 = vpack.c.bf16 %v1328_v51, %v1328_v51 }
 0xa3d   : > { %1389 = vrot.lane.b32.xlu0 %v2311_v32, %s2566_s3  ;;  %s768_s3 = scalar_lea.vmem %s2531_s24, %s2570_s7 }
 0xa3e   : > { %1850 = vmatmul.msk.bf16.vlgmr.msrb.gmra.mxu0 %vm1316_vm5, %v1329_v52 }
 0xa3f   : > { %1636 = vmatpush.bf16.msrb.mxu0 %v1906_v39 }
 0xa52   : > { %1511 = vrot.lane.b32.xlu1 %v2311_v32, %s2051_s6  ;;  %s2567_s6 = smov 24  }
 0xa67   : > { %1444 = vadd.xlane.f32.xlu0 %v1443_v56 }
 0xa9c   : > { %v1384_v57 = vpop.xlane.xlu0 %1383 }
 0xa9d   : > { %1997 = vrcp.f32 %v1384_v57  ;;  %v1907_v57 = vld [vmem:[%s2529_s22] sm:$0xff] }
 0xaa3   : > { %v1998_v58 = vpop.eup %1997 }
 0xaa4   : > { %v1386_v59 = vmul.f32 %v1998_v58, %v1990_v40  ;;  %v1910_v40 = vld [vmem:[%s2529_s22 + $0x18] sm:$0xff]  ;;  %v1963_v58 = vld [vmem:[%s2528_s21] ss:$0 sm:$0xff] }
 0xaa5   : > { %1689 = vmatpush.bf16.msrb.mxu1 %v1910_v40 }
 0xaa6   : > { %v1387_v60 = vsel %vm2397_vm4, %v1386_v59, 0.0 }
 0xaa7   : > { %v1388_v37 = vpack.c.bf16 %v1387_v60, %v1387_v60 }
 0xaa9   : > { %1690 = vmatpush.bf16.msrb.mxu1 %v1909_v43 }
 0xaac   : > { %v1506_v62 = vpop.xlane.xlu1 %1505 }
 0xaad   : > { %1999 = vrcp.f32 %v1506_v62  ;;  %1691 = vmatpush.bf16.msrb.mxu1 %v1908_v0 }
 0xaaf   : > { %v1390_v61 = vpop.permute.xlu0 %1389 }
 0xab0   : > { %1402 = vmatpush.bf16.msrb.mxu2 %v1390_v61 }
 0xab1   : > { %1692 = vmatpush.bf16.msrb.mxu1 %v1907_v57 }
 0xab3   : > { %1852 = vmatmul.msk.bf16.vlgmr.msrb.gmra.mxu2 %vm1316_vm5, %v1388_v37  ;;  %v2000_v1 = vpop.eup %1999 }
 0xab4   : > { %v1508_v2 = vmul.f32 %v2000_v1, %v1992_v47 }
 0xab6   : > { %v1509_v3 = vsel %vm2397_vm4, %v1508_v2, 0.0 }
 0xab7   : > { %v1510_v6 = vpack.c.bf16 %v1509_v3, %v1509_v3 }
 0xabb   : > { %v1346_v32 = vpop.f32.mrf.mxu0 }
 0xabc   : > { %1350 = vst.msk [vmem:[#allocation4] sm:$0xff] %vm920_vm7, %v1346_v32  ;;  %v1964_v32 = vld [vmem:[%s2530_s23] ss:$0 sm:$0xff] }
 0xac3   : > { %v1348_v4 = vpop.f32.mrf.mxu0 }
 0xac4   : > { %v1512_v5 = vpop.permute.xlu1 %1511 }
 0xac5   : > { %1524 = vmatpush.bf16.msra.mxu2 %v1512_v5 }
 0xac8   : > { %1856 = vmatmul.msk.bf16.vlgmr.msra.gmra.mxu2 %vm1316_vm5, %v1510_v6 }
 0xada   : > { %v1445_v7 = vpop.xlane.xlu0 %1444 }
 0xadb   : > { %2001 = vrcp.f32 %v1445_v7 }
 0xae1   : > { %v2002_v9 = vpop.eup %2001 }
 0xae2   : > { %v1447_v10 = vmul.f32 %v2002_v9, %v1996_v55 }
 0xae4   : > { %v1448_v12 = vsel %vm2397_vm4, %v1447_v10, 0.0 }
 0xae5   : > { %v1449_v13 = vpack.c.bf16 %v1448_v12, %v1448_v12 }
 0xae7   : > { %1854 = vmatmul.msk.bf16.vlgmr.msra.gmra.mxu0 %vm1316_vm5, %v1449_v13 }
 0xb36   : > { %v1404_v14 = vpop.f32.mrf.mxu2 }
 0xb37   : > { %1409 = vrot.lane.b32.xlu2 %v1404_v14, %s2056_s27 }
 0xb3e   : > { %v1406_v15 = vpop.f32.mrf.mxu2 }
 0xb4b   : > { %v1526_v16 = vpop.f32.mrf.mxu2 }
 0xb4c   : > { %1531 = vrot.lane.b32.xlu2 %v1526_v16, %s2567_s6 }
 0xb53   : > { %v1528_v63 = vpop.f32.mrf.mxu2 }
 0xb64   : > { %v1465_v17 = vpop.f32.mrf.mxu0 }
 0xb65   : > { %1470 = vrot.lane.b32.xlu1 %v1465_v17, %s2568_s5 }
 0xb6c   : > { %v1467_v18 = vpop.f32.mrf.mxu0 }
 0xb91   : > { %v1410_v19 = vpop.permute.xlu2 %1409 }
 0xb92   : > { %1412 = vst.msk [vmem:[#allocation4] sm:$0xff] %vm1040_vm12, %v1410_v19 }
 0xba6   : > { %v1532_v22 = vpop.permute.xlu2 %1531 }
 0xbd7   : > { %v1471_v21 = vpop.permute.xlu1 %1470 }
 0xbd8   : > { %1473 = vst.msk [vmem:[#allocation4] sm:$0xff] %vm1104_vm13, %v1471_v21 }
 0xbd9   : > { %1534 = vst.msk [vmem:[#allocation4] sm:$0xff] %vm1168_vm14, %v1532_v22 }
 0xbe0   : > { %v1535_v23 = vld [vmem:[#allocation4] sm:$0xff] }
 0xbe1   : > { %v1536_v24 = vpack.c.bf16 %v1535_v23, %v1535_v23 }
 0xbe3   : > { %1865 = vmatmul.msk.bf16.vlgmr.msrb.gmra.mxu3 %vm777_vm0, %v1536_v24 }
 0xc66   : > { %v1569_v26 = vpop.f32.mrf.mxu3 }
 0xc67   : > { %v1570_v27 = vadd.f32 %v1960_v25, %v1569_v26 }
 0xc69   : > { %v1573_v28 = vadd.f32 %v1570_v27, %v2363_v35  ;;  %v1905_v35 = vld [vmem:[%s2527_s20] sm:$0xff] }
 0xc6a   : > { %1637 = vmatpush.bf16.msrb.mxu0 %v1905_v35 }
 0xc6b   : > { %v1576_v29 = vsel %vm777_vm0, %v1573_v28, 0.0 }
 0xc6c   : > { %1577 = vadd.xlane.f32.xlu1 %v1576_v29 }
 0xc6e   : > { %v1571_v30 = vpop.f32.mrf.mxu3 }
 0xcdf   : > { %v1578_v31 = vpop.xlane.xlu1 %1577 }
 0xce0   : > { %v1579_v33 = vmul.f32 %v1578_v31, %v2222_v8 }
 0xce2   : > { %v1580_v34 = vsub.f32 %v1573_v28, %v1579_v33 }
 0xce4   : > { %v1581_v36 = vmul.f32 %v1580_v34, %v1580_v34 }
 0xce6   : > { %v1582_v38 = vsel %vm777_vm0, %v1581_v36, 0.0 }
 0xce7   : > { %1583 = vadd.xlane.f32.xlu2 %v1582_v38 }
 0xd5a   : > { %v1584_v41 = vpop.xlane.xlu2 %1583 }
 0xd5b   : > { %v1585_v42 = vmul.f32 %v1584_v41, %v2222_v8 }
 0xd5d   : > { %v1586_v44 = vadd.f32 1e-05, %v1585_v42 }
 0xd5f   : > { %2003 = vrsqrt.f32 %v1586_v44  ;;  %vm1593_vm7 = vweird.f32 %v1586_v44 }
 0xd65   : > { %v2004_v45 = vpop.eup %2003 }
 0xd66   : > { %v1588_v46 = vmul.f32 %v2004_v45, %v1586_v44  ;;  %vm1594_vm6 = vweird.f32 %v2004_v45 }
 0xd67   : > { %vm1595_vm9 = vmor %vm1593_vm7, %vm1594_vm6 }
 0xd68   : > { %v1589_v47 = vmul.f32 %v2004_v45, %v1588_v46 }
 0xd6a   : > { %v1590_v48 = vmul.f32 0.5, %v1589_v47 }
 0xd6c   : > { %v1591_v49 = vsub.f32 1.5, %v1590_v48 }
 0xd6e   : > { %v1592_v8 = vmul.f32 %v2004_v45, %v1591_v49 }
 0xd70   : > { %v1596_v51 = vsel %vm1595_vm9, %v2004_v45, %v1592_v8 }
 0xd71   : > { %v1597_v52 = vmul.f32 %v1596_v51, %v1580_v34 }
 0xd73   : > { %v1601_v54 = vmul.f32 %v1961_v50, %v1597_v52 }
 0xd75   : > { %v1605_v55 = vadd.f32 %v1962_v53, %v1601_v54 }
 0xd77   : > { %v1606_v56 = vpack.c.bf16 %v1605_v55, %v1605_v55 }
 0xd79   : > { %1874 = vmatmul.msk.bf16.vlgmr.msrb.gmra.mxu0 %vm777_vm0, %v1606_v56 }
 0xdf6   : > { %v1639_v59 = vpop.f32.mrf.mxu0 }
 0xdf7   : > { %v1640_v60 = vadd.f32 %v1963_v58, %v1639_v59 }
 0xdf9   : > { %v1643_v61 = vmax.f32 %v1640_v60, 0.0 }
 0xdfb   : > { %v1644_v37 = vpack.c.bf16 %v1643_v61, %v1643_v61 }
 0xdfd   : > { %1891 = vmatmul.msk.bf16.vlgmr.msrb.gmra.mxu1 %vm894_vm8, %v1644_v37 }
 0xdfe   : > { %v1641_v62 = vpop.f32.mrf.mxu0 }
 0xe7a   : > { %v1694_v1 = vpop.f32.mrf.mxu1 }
 0xe7b   : > { %v1695_v2 = vadd.f32 %v1964_v32, %v1694_v1 }
 0xe7d   : > { %v1698_v3 = vadd.f32 %v1695_v2, %v1573_v28 }
 0xe7f   : > { %1699 = vst.msk [vmem:[%s768_s3] sm:$0xff] %vm777_vm0, %v1698_v3 }
 0xe82   : > { %v1696_v4 = vpop.f32.mrf.mxu1 }
 0xe83 PF: > { %s42_s29 = sadd.s32 1, %s2041_s29   ;;  %s2571_s6 = smov %s2037_s2 }
 0xe84   : > { %p39_p5 = scmp.ge.s32.totalorder %s42_s29, 4   ;;  %s2572_s2 = smov %s2574_s18 }
 0xe86   :  { %41 = sbr.rel (!%p39_p5) target bundleno = 24 (0x18), region = 154 }

// kernel: transformer_decoder_forward.4
= control target key start
LH: loop header
LB: loop body
LE: loop exit
PB: predicated region body
PF: predicated region fallthrough
CT: control target
= control target key end

     0   :  { %s2461_s28 = smov [#allocation6]   ;;  %s2978_s0 = inlined_call_operand.vmem [shape: s32[2], index: 0, kind: input, shape index: {}]   ;;  %s2979_s1 = inlined_call_operand.vmem [shape: f32[2,8,32], index: 1, kind: input, shape index: {}]   ;;  %s2980_s2 = inlined_call_operand.vmem [shape: f32[2,16,32], index: 2, kind: input, shape index: {}]   ;;  %s2981_s3 = inlined_call_operand.vmem [shape: s32[2,1,16], index: 3, kind: input, shape index: {}]   ;;  %s2982_s4 = inlined_call_operand.vmem [shape: f32[1,32], index: 4, kind: input, shape index: {}]   ;;  %s2983_s5 = inlined_call_operand.vmem [shape: f32[1,32], index: 5, kind: input, shape index: {}]   ;;  %s2984_s6 = inlined_call_operand.vmem [shape: bf16[32,96], index: 6, kind: input, shape index: {}]   ;;  %s2985_s7 = inlined_call_operand.vmem [shape: f32[1,96], index: 7, kind: input, shape index: {}]   ;;  %s2986_s8 = inlined_call_operand.vmem [shape: bf16[32,32], index: 8, kind: input, shape index: {}]   ;;  %s2987_s9 = inlined_call_operand.vmem [shape: f32[1,32], index: 9, kind: input, shape index: {}]   ;;  %s2988_s10 = inlined_call_operand.vmem [shape: f32[1,32], index: 10, kind: input, shape index: {}]   ;;  %s2989_s11 = inlined_call_operand.vmem [shape: f32[1,32], index: 11, kind: input, shape index: {}]   ;;  %s2990_s12 = inlined_call_operand.vmem [shape: bf16[32,32], index: 12, kind: input, shape index: {}]   ;;  %s2991_s13 = inlined_call_operand.vmem [shape: f32[1,32], index: 13, kind: input, shape index: {}]   ;;  %s2992_s14 = inlined_call_operand.vmem [shape: bf16[32,64], index: 14, kind: input, shape index: {}]   ;;  %s2993_s15 = inlined_call_operand.hbm [shape: f32[1,64], index: 15, kind: input, shape index: {}]   ;;  %s2994_s16 = inlined_call_operand.vmem [shape: bf16[32,32], index: 16, kind: input, shape index: {}]   ;;  %s2995_s17 = inlined_call_operand.hbm [shape: f32[1,32], index: 17, kind: input, shape index: {}]   ;;  %s2996_s18 = inlined_call_operand.hbm [shape: f32[1,32], index: 18, kind: input, shape index: {}]   ;;  %s2997_s19 = inlined_call_operand.hbm [shape: f32[1,32], index: 19, kind: input, shape index: {}]   ;;  %s2998_s20 = inlined_call_operand.vmem [shape: bf16[32,64], index: 20, kind: input, shape index: {}]   ;;  %s2999_s21 = inlined_call_operand.hbm [shape: f32[1,64], index: 21, kind: input, shape index: {}]   ;;  %s3000_s22 = inlined_call_operand.vmem [shape: bf16[64,32], index: 22, kind: input, shape index: {}]   ;;  %s3001_s23 = inlined_call_operand.hbm [shape: f32[1,32], index: 23, kind: input, shape index: {}]   ;;  %s3002_s24 = inlined_call_operand.vmem [shape: f32[2,8,32], index: 24, kind: output, shape index: {}]  }
   0x1   :  { %3010 = sst [smem:[#allocation23_spill]] %s2978_s0 }
   0x2   :  { %3011 = sst [smem:[#allocation24_spill]] %s2979_s1 }
   0x3   :  { %3012 = sst [smem:[#allocation25_spill]] %s2980_s2 }
   0x4   :  { %3013 = sst [smem:[#allocation26_spill]] %s2981_s3 }
   0x5   :  { %3014 = sst [smem:[#allocation27_spill]] %s2982_s4 }
   0x6   :  { %3015 = sst [smem:[#allocation28_spill]] %s2983_s5 }
   0x7   :  { %3016 = sst [smem:[#allocation29_spill]] %s2984_s6 }
   0x8   :  { %3017 = sst [smem:[#allocation30_spill]] %s2985_s7 }
   0x9   :  { %3018 = sst [smem:[#allocation31_spill]] %s2986_s8 }
   0xa   :  { %3019 = sst [smem:[#allocation32_spill]] %s2993_s15 }
   0xb   :  { %3020 = sst [smem:[#allocation33_spill]] %s2994_s16 }
   0xc   :  { %3021 = sst [smem:[#allocation34_spill]] %s2995_s17 }
   0xd   :  { %3022 = sst [smem:[#allocation35_spill]] %s2997_s19 }
   0xe   :  { %s3023_s27 = sld [smem:[#allocation23_spill]] }
  0x14   :  { %s30_s16 = sshll.u32 %s3023_s27, 4  ;;  %s31_s16 = int_to_ptr.vmem [resolvable:$true] %s30_s16 }
  0x15   :  { %33 = dma.vmem_to_smem %s31_s16, 16, %s2461_s28, [#allocation5] }
  0x16   :  { %2431 = dma.done.wait [#allocation5], 16 }
  0x17   :  { %2432 = vsyncadd [#allocation5], 4294967280 }
  0x18   :  { %36 = sfence }
  0x19   :  { %37 = vsyncpa [#allocation8], 0 }
  0x1a   :  { %38 = vsyncpa [#allocation10], 0 }
  0x1b   :  { %39 = vsyncpa [#allocation13], 0 }
  0x1c   :  { %40 = vsyncpa [#allocation16], 0  ;;  %s2612_s6 = smov 0   ;;  %s2614_s2 = smov 0  }
  0x1d   :  { %s2616_s29 = smov 0  }
  0x1e LB: > { %3024 = sst [smem:[#allocation22_spill]] %s2459_s29  ;;  %s1945_s30 = sadd.s32 4294967295, %s2459_s29   ;;  %s2459_s29 = sphi %s2616_s29, %s46_s29   ;;  %s2455_s2 = sphi %s2614_s2, %s3049_s2   ;;  %s2451_s6 = sphi %s2612_s6, %s3048_s6  }
  0x1f   : > { %s3025_s17 = sld [smem:[#allocation34_spill]]  ;;  %p1947_p0 = scmp.ge.s32.totalorder %s2459_s29, 1 }
  0x20   : > { %p589_p1 = scmp.lt.s32.totalorder %s2459_s29, 3  ;;  %p2633_p2 = scmp.eq.s32.totalorder %s1945_s30, 0 }
  0x21   : > { %s2462_s8 = smov [#allocation9]   ;;  %s3028_s19 = sld [smem:[#allocation35_spill]] }
  0x22   : > { %p2637_p3 = pnand %p1947_p0, %p589_p1  ;;  %s651_s4 = sshll.u32 %s2462_s8, 4  ;;  %s652_s4 = int_to_ptr.vmem [resolvable:$true] %s651_s4 }
  0x23   : > { %s2463_s28 = smov [#allocation12]   ;;  %s58_s0 = sadd.s32 1, %s2455_s2 }
  0x24   : > { %p2096_p4 = pneg %p2637_p3  ;;  %s675_s16 = sshll.u32 %s2463_s28, 4  ;;  %s676_s16 = int_to_ptr.vmem [resolvable:$true] %s675_s16 }
  0x25   : > { %s649_s7 = sshll.u32 %s3025_s17, 4  ;;  %p60_p6 = scmp.ge.s32.totalorder %s58_s0, 2  ;;  %s650_s7 = int_to_ptr.hbm [resolvable:$true] %s649_s7 }
  0x26   : > { %p2648_p5 = pnand %p2633_p2, %p2096_p4  ;;  %s3030_s15 = sld [smem:[#allocation32_spill]] }
  0x27   : > { %s673_s26 = sshll.u32 %s3028_s19, 4  ;;  %s3051_s0 = smov (%p60_p6, %s58_s0), 0  ;;  %s674_s26 = int_to_ptr.hbm [resolvable:$true] %s673_s26 }
  0x28   : > { %2102 = dma.hbm_to_vmem [thread:$0]  (!%p2648_p5), %s650_s7, 16, %s652_s4, [#allocation10]  }
  0x29   : > { %2108 = dma.hbm_to_vmem [thread:$0]  (!%p2648_p5), %s674_s26, 16, %s676_s16, [#allocation13]  }
  0x2a   : > { %s2464_s5 = smov [#allocation7]   ;;  %s661_s29 = sshll.u32 %s2996_s18, 4  ;;  %s662_s29 = int_to_ptr.hbm [resolvable:$true] %s661_s29 }
  0x2b   : > { %s636_s17 = sshll.u32 %s2464_s5, 4  ;;  %s688_s26 = sshll.u32 %s2999_s21, 4  ;;  %s637_s17 = int_to_ptr.vmem [resolvable:$true] %s636_s17  ;;  %s689_s26 = int_to_ptr.hbm [resolvable:$true] %s688_s26 }
  0x2c   : > { %s634_s1 = sshll.u32 %s3030_s15, 4  ;;  %s2465_s16 = smov [#allocation11]   ;;  %s635_s1 = int_to_ptr.hbm [resolvable:$true] %s634_s1 }
  0x2d   : > { %2099 = dma.hbm_to_vmem [thread:$0]  (!%p2648_p5), %s635_s1, 16, %s637_s17, [#allocation8]  }
  0x2e   : > { %s663_s30 = sshll.u32 %s2465_s16, 4  ;;  %s2466_s8 = smov [#allocation14]   ;;  %s664_s30 = int_to_ptr.vmem [resolvable:$true] %s663_s30 }
  0x2f   : > { %2105 = dma.hbm_to_vmem [thread:$0]  (!%p2648_p5), %s662_s29, 16, %s664_s30, [#allocation10]  }
  0x30   : > { %s690_s5 = sshll.u32 %s2466_s8, 4  ;;  %s703_s28 = sshll.u32 %s3001_s23, 4  ;;  %s691_s5 = int_to_ptr.vmem [resolvable:$true] %s690_s5  ;;  %s704_s28 = int_to_ptr.hbm [resolvable:$true] %s703_s28 }
  0x31   : > { %2111 = dma.hbm_to_vmem [thread:$0]  (!%p2648_p5), %s689_s26, 16, %s691_s5, [#allocation13]  }
  0x32   : > { %s2467_s17 = smov [#allocation15]   ;;  %739 = sbr.rel (%p2637_p3) target bundleno = 3746 (0xea2), region = 112 }
  0x33   : > { %s705_s1 = sshll.u32 %s2467_s17, 4  ;;  %s706_s1 = int_to_ptr.vmem [resolvable:$true] %s705_s1 }
  0x34   : > { %2114 = dma.hbm_to_vmem [thread:$0]  (!%p2648_p5), %s704_s28, 16, %s706_s1, [#allocation16]  }
  0x37   : > { %2434 = dma.done.wait (%p2633_p2), [#allocation8], 16  }
  0x38   : > { %2436 = vsyncadd (%p2633_p2), [#allocation8], 4294967280 }
  0x39   : > { %2438 = dma.done.wait (%p2633_p2), [#allocation10], 32  }
  0x3a   : > { %2440 = vsyncadd (%p2633_p2), [#allocation10], 4294967264 }
  0x3b   : > { %2442 = dma.done.wait (%p2633_p2), [#allocation13], 32  }
  0x3c   : > { %2444 = vsyncadd (%p2633_p2), [#allocation13], 4294967264 }
  0x3d   : > { %2446 = dma.done.wait (%p2633_p2), [#allocation16], 16  }
  0x3e   : > { %2448 = vsyncadd (%p2633_p2), [#allocation16], 4294967280  ;;  %p838_p7 = scmp.lt.s32.totalorder %s2451_s6, 1  ;;  %s3031_s7 = sld [smem:[#allocation24_spill]]  ;;  %vm865_vm0 = vcmask 261120   ;;  %v2468_v2 = vmov 32.0   ;;  %v992_v59 = vlaneseq }
  0x3f   : > { %2187 = vrcp.f32 %v2468_v2  ;;  %s3032_s16 = sld [smem:[#allocation29_spill]]  ;;  %vm940_vm5 = vcmask 785408   ;;  %s2469_s3 = smov 88   ;;  %v2059_v40 = vld [vmem:[%s2992_s14 + $0x8] sm:$0xff]  ;;  %v2058_v41 = vld [vmem:[%s2992_s14] sm:$0xff]  ;;  %vm1047_vm6 = vcmask 1043456  }
  0x40   : > { %s2699_s15 = scalar_select %p838_p7, %s2451_s6, 1  ;;  %974 = vmatpush.bf16.msra.mxu1 %v2059_v40  ;;  %vm1008_vm7 = vcmask 64512   ;;  %v2177_v54 = vld [vmem:[#allocation7] ss:$0 sm:$0xff]  ;;  %vm982_vm8 = vcmask 523264   ;;  %v993_v60 = vshrl.u32 %v992_v59, 7 }
  0x41   : > { %s3033_s28 = sld [smem:[#allocation27_spill]]  ;;  %s2470_s26 = smov 64   ;;  %v997_v61 = vand.u32 127, %v992_v59  ;;  %vm1128_vm12 = vcmask 130112   ;;  %vm1192_vm13 = vcmask 195712   ;;  %vm1256_vm14 = vcmask 261312  }
  0x42   : > { %s3007_s29 = sshll.u32 %s2699_s15, 3  ;;  %s3034_s25 = sld [smem:[#allocation28_spill]] }
  0x43   : > { %s2471_s30 = smov 96   ;;  %s2472_s8 = smov 80   ;;  %vm998_vm9 = vcmp.le.s32.totalorder %v997_v61, %v993_v60 }
  0x44   : > { %s841_s4 = scalar_lea.vmem %s3031_s7, %s3007_s29  ;;  %s2473_s5 = smov 120   ;;  %975 = vmatpush.bf16.msra.mxu1 %v2058_v41 }
  0x45   : > { %v2707_v0 = vld [vmem:[%s841_s4] sm:$0xff]  ;;  %v2188_v3 = vpop.eup %2187  ;;  %v2057_v14 = vld [vmem:[%s3032_s16 + $0x8] sm:$0xff]  ;;  %s3035_s4 = sld [smem:[#allocation30_spill]]  ;;  %s2474_s19 = smov 112  }
  0x46   : > { %v866_v1 = vsel %vm865_vm0, %v2707_v0, 0.0  ;;  %v870_v4 = vmul.f32 32.0, %v2188_v3  ;;  %vm874_vm1 = vweird.f32 %v2188_v3  ;;  %933 = vmatpush.bf16.msra.mxu0 %v2057_v14  ;;  %v2056_v15 = vld [vmem:[%s3032_s16] sm:$0xff]  ;;  %s2055_s27 = sshll.u32 %s2699_s15, 4  ;;  %s2477_s17 = smov 48  }
  0x47   : > { %867 = vadd.xlane.f32.xlu0 %v866_v1  ;;  %v2174_v25 = vld [vmem:[%s3033_s28] ss:$0 sm:$0xff]  ;;  %s2476_s28 = smov 104   ;;  %s2478_s1 = smov 56  }
  0x48   : > { %v871_v5 = vsub.f32 1.0, %v870_v4  ;;  %v2175_v28 = vld [vmem:[%s3034_s25] ss:$0 sm:$0xff]  ;;  %s2479_s25 = smov 40   ;;  %s3009_s7 = smov 24  }
  0x4a   : > { %v872_v6 = vmul.f32 %v2188_v3, %v871_v5  ;;  %934 = vmatpush.bf16.msra.mxu0 %v2056_v15 }
  0x4b   : > { %v2176_v32 = vld [vmem:[%s3035_s4] ss:$0 sm:$0xff]  ;;  %s3008_s4 = smov 16  }
  0x4c   : > { %v873_v7 = vadd.f32 %v2188_v3, %v872_v6 }
  0x4e   : > { %v2711_v8 = vsel %vm874_vm1, %v2188_v3, %v873_v7 }
  0xba   : > { %v868_v9 = vpop.xlane.xlu0 %867 }
  0xbb   : > { %v876_v10 = vmul.f32 %v2711_v8, %v868_v9 }
  0xbd   : > { %v877_v11 = vsub.f32 %v2707_v0, %v876_v10 }
  0xbf   : > { %v878_v12 = vmul.f32 %v877_v11, %v877_v11 }
  0xc1   : > { %v879_v13 = vsel %vm865_vm0, %v878_v12, 0.0 }
  0xc2   : > { %880 = vadd.xlane.f32.xlu0 %v879_v13 }
 0x135   : > { %v881_v16 = vpop.xlane.xlu0 %880 }
 0x136   : > { %v882_v17 = vmul.f32 %v881_v16, %v2711_v8 }
 0x138   : > { %v883_v18 = vadd.f32 1e-05, %v882_v17 }
 0x13a   : > { %2189 = vrsqrt.f32 %v883_v18  ;;  %vm890_vm3 = vweird.f32 %v883_v18 }
 0x140   : > { %v2190_v19 = vpop.eup %2189 }
 0x141   : > { %v885_v20 = vmul.f32 %v2190_v19, %v883_v18  ;;  %vm891_vm2 = vweird.f32 %v2190_v19 }
 0x142   : > { %vm892_vm4 = vmor %vm890_vm3, %vm891_vm2 }
 0x143   : > { %v886_v21 = vmul.f32 %v2190_v19, %v885_v20 }
 0x145   : > { %v887_v22 = vmul.f32 0.5, %v886_v21 }
 0x147   : > { %v888_v23 = vsub.f32 1.5, %v887_v22 }
 0x149   : > { %v889_v24 = vmul.f32 %v2190_v19, %v888_v23 }
 0x14b   : > { %v893_v26 = vsel %vm892_vm4, %v2190_v19, %v889_v24 }
 0x14c   : > { %v894_v27 = vmul.f32 %v893_v26, %v877_v11 }
 0x14e   : > { %v898_v29 = vmul.f32 %v2174_v25, %v894_v27 }
 0x150   : > { %v902_v30 = vadd.f32 %v2175_v28, %v898_v29 }
 0x152   : > { %v903_v31 = vpack.c.bf16 %v902_v30, %v902_v30 }
 0x154   : > { %1974 = vmatmul.msk.bf16.vlgmr.msra.gmra.mxu0 %vm865_vm0, %v903_v31 }
 0x1d1   : > { %v936_v33 = vpop.f32.mrf.mxu0 }
 0x1d2   : > { %v937_v34 = vadd.f32 %v2176_v32, %v936_v33 }
 0x1d4   : > { %941 = vst.msk [vmem:[#allocation2] sm:$0xff] %vm940_vm5, %v937_v34  ;;  %vm1404_vm5 = vcmask 130048  }
 0x1d9   : > { %v938_v35 = vpop.f32.mrf.mxu0 }
 0x1db   : > { %v991_v36 = vld [vmem:[#allocation2] sm:$0xff] }
 0x1dc   : > { %v2733_v37 = vpack.c.bf16 %v991_v36, %v991_v36  ;;  %v990_v38 = vmul.f32 0.35355338, %v991_v36 }
 0x1de   : > { %1068 = vrot.lane.b32.xlu0 %v2733_v37, %s2469_s3  ;;  %1042 = vrot.lane.b32.xlu2 %v2733_v37, %s2470_s26  ;;  %v2740_v39 = vpack.c.bf16 %v990_v38, %v990_v38  ;;  %s3036_s26 = sld [smem:[#allocation25_spill]] }
 0x1df   : > { %1006 = vrot.lane.b32.xlu1 %v2733_v37, %s2471_s30 }
 0x1e4   : > { %s846_s29 = scalar_lea.vmem %s3036_s26, %s2055_s27  ;;  %s2480_s27 = smov 8  }
 0x1e5   : > { %v942_v42 = vld [vmem:[%s846_s29] sm:$0xff]  ;;  %v943_v43 = vld [vmem:[%s846_s29 + $0x8] sm:$0xff]  ;;  %s999_s29 = sld [smem:[#allocation6 + %s2451_s6]]  ;;  %s2475_s6 = smov 72  }
 0x1e6   : > { %1132 = vrot.lane.b32.xlu0 %v2733_v37, %s2472_s8  ;;  %1066 = vrot.lane.b32.xlu2 %v2740_v39, %s2473_s5  ;;  %v944_v44 = vpack.c.bf16 %v943_v43, %v942_v42 }
 0x1e8   : > { %1983 = vmatmul.msk.bf16.vlgmr.msra.gmra.mxu1 %vm865_vm0, %v944_v44 }
 0x1eb   : > { %v1000_v62 = vstv %s999_s29 }
 0x1ec   : > { %vm1001_vm10 = vcmp.lt.s32.totalorder %v997_v61, %v1000_v62 }
 0x1ed   : > { %vm2769_vm11 = vmand %vm998_vm9, %vm1001_vm10 }
 0x1ee   : > { %1130 = vrot.lane.b32.xlu0 %v2740_v39, %s2474_s19 }
 0x238   : > { %v1043_v45 = vpop.permute.xlu2 %1042 }
 0x239   : > { %v1049_v46 = vsel %vm1047_vm6, %v1043_v45, 0 }
 0x23a   : > { %1058 = vmatpush.bf16.msra.mxu3 %v1049_v46 }
 0x240   : > { %v1067_v15 = vpop.permute.xlu2 %1066 }
 0x250   : > { %v1069_v47 = vpop.permute.xlu0 %1068 }
 0x251   : > { %v1007_v48 = vpop.permute.xlu1 %1006  ;;  %v1074_v49 = vsel %vm1008_vm7, %v1069_v47, 0 }
 0x252   : > { %v1013_v50 = vsel %vm1008_vm7, %v1007_v48, 0  ;;  %1083 = vmatpush.bf16.xpose.msrb.mxu3 %v1074_v49 }
 0x253   : > { %1022 = vmatpush.bf16.xpose.msra.mxu2 %v1013_v50 }
 0x258   : > { %v1133_v51 = vpop.permute.xlu0 %1132 }
 0x259   : > { %v1138_v52 = vsel %vm1008_vm7, %v1133_v51, 0 }
 0x25a   : > { %1984 = vmatmul.msk.bf16.vlgmr.msra.gmra.mxu2 %vm1008_vm7, %v2740_v39  ;;  %1147 = vmatpush.bf16.xpose.msrb.mxu1 %v1138_v52 }
 0x260   : > { %v1131_v53 = vpop.permute.xlu0 %1130 }
 0x261   : > { %1988 = vmatmul.msk.bf16.vlgmr.msrb.gmra.mxu1 %vm1008_vm7, %v1131_v53 }
 0x265   : > { %v977_v55 = vpop.f32.mrf.mxu1 }
 0x266   : > { %v978_v56 = vadd.f32 %v2177_v54, %v977_v55 }
 0x268   : > { %983 = vst.msk [vmem:[#allocation3] sm:$0xff] %vm982_vm8, %v978_v56 }
 0x26d   : > { %v979_v57 = vpop.f32.mrf.mxu1 }
 0x26e   : > { %v980_v58 = vadd.f32 %v2177_v54, %v979_v57 }
 0x26f   : > { %v1375_v30 = vld [vmem:[#allocation3] sm:$0xff] }
 0x270   : > { %984 = vst.msk [vmem:[#allocation3 + $0x8] sm:$0xff] %vm982_vm8, %v980_v58 }
 0x277   : > { %v1376_v31 = vld [vmem:[#allocation3 + $0x8] sm:$0xff] }
 0x278   : > { %v2797_v32 = vpack.c.bf16 %v1376_v31, %v1375_v30  ;;  %v2178_v31 = vld [vmem:[%s2987_s9] ss:$0 sm:$0xff] }
 0x27a   : > { %v1385_v33 = vsel %vm1008_vm7, %v2797_v32, 0 }
 0x2dd   : > { %v1024_v1 = vpop.f32.mrf.mxu2 }
 0x2de   : > { %v1028_v2 = vsel %vm2769_vm11, %v1024_v1, -1e+30  ;;  %v1149_v3 = vpop.f32.mrf.mxu1 }
 0x2df   : > { %v2777_v4 = vsel %vm2769_vm11, %v1149_v3, -1e+30  ;;  %v1029_v5 = vsel %vm1008_vm7, %v1028_v2, -inf }
 0x2e0   : > { %1030 = vmax.xlane.f32.xlu1 %v1029_v5  ;;  %v1154_v6 = vsel %vm1008_vm7, %v2777_v4, -inf }
 0x2e1   : > { %1155 = vmax.xlane.f32.xlu0 %v1154_v6 }
 0x2e5   : > { %v1026_v7 = vpop.f32.mrf.mxu2 }
 0x2e6   : > { %v1151_v9 = vpop.f32.mrf.mxu1 }
 0x353   : > { %v1031_v10 = vpop.xlane.xlu1 %1030 }
 0x354   : > { %v1032_v11 = vsub.f32 %v1028_v2, %v1031_v10  ;;  %v1156_v51 = vpop.xlane.xlu0 %1155 }
 0x355   : > { %v1157_v52 = vsub.f32 %v2777_v4, %v1156_v51 }
 0x356   : > { %v1033_v12 = vmul.f32 1.442695, %v1032_v11 }
 0x357   : > { %v1158_v53 = vmul.f32 1.442695, %v1157_v52 }
 0x358   : > { %2191 = vpow2.f32 %v1033_v12 }
 0x35e   : > { %v2192_v13 = vpop.eup %2191 }
 0x35f   : > { %v1035_v14 = vsel %vm1008_vm7, %v2192_v13, 0.0 }
 0x360   : > { %1036 = vadd.xlane.f32.xlu2 %v1035_v14 }
 0x378   : > { %1196 = vrot.lane.b32.xlu2 %v2733_v37, %s2475_s6 }
 0x380   : > { %1194 = vrot.lane.b32.xlu2 %v2740_v39, %s2476_s28 }
 0x3d3   : > { %v1037_v16 = vpop.xlane.xlu2 %1036 }
 0x3d4   : > { %2193 = vrcp.f32 %v1037_v16 }
 0x3da   : > { %v2194_v17 = vpop.eup %2193 }
 0x3db   : > { %v1039_v18 = vmul.f32 %v2194_v17, %v2192_v13  ;;  %v1197_v19 = vpop.permute.xlu2 %1196 }
 0x3dc   : > { %v1202_v22 = vsel %vm1008_vm7, %v1197_v19, 0 }
 0x3dd   : > { %v1040_v20 = vsel %vm2769_vm11, %v1039_v18, 0.0 }
 0x3de   : > { %v1041_v21 = vpack.c.bf16 %v1040_v20, %v1040_v20 }
 0x3e0   : > { %1985 = vmatmul.msk.bf16.vlgmr.msra.gmra.mxu3 %vm1008_vm7, %v1041_v21 }
 0x3e1   : > { %1211 = vmatpush.bf16.xpose.msra.mxu3 %v1202_v22 }
 0x3e3   : > { %v1195_v23 = vpop.permute.xlu2 %1194 }
 0x3f0   : > { %1986 = vmatmul.msk.bf16.vlgmr.msrb.gmra.mxu3 %vm1008_vm7, %v1067_v15 }
 0x3f1   : > { %1394 = vmatpush.bf16.xpose.msrb.mxu3 %v1385_v33 }
 0x400   : > { %1990 = vmatmul.msk.bf16.vlgmr.msra.gmra.mxu3 %vm1008_vm7, %v1195_v23 }
 0x463   : > { %v1060_v24 = vpop.f32.mrf.mxu3 }
 0x464   : > { %1064 = vst.msk [vmem:[#allocation4] sm:$0xff] %vm1008_vm7, %v1060_v24 }
 0x46b   : > { %v1062_v25 = vpop.f32.mrf.mxu3 }
 0x473   : > { %v1085_v26 = vpop.f32.mrf.mxu3 }
 0x474   : > { %v1089_v27 = vsel %vm2769_vm11, %v1085_v26, -1e+30 }
 0x475   : > { %v1090_v28 = vsel %vm1008_vm7, %v1089_v27, -inf }
 0x476   : > { %1091 = vmax.xlane.f32.xlu1 %v1090_v28 }
 0x47b   : > { %v1087_v29 = vpop.f32.mrf.mxu3 }
 0x483   : > { %v1213_v34 = vpop.f32.mrf.mxu3 }
 0x484   : > { %v1217_v35 = vsel %vm2769_vm11, %v1213_v34, -1e+30 }
 0x485   : > { %v1218_v36 = vsel %vm1008_vm7, %v1217_v35, -inf }
 0x486   : > { %1219 = vmax.xlane.f32.xlu2 %v1218_v36 }
 0x48b   : > { %v1215_v38 = vpop.f32.mrf.mxu3 }
 0x49e   : > { %1167 = vrot.lane.b32.xlu2 %v2733_v37, %s2477_s17  ;;  %s3039_s17 = sld [smem:[#allocation31_spill]] }
 0x4a4   : > { %v2061_v18 = vld [vmem:[%s3039_s17 + $0x8] sm:$0xff]  ;;  %v2060_v19 = vld [vmem:[%s3039_s17] sm:$0xff] }
 0x4a5   : > { %1290 = vmatpush.bf16.msra.mxu1 %v2061_v18 }
 0x4a9   : > { %1291 = vmatpush.bf16.msra.mxu1 %v2060_v19 }
 0x4e9   : > { %v1092_v39 = vpop.xlane.xlu1 %1091 }
 0x4ea   : > { %v1093_v40 = vsub.f32 %v1089_v27, %v1092_v39 }
 0x4ec   : > { %v1094_v41 = vmul.f32 1.442695, %v1093_v40 }
 0x4ee   : > { %2195 = vpow2.f32 %v1094_v41 }
 0x4f4   : > { %v2196_v42 = vpop.eup %2195 }
 0x4f5   : > { %v1096_v43 = vsel %vm1008_vm7, %v2196_v42, 0.0 }
 0x4f6   : > { %1097 = vadd.xlane.f32.xlu1 %v1096_v43 }
 0x4f9   : > { %v1220_v44 = vpop.xlane.xlu2 %1219 }
 0x4fa   : > { %v1221_v45 = vsub.f32 %v1217_v35, %v1220_v44  ;;  %v2063_v44 = vld [vmem:[%s2990_s12 + $0x8] sm:$0xff] }
 0x4fc   : > { %v1222_v46 = vmul.f32 1.442695, %v1221_v45 }
 0x4fe   : > { %2197 = vpow2.f32 %v1222_v46 }
 0x4ff   : > { %2199 = vpow2.f32 %v1158_v53 }
 0x501   : > { %v1168_v47 = vpop.permute.xlu2 %1167 }
 0x502   : > { %v1173_v48 = vsel %vm1047_vm6, %v1168_v47, 0 }
 0x503   : > { %1182 = vmatpush.bf16.msrb.mxu2 %v1173_v48 }
 0x504   : > { %v2198_v49 = vpop.eup %2197 }
 0x505   : > { %v1224_v50 = vsel %vm1008_vm7, %v2198_v49, 0.0  ;;  %v2200_v54 = vpop.eup %2199 }
 0x506   : > { %1225 = vadd.xlane.f32.xlu0 %v1224_v50  ;;  %v1160_v55 = vsel %vm1008_vm7, %v2200_v54, 0.0 }
 0x507   : > { %1367 = vmatpush.bf16.msra.mxu2 %v2063_v44 }
 0x50f   : > { %1103 = vrot.lane.b32.xlu1 %v2733_v37, %s2478_s1 }
 0x51a   : > { %1231 = vrot.lane.b32.xlu0 %v2733_v37, %s2479_s25 }
 0x539   : > { %1161 = vadd.xlane.f32.xlu1 %v1160_v55 }
 0x569   : > { %v1098_v56 = vpop.xlane.xlu1 %1097 }
 0x56a   : > { %2201 = vrcp.f32 %v1098_v56 }
 0x570   : > { %v2202_v57 = vpop.eup %2201 }
 0x571   : > { %v1100_v58 = vmul.f32 %v2202_v57, %v2196_v42  ;;  %v2180_v57 = vld [vmem:[%s2989_s11] ss:$0 sm:$0xff] }
 0x573   : > { %v1101_v61 = vsel %vm2769_vm11, %v1100_v58, 0.0 }
 0x574   : > { %v1102_v62 = vpack.c.bf16 %v1101_v61, %v1101_v61  ;;  %v2181_v61 = vld [vmem:[%s2991_s13] ss:$0 sm:$0xff] }
 0x579   : > { %v1226_v59 = vpop.xlane.xlu0 %1225 }
 0x57a   : > { %2203 = vrcp.f32 %v1226_v59 }
 0x580   : > { %v2204_v1 = vpop.eup %2203 }
 0x581   : > { %v1104_v60 = vpop.permute.xlu1 %1103  ;;  %v1228_v3 = vmul.f32 %v2204_v1, %v2198_v49 }
 0x582   : > { %v1109_v37 = vsel %vm1047_vm6, %v1104_v60, 0 }
 0x583   : > { %1118 = vmatpush.bf16.msrb.mxu0 %v1109_v37  ;;  %v1229_v5 = vsel %vm2769_vm11, %v1228_v3, 0.0 }
 0x584   : > { %v1230_v6 = vpack.c.bf16 %v1229_v5, %v1229_v5 }
 0x586   : > { %1987 = vmatmul.msk.bf16.vlgmr.msrb.gmra.mxu0 %vm1008_vm7, %v1102_v62 }
 0x58c   : > { %v1232_v2 = vpop.permute.xlu0 %1231 }
 0x58d   : > { %v1237_v4 = vsel %vm1047_vm6, %v1232_v2, 0 }
 0x58e   : > { %1246 = vmatpush.bf16.msra.mxu0 %v1237_v4 }
 0x596   : > { %1991 = vmatmul.msk.bf16.vlgmr.msra.gmra.mxu0 %vm1008_vm7, %v1230_v6 }
 0x5ac   : > { %v1162_v7 = vpop.xlane.xlu1 %1161 }
 0x5ad   : > { %2205 = vrcp.f32 %v1162_v7  ;;  %v2483_v7 = vmov 0  }
 0x5b3   : > { %v2206_v9 = vpop.eup %2205 }
 0x5b4   : > { %v1164_v10 = vmul.f32 %v2206_v9, %v2200_v54  ;;  %v2179_v54 = vld [vmem:[%s2988_s10] ss:$0 sm:$0xff] }
 0x5b6   : > { %v1165_v11 = vsel %vm2769_vm11, %v1164_v10, 0.0 }
 0x5b7   : > { %v1166_v12 = vpack.c.bf16 %v1165_v11, %v1165_v11 }
 0x5b9   : > { %1989 = vmatmul.msk.bf16.vlgmr.msrb.gmra.mxu2 %vm1008_vm7, %v1166_v12 }
 0x603   : > { %v1120_v13 = vpop.f32.mrf.mxu0 }
 0x604   : > { %1125 = vrot.lane.b32.xlu2 %v1120_v13, %s2480_s27 }
 0x60b   : > { %v1122_v14 = vpop.f32.mrf.mxu0 }
 0x613   : > { %v1248_v15 = vpop.f32.mrf.mxu0 }
 0x614   : > { %1253 = vrot.lane.b32.xlu2 %v1248_v15, %s3009_s7  ;;  %s3040_s7 = sld [smem:[#allocation26_spill]] }
 0x61b   : > { %v1250_v16 = vpop.f32.mrf.mxu0 }
 0x61c   : > { %1442 = vrot.lane.b32.xlu2 %v2797_v32, %s2473_s5 }
 0x624   : > { %1503 = vrot.lane.b32.xlu2 %v2797_v32, %s2474_s19 }
 0x62c   : > { %1564 = vrot.lane.b32.xlu2 %v2797_v32, %s2476_s28 }
 0x63c   : > { %v1184_v63 = vpop.f32.mrf.mxu2 }
 0x63d   : > { %1189 = vrot.lane.b32.xlu0 %v1184_v63, %s3008_s4  ;;  %s849_s4 = scalar_lea.vmem %s3040_s7, %s2699_s15 }
 0x63e   : > { %v1377_v6 = vld [vmem:[%s849_s4] sm:$0x1] }
 0x63f   : > { %vm1378_vm3 = vcmp.gt.s32.totalorder %v1377_v6, 0 }
 0x640   : > { %v1400_v9 = vsel %vm1378_vm3, 1, %v2483_v7 }
 0x641   : > { %v1401_v10 = vperm.slane %v1400_v9, 0 }
 0x643   : > { %vm2883_vm4 = vcmp.eq.s32.totalorder %v1401_v10, 1 }
 0x644   : > { %v1186_v17 = vpop.f32.mrf.mxu2 }
 0x65e   : > { %v1126_v20 = vpop.permute.xlu2 %1125 }
 0x65f   : > { %1129 = vst.msk [vmem:[#allocation4] sm:$0xff] %vm1128_vm12, %v1126_v20 }
 0x66e   : > { %v1254_v21 = vpop.permute.xlu2 %1253 }
 0x676   : > { %v1443_v22 = vpop.permute.xlu2 %1442 }
 0x677   : > { %v1448_v23 = vsel %vm1008_vm7, %v1443_v22, 0 }
 0x678   : > { %1457 = vmatpush.bf16.xpose.msrb.mxu1 %v1448_v23 }
 0x67e   : > { %v1504_v24 = vpop.permute.xlu2 %1503 }
 0x67f   : > { %v1509_v25 = vsel %vm1008_vm7, %v1504_v24, 0 }
 0x680   : > { %1518 = vmatpush.bf16.xpose.msra.mxu3 %v1509_v25 }
 0x686   : > { %v1565_v27 = vpop.permute.xlu2 %1564 }
 0x687   : > { %v1570_v30 = vsel %vm1008_vm7, %v1565_v27, 0 }
 0x6af   : > { %v1190_v26 = vpop.permute.xlu0 %1189 }
 0x6b0   : > { %1193 = vst.msk [vmem:[#allocation4] sm:$0xff] %vm1192_vm13, %v1190_v26 }
 0x6b1   : > { %1257 = vst.msk [vmem:[#allocation4] sm:$0xff] %vm1256_vm14, %v1254_v21 }
 0x6b8   : > { %v1258_v28 = vld [vmem:[#allocation4] sm:$0xff] }
 0x6b9   : > { %v1259_v29 = vpack.c.bf16 %v1258_v28, %v1258_v28 }
 0x6bb   : > { %2000 = vmatmul.msk.bf16.vlgmr.msra.gmra.mxu1 %vm865_vm0, %v1259_v29 }
 0x6bc   : > { %1579 = vmatpush.bf16.xpose.msra.mxu1 %v1570_v30 }
 0x738   : > { %v1293_v33 = vpop.f32.mrf.mxu1 }
 0x739   : > { %v1294_v34 = vadd.f32 %v2178_v31, %v1293_v33 }
 0x73b   : > { %v2849_v35 = vadd.f32 %v1294_v34, %v2707_v0  ;;  %v2062_v0 = vld [vmem:[%s2990_s12] sm:$0xff] }
 0x73c   : > { %1368 = vmatpush.bf16.msra.mxu2 %v2062_v0 }
 0x73d   : > { %v1300_v36 = vsel %vm865_vm0, %v2849_v35, 0.0 }
 0x73e   : > { %1301 = vadd.xlane.f32.xlu0 %v1300_v36 }
 0x740   : > { %v1295_v38 = vpop.f32.mrf.mxu1 }
 0x7b1   : > { %v1302_v39 = vpop.xlane.xlu0 %1301 }
 0x7b2   : > { %v1310_v40 = vmul.f32 %v1302_v39, %v2711_v8 }
 0x7b4   : > { %v1311_v41 = vsub.f32 %v2849_v35, %v1310_v40 }
 0x7b6   : > { %v1312_v42 = vmul.f32 %v1311_v41, %v1311_v41 }
 0x7b8   : > { %v1313_v43 = vsel %vm865_vm0, %v1312_v42, 0.0 }
 0x7b9   : > { %1314 = vadd.xlane.f32.xlu1 %v1313_v43 }
 0x82c   : > { %v1315_v45 = vpop.xlane.xlu1 %1314 }
 0x82d   : > { %v1316_v46 = vmul.f32 %v1315_v45, %v2711_v8 }
 0x82f   : > { %v1317_v47 = vadd.f32 1e-05, %v1316_v46 }
 0x831   : > { %2207 = vrsqrt.f32 %v1317_v47  ;;  %vm1324_vm1 = vweird.f32 %v1317_v47 }
 0x837   : > { %v2208_v48 = vpop.eup %2207 }
 0x838   : > { %v1319_v49 = vmul.f32 %v2208_v48, %v1317_v47  ;;  %vm1325_vm15 = vweird.f32 %v2208_v48 }
 0x839   : > { %vm1326_vm2 = vmor %vm1324_vm1, %vm1325_vm15 }
 0x83a   : > { %v1320_v50 = vmul.f32 %v2208_v48, %v1319_v49 }
 0x83c   : > { %v1321_v51 = vmul.f32 0.5, %v1320_v50 }
 0x83e   : > { %v1322_v52 = vsub.f32 1.5, %v1321_v51 }
 0x840   : > { %v1323_v53 = vmul.f32 %v2208_v48, %v1322_v52 }
 0x842   : > { %v1327_v55 = vsel %vm1326_vm2, %v2208_v48, %v1323_v53 }
 0x843   : > { %v1328_v56 = vmul.f32 %v1327_v55, %v1311_v41 }
 0x845   : > { %v1332_v58 = vmul.f32 %v2179_v54, %v1328_v56 }
 0x847   : > { %v1336_v59 = vadd.f32 %v2180_v57, %v1332_v58 }
 0x849   : > { %v1337_v60 = vpack.c.bf16 %v1336_v59, %v1336_v59 }
 0x84b   : > { %2009 = vmatmul.msk.bf16.vlgmr.msra.gmra.mxu2 %vm865_vm0, %v1337_v60 }
 0x8ce   : > { %v1370_v37 = vpop.f32.mrf.mxu2 }
 0x8cf   : > { %v1371_v62 = vadd.f32 %v2181_v61, %v1370_v37 }
 0x8d1   : > { %v1374_v1 = vmul.f32 0.35355338, %v1371_v62 }
 0x8d3   : > { %v1379_v2 = vpack.c.bf16 %v1374_v1, %v1374_v1 }
 0x8d5   : > { %1501 = vrot.lane.b32.xlu2 %v1379_v2, %s2474_s19  ;;  %1440 = vrot.lane.b32.xlu1 %v1379_v2, %s2473_s5  ;;  %s3045_s19 = sld [smem:[#allocation33_spill]] }
 0x8d6   : > { %2010 = vmatmul.msk.bf16.vlgmr.msrb.gmra.mxu3 %vm1008_vm7, %v1379_v2  ;;  %v1372_v3 = vpop.f32.mrf.mxu2 }
 0x8db   : > { %v2065_v11 = vld [vmem:[%s3045_s19 + $0x8] sm:$0xff] }
 0x8dc   : > { %1654 = vmatpush.bf16.msrb.mxu3 %v2065_v11 }
 0x8dd   : > { %1562 = vrot.lane.b32.xlu1 %v1379_v2, %s2476_s28  ;;  %s3046_s28 = sshll.u32 %s2699_s15, 3 }
 0x8de   : > { %s856_s29 = scalar_lea.vmem %s3002_s24, %s3046_s28 }
 0x92f   : > { %v1502_v4 = vpop.permute.xlu2 %1501 }
 0x930   : > { %2014 = vmatmul.msk.bf16.vlgmr.msra.gmra.mxu3 %vm1008_vm7, %v1502_v4 }
 0x947   : > { %v1441_v5 = vpop.permute.xlu1 %1440 }
 0x948   : > { %2012 = vmatmul.msk.bf16.vlgmr.msrb.gmra.mxu1 %vm1008_vm7, %v1441_v5 }
 0x94f   : > { %v1563_v12 = vpop.permute.xlu1 %1562 }
 0x958   : > { %2016 = vmatmul.msk.bf16.vlgmr.msra.gmra.mxu1 %vm1008_vm7, %v1563_v12 }
 0x959   : > { %v1396_v13 = vpop.f32.mrf.mxu3 }
 0x95a   : > { %v1403_v14 = vsel %vm2883_vm4, %v1396_v13, -1e+30 }
 0x95b   : > { %v1405_v15 = vsel %vm1404_vm5, %v1403_v14, -inf }
 0x95c   : > { %1406 = vmax.xlane.f32.xlu0 %v1405_v15 }
 0x961   : > { %v1398_v16 = vpop.f32.mrf.mxu3 }
 0x9b3   : > { %v1520_v63 = vpop.f32.mrf.mxu3 }
 0x9b4   : > { %v1524_v17 = vsel %vm2883_vm4, %v1520_v63, -1e+30 }
 0x9b5   : > { %v1525_v18 = vsel %vm1404_vm5, %v1524_v17, -inf }
 0x9b6   : > { %1526 = vmax.xlane.f32.xlu0 %v1525_v18 }
 0x9bb   : > { %v1522_v19 = vpop.f32.mrf.mxu3 }
 0x9c5   : > { %v1459_v20 = vpop.f32.mrf.mxu1 }
 0x9c6   : > { %v1463_v21 = vsel %vm2883_vm4, %v1459_v20, -1e+30  ;;  %v2064_v20 = vld [vmem:[%s3045_s19] sm:$0xff] }
 0x9c7   : > { %v1464_v22 = vsel %vm1404_vm5, %v1463_v21, -inf  ;;  %1655 = vmatpush.bf16.msrb.mxu3 %v2064_v20 }
 0x9c8   : > { %1465 = vmax.xlane.f32.xlu2 %v1464_v22 }
 0x9cd   : > { %v1461_v23 = vpop.f32.mrf.mxu1 }
 0x9cf   : > { %v1407_v24 = vpop.xlane.xlu0 %1406 }
 0x9d0   : > { %v1408_v25 = vsub.f32 %v1403_v14, %v1407_v24 }
 0x9d2   : > { %v1409_v26 = vmul.f32 1.442695, %v1408_v25  ;;  %v2182_v25 = vld [vmem:[#allocation9] ss:$0 sm:$0xff] }
 0x9d4   : > { %2209 = vpow2.f32 %v1409_v26 }
 0x9d5   : > { %v1581_v27 = vpop.f32.mrf.mxu1 }
 0x9d6   : > { %v1585_v28 = vsel %vm2883_vm4, %v1581_v27, -1e+30 }
 0x9d7   : > { %v1586_v29 = vsel %vm1404_vm5, %v1585_v28, -inf }
 0x9d8   : > { %1587 = vmax.xlane.f32.xlu1 %v1586_v29 }
 0x9da   : > { %v2210_v30 = vpop.eup %2209 }
 0x9db   : > { %v1411_v31 = vsel %vm1404_vm5, %v2210_v30, 0.0 }
 0x9dc   : > { %1412 = vadd.xlane.f32.xlu0 %v1411_v31 }
 0x9dd   : > { %v1583_v33 = vpop.f32.mrf.mxu1 }
 0x9e0   : > { %1419 = vrot.lane.b32.xlu2 %v2797_v32, %s2471_s30  ;;  %s3044_s30 = smov 16  }
 0x9e8   : > { %1538 = vrot.lane.b32.xlu2 %v2797_v32, %s2472_s8 }
 0xa29   : > { %v1527_v41 = vpop.xlane.xlu0 %1526 }
 0xa2a   : > { %v1528_v53 = vsub.f32 %v1524_v17, %v1527_v41 }
 0xa2c   : > { %v1529_v54 = vmul.f32 1.442695, %v1528_v53  ;;  %v2184_v53 = vld [vmem:[#allocation12] ss:$0 sm:$0xff] }
 0xa3b   : > { %v1466_v34 = vpop.xlane.xlu2 %1465 }
 0xa3c   : > { %v1467_v36 = vsub.f32 %v1463_v21, %v1466_v34 }
 0xa3e   : > { %v1468_v38 = vmul.f32 1.442695, %v1467_v36 }
 0xa40   : > { %2211 = vpow2.f32 %v1468_v38 }
 0xa43   : > { %v1420_v39 = vpop.permute.xlu2 %1419 }
 0xa44   : > { %1432 = vmatpush.bf16.msrb.mxu0 %v1420_v39  ;;  %v2067_v39 = vld [vmem:[%s2998_s20 + $0x8] sm:$0xff] }
 0xa46   : > { %v2212_v40 = vpop.eup %2211 }
 0xa47   : > { %v1470_v42 = vsel %vm1404_vm5, %v2212_v40, 0.0 }
 0xa48   : > { %1471 = vadd.xlane.f32.xlu0 %v1470_v42 }
 0xa4b   : > { %v1539_v43 = vpop.permute.xlu2 %1538  ;;  %v1588_v44 = vpop.xlane.xlu1 %1587 }
 0xa4c   : > { %v1589_v0 = vsub.f32 %v1585_v28, %v1588_v44  ;;  %1551 = vmatpush.bf16.msra.mxu0 %v1539_v43  ;;  %v2070_v43 = vld [vmem:[%s3000_s22 + $0x10] sm:$0xff] }
 0xa4e   : > { %v1590_v45 = vmul.f32 1.442695, %v1589_v0  ;;  %v2069_v0 = vld [vmem:[%s3000_s22 + $0x8] sm:$0xff] }
 0xa4f   : > { %v1413_v46 = vpop.xlane.xlu0 %1412 }
 0xa50   : > { %2213 = vpow2.f32 %v1590_v45 }
 0xa51   : > { %2215 = vrcp.f32 %v1413_v46 }
 0xa52   : > { %2217 = vpow2.f32 %v1529_v54 }
 0xa56   : > { %v2214_v47 = vpop.eup %2213 }
 0xa57   : > { %v2216_v48 = vpop.eup %2215  ;;  %v1592_v49 = vsel %vm1404_vm5, %v2214_v47, 0.0 }
 0xa58   : > { %v1415_v50 = vmul.f32 %v2216_v48, %v2210_v30  ;;  %1593 = vadd.xlane.f32.xlu1 %v1592_v49  ;;  %v2218_v55 = vpop.eup %2217 }
 0xa59   : > { %v1531_v56 = vsel %vm1404_vm5, %v2218_v55, 0.0 }
 0xa5a   : > { %v1416_v51 = vsel %vm2883_vm4, %v1415_v50, 0.0  ;;  %v2183_v50 = vld [vmem:[#allocation11] ss:$0 sm:$0xff] }
 0xa5b   : > { %v1417_v52 = vpack.c.bf16 %v1416_v51, %v1416_v51 }
 0xa5c   : > { %1477 = vrot.lane.b32.xlu0 %v2797_v32, %s2469_s3  ;;  %s3043_s3 = smov 24  }
 0xa5d   : > { %2011 = vmatmul.msk.bf16.vlgmr.msrb.gmra.mxu0 %vm1404_vm5, %v1417_v52 }
 0xa5e   : > { %1724 = vmatpush.bf16.msrb.mxu0 %v2067_v39 }
 0xa71   : > { %1599 = vrot.lane.b32.xlu1 %v2797_v32, %s2475_s6 }
 0xa86   : > { %1532 = vadd.xlane.f32.xlu0 %v1531_v56 }
 0xabb   : > { %v1472_v57 = vpop.xlane.xlu0 %1471 }
 0xabc   : > { %2219 = vrcp.f32 %v1472_v57  ;;  %v2068_v57 = vld [vmem:[%s3000_s22] sm:$0xff] }
 0xac2   : > { %v2220_v58 = vpop.eup %2219 }
 0xac3   : > { %v1474_v59 = vmul.f32 %v2220_v58, %v2212_v40  ;;  %v2071_v40 = vld [vmem:[%s3000_s22 + $0x18] sm:$0xff]  ;;  %v2185_v58 = vld [vmem:[#allocation14] ss:$0 sm:$0xff] }
 0xac4   : > { %1777 = vmatpush.bf16.msrb.mxu1 %v2071_v40 }
 0xac5   : > { %v1475_v60 = vsel %vm2883_vm4, %v1474_v59, 0.0 }
 0xac6   : > { %v1476_v37 = vpack.c.bf16 %v1475_v60, %v1475_v60 }
 0xac8   : > { %1778 = vmatpush.bf16.msrb.mxu1 %v2070_v43 }
 0xacb   : > { %v1594_v62 = vpop.xlane.xlu1 %1593 }
 0xacc   : > { %2221 = vrcp.f32 %v1594_v62  ;;  %1779 = vmatpush.bf16.msrb.mxu1 %v2069_v0 }
 0xace   : > { %v1478_v61 = vpop.permute.xlu0 %1477 }
 0xacf   : > { %1490 = vmatpush.bf16.msrb.mxu2 %v1478_v61 }
 0xad0   : > { %1780 = vmatpush.bf16.msrb.mxu1 %v2068_v57 }
 0xad2   : > { %2013 = vmatmul.msk.bf16.vlgmr.msrb.gmra.mxu2 %vm1404_vm5, %v1476_v37  ;;  %v2222_v1 = vpop.eup %2221 }
 0xad3   : > { %v1596_v2 = vmul.f32 %v2222_v1, %v2214_v47 }
 0xad5   : > { %v1597_v3 = vsel %vm2883_vm4, %v1596_v2, 0.0 }
 0xad6   : > { %v1598_v6 = vpack.c.bf16 %v1597_v3, %v1597_v3 }
 0xada   : > { %v1434_v32 = vpop.f32.mrf.mxu0 }
 0xadb   : > { %1438 = vst.msk [vmem:[#allocation4] sm:$0xff] %vm1008_vm7, %v1434_v32  ;;  %v2186_v32 = vld [vmem:[#allocation15] ss:$0 sm:$0xff] }
 0xae2   : > { %v1436_v4 = vpop.f32.mrf.mxu0 }
 0xae3   : > { %v1600_v5 = vpop.permute.xlu1 %1599 }
 0xae4   : > { %1612 = vmatpush.bf16.msra.mxu2 %v1600_v5 }
 0xae7   : > { %2017 = vmatmul.msk.bf16.vlgmr.msra.gmra.mxu2 %vm1404_vm5, %v1598_v6 }
 0xaf9   : > { %v1533_v7 = vpop.xlane.xlu0 %1532 }
 0xafa   : > { %2223 = vrcp.f32 %v1533_v7 }
 0xb00   : > { %v2224_v9 = vpop.eup %2223 }
 0xb01   : > { %v1535_v10 = vmul.f32 %v2224_v9, %v2218_v55 }
 0xb03   : > { %v1536_v12 = vsel %vm2883_vm4, %v1535_v10, 0.0 }
 0xb04   : > { %v1537_v13 = vpack.c.bf16 %v1536_v12, %v1536_v12 }
 0xb06   : > { %2015 = vmatmul.msk.bf16.vlgmr.msra.gmra.mxu0 %vm1404_vm5, %v1537_v13 }
 0xb55   : > { %v1492_v14 = vpop.f32.mrf.mxu2 }
 0xb56   : > { %1497 = vrot.lane.b32.xlu2 %v1492_v14, %s2480_s27 }
 0xb5d   : > { %v1494_v15 = vpop.f32.mrf.mxu2 }
 0xb6a   : > { %v1614_v16 = vpop.f32.mrf.mxu2 }
 0xb6b   : > { %1619 = vrot.lane.b32.xlu2 %v1614_v16, %s3043_s3 }
 0xb72   : > { %v1616_v63 = vpop.f32.mrf.mxu2 }
 0xb83   : > { %v1553_v17 = vpop.f32.mrf.mxu0 }
 0xb84   : > { %1558 = vrot.lane.b32.xlu1 %v1553_v17, %s3044_s30 }
 0xb8b   : > { %v1555_v18 = vpop.f32.mrf.mxu0 }
 0xbb0   : > { %v1498_v19 = vpop.permute.xlu2 %1497 }
 0xbb1   : > { %1500 = vst.msk [vmem:[#allocation4] sm:$0xff] %vm1128_vm12, %v1498_v19 }
 0xbc5   : > { %v1620_v22 = vpop.permute.xlu2 %1619 }
 0xbf6   : > { %v1559_v21 = vpop.permute.xlu1 %1558 }
 0xbf7   : > { %1561 = vst.msk [vmem:[#allocation4] sm:$0xff] %vm1192_vm13, %v1559_v21 }
 0xbf8   : > { %1622 = vst.msk [vmem:[#allocation4] sm:$0xff] %vm1256_vm14, %v1620_v22 }
 0xbff   : > { %v1623_v23 = vld [vmem:[#allocation4] sm:$0xff] }
 0xc00   : > { %v1624_v24 = vpack.c.bf16 %v1623_v23, %v1623_v23 }
 0xc02   : > { %2026 = vmatmul.msk.bf16.vlgmr.msrb.gmra.mxu3 %vm865_vm0, %v1624_v24 }
 0xc85   : > { %v1657_v26 = vpop.f32.mrf.mxu3 }
 0xc86   : > { %v1658_v27 = vadd.f32 %v2182_v25, %v1657_v26 }
 0xc88   : > { %v1661_v28 = vadd.f32 %v1658_v27, %v2849_v35  ;;  %v2066_v35 = vld [vmem:[%s2998_s20] sm:$0xff] }
 0xc89   : > { %1725 = vmatpush.bf16.msrb.mxu0 %v2066_v35 }
 0xc8a   : > { %v1664_v29 = vsel %vm865_vm0, %v1661_v28, 0.0 }
 0xc8b   : > { %1665 = vadd.xlane.f32.xlu1 %v1664_v29 }
 0xc8d   : > { %v1659_v30 = vpop.f32.mrf.mxu3 }
 0xcfe   : > { %v1666_v31 = vpop.xlane.xlu1 %1665 }
 0xcff   : > { %v1667_v33 = vmul.f32 %v1666_v31, %v2711_v8 }
 0xd01   : > { %v1668_v34 = vsub.f32 %v1661_v28, %v1667_v33 }
 0xd03   : > { %v1669_v36 = vmul.f32 %v1668_v34, %v1668_v34 }
 0xd05   : > { %v1670_v38 = vsel %vm865_vm0, %v1669_v36, 0.0 }
 0xd06   : > { %1671 = vadd.xlane.f32.xlu2 %v1670_v38 }
 0xd79   : > { %v1672_v41 = vpop.xlane.xlu2 %1671 }
 0xd7a   : > { %v1673_v42 = vmul.f32 %v1672_v41, %v2711_v8 }
 0xd7c   : > { %v1674_v44 = vadd.f32 1e-05, %v1673_v42 }
 0xd7e   : > { %2225 = vrsqrt.f32 %v1674_v44  ;;  %vm1681_vm7 = vweird.f32 %v1674_v44 }
 0xd84   : > { %v2226_v45 = vpop.eup %2225 }
 0xd85   : > { %v1676_v46 = vmul.f32 %v2226_v45, %v1674_v44  ;;  %vm1682_vm6 = vweird.f32 %v2226_v45 }
 0xd86   : > { %vm1683_vm9 = vmor %vm1681_vm7, %vm1682_vm6 }
 0xd87   : > { %v1677_v47 = vmul.f32 %v2226_v45, %v1676_v46 }
 0xd89   : > { %v1678_v48 = vmul.f32 0.5, %v1677_v47 }
 0xd8b   : > { %v1679_v49 = vsub.f32 1.5, %v1678_v48 }
 0xd8d   : > { %v1680_v8 = vmul.f32 %v2226_v45, %v1679_v49 }
 0xd8f   : > { %v1684_v51 = vsel %vm1683_vm9, %v2226_v45, %v1680_v8 }
 0xd90   : > { %v1685_v52 = vmul.f32 %v1684_v51, %v1668_v34 }
 0xd92   : > { %v1689_v54 = vmul.f32 %v2183_v50, %v1685_v52 }
 0xd94   : > { %v1693_v55 = vadd.f32 %v2184_v53, %v1689_v54 }
 0xd96   : > { %v1694_v56 = vpack.c.bf16 %v1693_v55, %v1693_v55 }
 0xd98   : > { %2035 = vmatmul.msk.bf16.vlgmr.msrb.gmra.mxu0 %vm865_vm0, %v1694_v56 }
 0xe15   : > { %v1727_v59 = vpop.f32.mrf.mxu0 }
 0xe16   : > { %v1728_v60 = vadd.f32 %v2185_v58, %v1727_v59 }
 0xe18   : > { %v1731_v61 = vmax.f32 %v1728_v60, 0.0 }
 0xe1a   : > { %v1732_v37 = vpack.c.bf16 %v1731_v61, %v1731_v61 }
 0xe1c   : > { %2052 = vmatmul.msk.bf16.vlgmr.msrb.gmra.mxu1 %vm982_vm8, %v1732_v37 }
 0xe1d   : > { %v1729_v62 = vpop.f32.mrf.mxu0 }
 0xe99   : > { %v1782_v1 = vpop.f32.mrf.mxu1 }
 0xe9a   : > { %v1783_v2 = vadd.f32 %v2186_v32, %v1782_v1 }
 0xe9c   : > { %v1786_v3 = vadd.f32 %v1783_v2, %v1661_v28 }
 0xe9e   : > { %1787 = vst.msk [vmem:[%s856_s29] sm:$0xff] %vm865_vm0, %v1786_v3 }
 0xea1   : > { %v1784_v4 = vpop.f32.mrf.mxu1 }
 0xea2 PF: > { %s3047_s1 = sld [smem:[#allocation22_spill]]  ;;  %s3048_s6 = smov %s2455_s2 }
 0xea3   : > { %s3049_s2 = smov %s3051_s0 }
 0xea8   : > { %s46_s29 = sadd.s32 1, %s3047_s1  }
 0xea9   : > { %p43_p8 = scmp.ge.s32.totalorder %s46_s29, 4  }
 0xeab   :  { %45 = sbr.rel (!%p43_p8) target bundleno = 30 (0x1e), region = 179 }
 0xeb0   :  { %1813 = vsyncpa [#allocation8], 1 }
 0xeb1   :  { %1815 = vsyncpa [#allocation8 + $0x1], 1 }
 0xeb2   :  { %1816 = vsyncpa [#allocation10], 1 }
 0xeb3   :  { %1817 = vsyncpa [#allocation13], 1 }
 0xeb4   :  { %1818 = vsyncpa [#allocation16], 1 }

</bundles_post_ra>
